<compile_context>
chip_gen: v5e
topology: v5e:2x2
jax: 0.10.0
libtpu: 0.0.40
codegen_flags: <defaults>
</compile_context>

<pallas_src>
import jax
import jax.numpy as jnp
from jax.experimental import pallas as pl
from jax.experimental.pallas import tpu as pltpu


# ----------------------------- in-kernel math helpers -----------------------------

def _gelu(x):
    # tanh-form GELU rewritten as a logistic:
    #   0.5*x*(1 + tanh(c*(x + 0.044715*x^3))) == x * sigmoid(2c*(x + 0.044715*x^3)),
    # c = sqrt(2/pi).  The logistic lands on the EUP (free VLIW slot); ~6 VALU ops/elem.
    inner = x + 0.044715 * (x * x * x)
    return x * jax.nn.sigmoid(1.5957691216057308 * inner)


# packed depthwise-kernel row bases within the (27, C) single-C pack
_DW_LI, _DW_DWC, _DW_PRJ = 0, 9, 18
# packed (1, C)-bias rows of the (6, C) pack
_B_LI1, _B_LIDW, _B_LI2, _B_DWC, _B_PRJ, _B_FC2 = range(6)


def _zero_border(ref):
    """Zero only the 1-px border of a (H+2, W+2, cw) padded scratch."""
    Hp2, Wp2, cw = ref.shape
    z_row = jnp.zeros((1, Wp2, cw), jnp.float32)
    ref[0:1, :, :] = z_row
    ref[Hp2 - 1:Hp2, :, :] = z_row
    z_col = jnp.zeros((Hp2 - 2, 1, cw), jnp.float32)
    ref[1:Hp2 - 1, 0:1, :] = z_col
    ref[1:Hp2 - 1, Wp2 - 1:Wp2, :] = z_col


def _dwconv3x3(x2d, taps, base, b1c, pad_ref, H, W):
    """Depthwise 3x3 conv, stride 1, zero padding 1, channels-last.

    x2d: (H*W, cw).  taps: (n, cw) packed taps; this conv's taps live at rows
    [base, base+9).  b1c: (1, cw).  pad_ref: persistent (H+2, W+2, cw) VMEM scratch whose
    1-px border is zero (interior is fully rewritten here before any read).
    The accumulator stays 3-D and is initialised with the tap-0 product (no memset).
    """
    cw = x2d.shape[-1]
    pad_ref[1:H + 1, 1:W + 1, :] = x2d.reshape(H, W, cw)
    acc = pad_ref[0:H, 0:W, :] * taps[base:base + 1, :].reshape(1, 1, cw)
    for tap in range(1, 9):
        ki, kj = tap // 3, tap % 3
        wk = taps[base + tap:base + tap + 1, :].reshape(1, 1, cw)
        acc = acc + pad_ref[ki:ki + H, kj:kj + W, :] * wk
    return (acc + b1c.reshape(1, 1, cw)).reshape(H * W, cw)


# ----------------------------------- the kernel ------------------------------------

def additive_block_kernel(x_ref, dwc_ref, bc_ref, dwqk_ref, bqk_ref, wcc_ref,
                          qkw_ref, pw2_ref, chw_ref, fc1w_ref, fc1b_ref, fc2w_ref,
                          out_ref, pad_c, pad_qk):
    Hp2, Wp2, C = pad_c.shape
    H, W = Hp2 - 2, Wp2 - 2
    HW = H * W
    bf16, f32 = jnp.bfloat16, jnp.float32

    # Border-only zeroing, once per grid step (each conv rewrites the interior before
    # reading; with a core-parallel batch axis each core zeroes its own scratch).
    _zero_border(pad_c)
    _zero_border(pad_qk)

    dw_c = dwc_ref[...]                                   # (27, C) packed dw taps
    b_c = bc_ref[...]                                     # (6, C)  packed biases

    def bias(i):
        return b_c[i:i + 1, :]

    li_w1 = wcc_ref[0:C, :]                               # (C, C)  bf16
    li_w2 = wcc_ref[C:2 * C, :]                           # (C, C)  bf16
    v_w = wcc_ref[2 * C:3 * C, :]                         # (C, C)  bf16

    x2d = x_ref[0]                                        # (HW, C) f32

    # ---- LocalIntegration: conv1x1 -> GELU -> dw3x3 -> ReLU -> conv1x1 (residual) ----
    t = jnp.dot(x2d.astype(bf16), li_w1, preferred_element_type=f32) + bias(_B_LI1)
    t = _gelu(t)
    t = _dwconv3x3(t, dw_c, _DW_LI, bias(_B_LIDW), pad_c, H, W)
    t = jnp.maximum(t, 0.0)
    t = jnp.dot(t.astype(bf16), li_w2, preferred_element_type=f32) + bias(_B_LI2)
    x2d = x2d + t

    # ---- AdditiveTokenMixer on norm1(x) == GELU(x) (residual) ----
    xn = _gelu(x2d).astype(bf16)
    qk = jnp.dot(xn, qkw_ref[...], preferred_element_type=f32)       # (HW, 2C), no bias
    v = jnp.dot(xn, v_w, preferred_element_type=f32)                 # (HW, C),  no bias

    # fused SpatialOperation for q and k (eval-mode BN already folded into taps/bias):
    # dw3x3 -> ReLU -> per-location gate via an MXU (2C,2) matmul -> sigmoid.
    a = _dwconv3x3(qk, dwqk_ref[...], 0, bqk_ref[...], pad_qk, H, W)  # (HW, 2C)
    a = jnp.maximum(a, 0.0)
    s2 = jax.nn.sigmoid(jnp.dot(a.astype(bf16), pw2_ref[...],
                                preferred_element_type=f32))          # (HW, 2)
    col = jax.lax.broadcasted_iota(jnp.int32, (1, 2 * C), 1)
    gate = jnp.where(col < C,
                     jnp.broadcast_to(s2[:, 0:1], (HW, 2 * C)),
                     jnp.broadcast_to(s2[:, 1:2], (HW, 2 * C)))
    qk = qk * gate

    # fused ChannelOperation: global avg pool -> block-diagonal (2C,2C) 1x1 -> sigmoid.
    pooled = jnp.mean(qk, axis=0, keepdims=True)                      # (1, 2C)
    cgate = jax.nn.sigmoid(jnp.dot(pooled.astype(bf16), chw_ref[...],
                                   preferred_element_type=f32))       # (1, 2C)
    qk = qk * cgate

    # TODO(synk): this split is lane-unaligned only when C < 128 (moot at real C >= 128).
    qpk = qk[:, 0:C] + qk[:, C:2 * C]
    s = _dwconv3x3(qpk, dw_c, _DW_DWC, bias(_B_DWC), pad_c, H, W) * v
    o = _dwconv3x3(s, dw_c, _DW_PRJ, bias(_B_PRJ), pad_c, H, W)
    x2d = x2d + o

    # ---- Mlp on norm2(x) == GELU(x): conv1x1 -> ReLU -> conv1x1 (residual) ----
    xn = _gelu(x2d).astype(bf16)
    h = jnp.dot(xn, fc1w_ref[...], preferred_element_type=f32) + fc1b_ref[...]
    h = jnp.maximum(h, 0.0)
    h = jnp.dot(h.astype(bf16), fc2w_ref[...], preferred_element_type=f32) + bias(_B_FC2)
    x2d = x2d + h

    # TODO(synk): for C < 128 this store is lane-masked; a lane-dense output view (or
    # padding C to 128 at pack time) is a measured A/B follow-up, gated on C.
    out_ref[0] = x2d


# ----------------------------------- wrapper ----------------------------------------

def additive_block(x_nhwc, packed):
    B, H, W, C = x_nhwc.shape
    x_tok = x_nhwc.reshape(B, H * W, C)          # free for contiguous NHWC
    tok_spec = pl.BlockSpec((1, H * W, C), lambda b: (b, 0, 0))
    param_specs = [pl.BlockSpec(p.shape, lambda b: (0, 0)) for p in packed]  # all 2-D

    out_tok = pl.pallas_call(
        additive_block_kernel,
        out_shape=jax.ShapeDtypeStruct((B, H * W, C), jnp.float32),
        grid_spec=pltpu.PrefetchScalarGridSpec(
            num_scalar_prefetch=0,
            grid=(B,),                           # batch axis; "parallel" => 2x on v7x megacore
            in_specs=[tok_spec] + param_specs,
            out_specs=tok_spec,
            scratch_shapes=[
                pltpu.VMEM((H + 2, W + 2, C), jnp.float32),       # single-C dw convs
                pltpu.VMEM((H + 2, W + 2, 2 * C), jnp.float32),   # fused q/k dw conv
            ],
        ),
        compiler_params=pltpu.CompilerParams(dimension_semantics=("parallel",)),
        # TODO(synk): at real rcvit sizes set vmem_limit_bytes (v6e/v5e) or row-tile with
        # a 4-row halo + cross-tile pooling (v7x); whole-image-per-step fits toy shapes.
    )(x_tok, *packed)
    return out_tok.reshape(B, H, W, C)


# ------------------------- deterministic params + packing ---------------------------

def init_params(key, C, Hd):
    """Raw parameters in torch-equivalent (channels-last-transposed) layouts."""
    keys = iter(jax.random.split(key, 64))

    def w(shape, scale=0.2):
        return (scale * jax.random.normal(next(keys), shape)).astype(jnp.float32)

    def bn_set():
        g = (1.0 + 0.1 * jax.random.normal(next(keys), (1, C))).astype(jnp.float32)
        b = w((1, C), 0.1)
        m = w((1, C), 0.1)
        v = (1.0 + 0.1 * jnp.abs(jax.random.normal(next(keys), (1, C)))).astype(jnp.float32)
        return g, b, m, v

    def sp_ch():
        return dict(dww=w((9, C)), dwb=w((1, C), 0.1), bn=bn_set(),
                    pw=w((1, C)), chw=w((C, C)))

    return dict(
        li_w1=w((C, C)), li_b1=w((1, C), 0.1),
        li_dww=w((9, C)), li_dwb=w((1, C), 0.1),
        li_w2=w((C, C)), li_b2=w((1, C), 0.1),
        q_w=w((C, C)), k_w=w((C, C)), v_w=w((C, C)),        # qkv 1x1 conv, no bias
        oper_q=sp_ch(), oper_k=sp_ch(),
        dwc_w=w((9, C)), dwc_b=w((1, C), 0.1),
        prj_w=w((9, C)), prj_b=w((1, C), 0.1),
        fc1_w=w((C, Hd)), fc1_b=w((1, Hd), 0.1),
        fc2_w=w((Hd, C)), fc2_b=w((1, C), 0.1),
    )


def pack_params(p):
    """Fold eval-mode BatchNorm into the q/k dw convs, fuse q/k weights channel-wise,
    and store all matmul weights as bf16."""
    eps = 1e-5
    f32, bf16 = jnp.float32, jnp.bfloat16
    C = p["li_w1"].shape[0]

    def fold(dww, dwb, bn):
        g, b, m, v = bn
        s = g * jax.lax.rsqrt(v + eps)
        return dww * s, (dwb - m) * s + b                    # exact eval-mode BN fold

    qs_dww, qs_dwb = fold(p["oper_q"]["dww"], p["oper_q"]["dwb"], p["oper_q"]["bn"])
    ks_dww, ks_dwb = fold(p["oper_k"]["dww"], p["oper_k"]["dwb"], p["oper_k"]["bn"])

    # single-C depthwise taps / biases
    dw_c = jnp.concatenate([p["li_dww"], p["dwc_w"], p["prj_w"]], axis=0).astype(f32)     # (27, C)
    b_c = jnp.concatenate([p["li_b1"], p["li_dwb"], p["li_b2"],
                           p["dwc_b"], p["prj_b"], p["fc2_b"]], axis=0).astype(f32)       # (6, C)
    # fused q/k depthwise taps / biases (channel-concatenated)
    dw_qk = jnp.concatenate([qs_dww, ks_dww], axis=1).astype(f32)                          # (9, 2C)
    b_qk = jnp.concatenate([qs_dwb, ks_dwb], axis=1).astype(f32)                           # (1, 2C)

    # bf16 matmul weights
    wcc = jnp.concatenate([p["li_w1"], p["li_w2"], p["v_w"]], axis=0).astype(bf16)         # (3C, C)
    qk_w = jnp.concatenate([p["q_w"], p["k_w"]], axis=1).astype(bf16)                      # (C, 2C)

    # spatial-gate weight (2C, 2): col 0 = q's pw over first C rows, col 1 = k's pw.
    zc = jnp.zeros((C, 1), f32)
    pw2 = jnp.concatenate([
        jnp.concatenate([p["oper_q"]["pw"].reshape(C, 1), zc], axis=1),
        jnp.concatenate([zc, p["oper_k"]["pw"].reshape(C, 1)], axis=1)], axis=0).astype(bf16)

    # block-diagonal channel-gate weight (2C, 2C)
    zcc = jnp.zeros((C, C), f32)
    chw = jnp.concatenate([
        jnp.concatenate([p["oper_q"]["chw"], zcc], axis=1),
        jnp.concatenate([zcc, p["oper_k"]["chw"]], axis=1)], axis=0).astype(bf16)

    return (dw_c, b_c, dw_qk, b_qk, wcc, qk_w, pw2, chw,
            p["fc1_w"].astype(bf16), p["fc1_b"].astype(f32), p["fc2_w"].astype(bf16))


if __name__ == "__main__":
    B, C, H, W = 2, 32, 8, 8          # dim=32, spatial 8x8
    mlp_ratio = 4.0
    Hd = int(C * mlp_ratio)

    key = jax.random.PRNGKey(0)
    kx, kp = jax.random.split(key)
    x_nchw = jax.random.normal(kx, (B, C, H, W), dtype=jnp.float32)   # PyTorch layout
    packed = pack_params(init_params(kp, C, Hd))

    x_nhwc = jnp.transpose(x_nchw, (0, 2, 3, 1))                      # -> kernel layout
    y_nhwc = additive_block(x_nhwc, packed)
    y = jnp.transpose(y_nhwc, (0, 3, 1, 2))                           # back to NCHW
    jax.block_until_ready(y)

    assert y.shape == (B, C, H, W)
    assert bool(jnp.all(jnp.isfinite(y)))
    print("KERNEL_OK")
</pallas_src>

<mosaic_0001>
module attributes {stable_mosaic.version = 11 : i64} {
  func.func @additive_block_kernel(%arg0: i32, %arg1: memref<1x64x32xf32, #tpu.memory_space<vmem>>, %arg2: memref<27x32xf32, #tpu.memory_space<vmem>>, %arg3: memref<6x32xf32, #tpu.memory_space<vmem>>, %arg4: memref<9x64xf32, #tpu.memory_space<vmem>>, %arg5: memref<1x64xf32, #tpu.memory_space<vmem>>, %arg6: memref<96x32xbf16, #tpu.memory_space<vmem>>, %arg7: memref<32x64xbf16, #tpu.memory_space<vmem>>, %arg8: memref<64x2xbf16, #tpu.memory_space<vmem>>, %arg9: memref<64x64xbf16, #tpu.memory_space<vmem>>, %arg10: memref<32x128xbf16, #tpu.memory_space<vmem>>, %arg11: memref<1x128xf32, #tpu.memory_space<vmem>>, %arg12: memref<128x32xbf16, #tpu.memory_space<vmem>>, %arg13: memref<1x64x32xf32, #tpu.memory_space<vmem>>, %arg14: memref<10x10x32xf32, #tpu.memory_space<vmem>>, %arg15: memref<10x10x64xf32, #tpu.memory_space<vmem>>) attributes {dimension_semantics = [#tpu.dimension_semantics<parallel>], iteration_bounds = array<i64: 2>, scalar_prefetch = 0 : i64, scratch_operands = 2 : i64, tpu.core_type = #tpu.core_type<tc>, window_params = [{transform_indices = @transform_0, window_bounds = array<i64: 1, 64, 32>}, {pipeline_mode = #tpu.pipeline_mode<synchronous>, transform_indices = @transform_1, window_bounds = array<i64: 27, 32>}, {pipeline_mode = #tpu.pipeline_mode<synchronous>, transform_indices = @transform_2, window_bounds = array<i64: 6, 32>}, {pipeline_mode = #tpu.pipeline_mode<synchronous>, transform_indices = @transform_3, window_bounds = array<i64: 9, 64>}, {pipeline_mode = #tpu.pipeline_mode<synchronous>, transform_indices = @transform_4, window_bounds = array<i64: 1, 64>}, {pipeline_mode = #tpu.pipeline_mode<synchronous>, transform_indices = @transform_5, window_bounds = array<i64: 96, 32>}, {pipeline_mode = #tpu.pipeline_mode<synchronous>, transform_indices = @transform_6, window_bounds = array<i64: 32, 64>}, {pipeline_mode = #tpu.pipeline_mode<synchronous>, transform_indices = @transform_7, window_bounds = array<i64: 64, 2>}, {pipeline_mode = #tpu.pipeline_mode<synchronous>, transform_indices = @transform_8, window_bounds = array<i64: 64, 64>}, {pipeline_mode = #tpu.pipeline_mode<synchronous>, transform_indices = @transform_9, window_bounds = array<i64: 32, 128>}, {pipeline_mode = #tpu.pipeline_mode<synchronous>, transform_indices = @transform_10, window_bounds = array<i64: 1, 128>}, {pipeline_mode = #tpu.pipeline_mode<synchronous>, transform_indices = @transform_11, window_bounds = array<i64: 128, 32>}, {transform_indices = @transform_12, window_bounds = array<i64: 1, 64, 32>}]} {
    %cst = arith.constant 0.000000e+00 : f32
    %0 = vector.broadcast %cst : f32 to vector<1x10x32xf32>
    %c0 = arith.constant 0 : index
    %c0_0 = arith.constant 0 : index
    %c0_1 = arith.constant 0 : index
    %1 = vector.load %arg14[%c0, %c0_0, %c0_1] : memref<10x10x32xf32, #tpu.memory_space<vmem>>, vector<1x10x32xf32>
    tpu.vector_store %arg14[%c0, %c0_0, %c0_1], %0 {strides = array<i32>} : memref<10x10x32xf32, #tpu.memory_space<vmem>>, vector<1x10x32xf32>,
    %c9 = arith.constant 9 : index
    %c0_2 = arith.constant 0 : index
    %c0_3 = arith.constant 0 : index
    %2 = vector.load %arg14[%c9, %c0_2, %c0_3] : memref<10x10x32xf32, #tpu.memory_space<vmem>>, vector<1x10x32xf32>
    tpu.vector_store %arg14[%c9, %c0_2, %c0_3], %0 {strides = array<i32>} : memref<10x10x32xf32, #tpu.memory_space<vmem>>, vector<1x10x32xf32>,
    %cst_4 = arith.constant 0.000000e+00 : f32
    %3 = vector.broadcast %cst_4 : f32 to vector<8x1x32xf32>
    %c1 = arith.constant 1 : index
    %c0_5 = arith.constant 0 : index
    %c0_6 = arith.constant 0 : index
    %4 = vector.load %arg14[%c1, %c0_5, %c0_6] : memref<10x10x32xf32, #tpu.memory_space<vmem>>, vector<8x1x32xf32>
    tpu.vector_store %arg14[%c1, %c0_5, %c0_6], %3 {strides = array<i32>} : memref<10x10x32xf32, #tpu.memory_space<vmem>>, vector<8x1x32xf32>,
    %c1_7 = arith.constant 1 : index
    %c9_8 = arith.constant 9 : index
    %c0_9 = arith.constant 0 : index
    %5 = vector.load %arg14[%c1_7, %c9_8, %c0_9] : memref<10x10x32xf32, #tpu.memory_space<vmem>>, vector<8x1x32xf32>
    tpu.vector_store %arg14[%c1_7, %c9_8, %c0_9], %3 {strides = array<i32>} : memref<10x10x32xf32, #tpu.memory_space<vmem>>, vector<8x1x32xf32>,
    %cst_10 = arith.constant 0.000000e+00 : f32
    %6 = vector.broadcast %cst_10 : f32 to vector<1x10x64xf32>
    %c0_11 = arith.constant 0 : index
    %c0_12 = arith.constant 0 : index
    %c0_13 = arith.constant 0 : index
    %7 = vector.load %arg15[%c0_11, %c0_12, %c0_13] : memref<10x10x64xf32, #tpu.memory_space<vmem>>, vector<1x10x64xf32>
    tpu.vector_store %arg15[%c0_11, %c0_12, %c0_13], %6 {strides = array<i32>} : memref<10x10x64xf32, #tpu.memory_space<vmem>>, vector<1x10x64xf32>,
    %c9_14 = arith.constant 9 : index
    %c0_15 = arith.constant 0 : index
    %c0_16 = arith.constant 0 : index
    %8 = vector.load %arg15[%c9_14, %c0_15, %c0_16] : memref<10x10x64xf32, #tpu.memory_space<vmem>>, vector<1x10x64xf32>
    tpu.vector_store %arg15[%c9_14, %c0_15, %c0_16], %6 {strides = array<i32>} : memref<10x10x64xf32, #tpu.memory_space<vmem>>, vector<1x10x64xf32>,
    %cst_17 = arith.constant 0.000000e+00 : f32
    %9 = vector.broadcast %cst_17 : f32 to vector<8x1x64xf32>
    %c1_18 = arith.constant 1 : index
    %c0_19 = arith.constant 0 : index
    %c0_20 = arith.constant 0 : index
    %10 = vector.load %arg15[%c1_18, %c0_19, %c0_20] : memref<10x10x64xf32, #tpu.memory_space<vmem>>, vector<8x1x64xf32>
    tpu.vector_store %arg15[%c1_18, %c0_19, %c0_20], %9 {strides = array<i32>} : memref<10x10x64xf32, #tpu.memory_space<vmem>>, vector<8x1x64xf32>,
    %c1_21 = arith.constant 1 : index
    %c9_22 = arith.constant 9 : index
    %c0_23 = arith.constant 0 : index
    %11 = vector.load %arg15[%c1_21, %c9_22, %c0_23] : memref<10x10x64xf32, #tpu.memory_space<vmem>>, vector<8x1x64xf32>
    tpu.vector_store %arg15[%c1_21, %c9_22, %c0_23], %9 {strides = array<i32>} : memref<10x10x64xf32, #tpu.memory_space<vmem>>, vector<8x1x64xf32>,
    %c0_24 = arith.constant 0 : index
    %c0_25 = arith.constant 0 : index
    %12 = vector.load %arg2[%c0_24, %c0_25] : memref<27x32xf32, #tpu.memory_space<vmem>>, vector<27x32xf32>
    %c0_26 = arith.constant 0 : index
    %c0_27 = arith.constant 0 : index
    %13 = vector.load %arg3[%c0_26, %c0_27] : memref<6x32xf32, #tpu.memory_space<vmem>>, vector<6x32xf32>
    %c0_28 = arith.constant 0 : index
    %c0_29 = arith.constant 0 : index
    %14 = vector.load %arg6[%c0_28, %c0_29] : memref<96x32xbf16, #tpu.memory_space<vmem>>, vector<32x32xbf16>
    %c32 = arith.constant 32 : index
    %c0_30 = arith.constant 0 : index
    %15 = vector.load %arg6[%c32, %c0_30] : memref<96x32xbf16, #tpu.memory_space<vmem>>, vector<32x32xbf16>
    %c64 = arith.constant 64 : index
    %c0_31 = arith.constant 0 : index
    %16 = vector.load %arg6[%c64, %c0_31] : memref<96x32xbf16, #tpu.memory_space<vmem>>, vector<32x32xbf16>
    %c0_32 = arith.constant 0 : index
    %c0_33 = arith.constant 0 : index
    %c0_34 = arith.constant 0 : index
    %17 = vector.load %arg1[%c0_32, %c0_33, %c0_34] : memref<1x64x32xf32, #tpu.memory_space<vmem>>, vector<1x64x32xf32>
    %18 = vector.shape_cast %17 : vector<1x64x32xf32> to vector<64x32xf32>
    %19 = arith.truncf %18 : vector<64x32xf32> to vector<64x32xbf16>
    %cst_35 = arith.constant dense<0.000000e+00> : vector<64x32xf32>
    %20 = tpu.matmul %19, %14, %cst_35 {dimension_numbers = #tpu.dot_dimension_numbers<[1], [0], [0], [1], [0, 0, 1, 1], [], []>} : vector<64x32xbf16>, vector<32x32xbf16>, vector<64x32xf32> -> vector<64x32xf32>
    %21 = vector.extract_strided_slice %13 {offsets = [0, 0], sizes = [1, 32], strides = [1, 1]} : vector<6x32xf32> to vector<1x32xf32>
    %22 = vector.broadcast %21 : vector<1x32xf32> to vector<64x32xf32>
    %23 = arith.addf %20, %22 : vector<64x32xf32>
    %24 = arith.mulf %23, %23 : vector<64x32xf32>
    %25 = arith.mulf %24, %23 : vector<64x32xf32>
    %cst_36 = arith.constant 4.471500e-02 : f32
    %26 = vector.broadcast %cst_36 : f32 to vector<64x32xf32>
    %27 = arith.mulf %26, %25 : vector<64x32xf32>
    %28 = arith.addf %23, %27 : vector<64x32xf32>
    %cst_37 = arith.constant 1.59576917 : f32
    %29 = vector.broadcast %cst_37 : f32 to vector<64x32xf32>
    %30 = arith.mulf %29, %28 : vector<64x32xf32>
    %31 = arith.negf %30 : vector<64x32xf32>
    %32 = math.exp %31 : vector<64x32xf32>
    %cst_38 = arith.constant 1.000000e+00 : f32
    %33 = vector.broadcast %cst_38 : f32 to vector<64x32xf32>
    %34 = arith.addf %33, %32 : vector<64x32xf32>
    %35 = arith.divf %33, %34 : vector<64x32xf32>
    %36 = arith.mulf %23, %35 : vector<64x32xf32>
    %37 = vector.extract_strided_slice %13 {offsets = [1, 0], sizes = [1, 32], strides = [1, 1]} : vector<6x32xf32> to vector<1x32xf32>
    %38 = vector.shape_cast %36 : vector<64x32xf32> to vector<8x8x32xf32>
    %c1_39 = arith.constant 1 : index
    %c1_40 = arith.constant 1 : index
    %c0_41 = arith.constant 0 : index
    %39 = vector.load %arg14[%c1_39, %c1_40, %c0_41] : memref<10x10x32xf32, #tpu.memory_space<vmem>>, vector<8x8x32xf32>
    tpu.vector_store %arg14[%c1_39, %c1_40, %c0_41], %38 {strides = array<i32>} : memref<10x10x32xf32, #tpu.memory_space<vmem>>, vector<8x8x32xf32>,
    %c0_42 = arith.constant 0 : index
    %c0_43 = arith.constant 0 : index
    %c0_44 = arith.constant 0 : index
    %40 = vector.load %arg14[%c0_42, %c0_43, %c0_44] : memref<10x10x32xf32, #tpu.memory_space<vmem>>, vector<8x8x32xf32>
    %41 = vector.extract_strided_slice %12 {offsets = [0, 0], sizes = [1, 32], strides = [1, 1]} : vector<27x32xf32> to vector<1x32xf32>
    %42 = vector.shape_cast %41 : vector<1x32xf32> to vector<1x1x32xf32>
    %43 = vector.broadcast %42 : vector<1x1x32xf32> to vector<8x8x32xf32>
    %44 = arith.mulf %40, %43 : vector<8x8x32xf32>
    %45 = vector.extract_strided_slice %12 {offsets = [1, 0], sizes = [1, 32], strides = [1, 1]} : vector<27x32xf32> to vector<1x32xf32>
    %46 = vector.shape_cast %45 : vector<1x32xf32> to vector<1x1x32xf32>
    %c0_45 = arith.constant 0 : index
    %c1_46 = arith.constant 1 : index
    %c0_47 = arith.constant 0 : index
    %47 = vector.load %arg14[%c0_45, %c1_46, %c0_47] : memref<10x10x32xf32, #tpu.memory_space<vmem>>, vector<8x8x32xf32>
    %48 = vector.broadcast %46 : vector<1x1x32xf32> to vector<8x8x32xf32>
    %49 = arith.mulf %47, %48 : vector<8x8x32xf32>
    %50 = arith.addf %44, %49 : vector<8x8x32xf32>
    %51 = vector.extract_strided_slice %12 {offsets = [2, 0], sizes = [1, 32], strides = [1, 1]} : vector<27x32xf32> to vector<1x32xf32>
    %52 = vector.shape_cast %51 : vector<1x32xf32> to vector<1x1x32xf32>
    %c0_48 = arith.constant 0 : index
    %c2 = arith.constant 2 : index
    %c0_49 = arith.constant 0 : index
    %53 = vector.load %arg14[%c0_48, %c2, %c0_49] : memref<10x10x32xf32, #tpu.memory_space<vmem>>, vector<8x8x32xf32>
    %54 = vector.broadcast %52 : vector<1x1x32xf32> to vector<8x8x32xf32>
    %55 = arith.mulf %53, %54 : vector<8x8x32xf32>
    %56 = arith.addf %50, %55 : vector<8x8x32xf32>
    %57 = vector.extract_strided_slice %12 {offsets = [3, 0], sizes = [1, 32], strides = [1, 1]} : vector<27x32xf32> to vector<1x32xf32>
    %58 = vector.shape_cast %57 : vector<1x32xf32> to vector<1x1x32xf32>
    %c1_50 = arith.constant 1 : index
    %c0_51 = arith.constant 0 : index
    %c0_52 = arith.constant 0 : index
    %59 = vector.load %arg14[%c1_50, %c0_51, %c0_52] : memref<10x10x32xf32, #tpu.memory_space<vmem>>, vector<8x8x32xf32>
    %60 = vector.broadcast %58 : vector<1x1x32xf32> to vector<8x8x32xf32>
    %61 = arith.mulf %59, %60 : vector<8x8x32xf32>
    %62 = arith.addf %56, %61 : vector<8x8x32xf32>
    %63 = vector.extract_strided_slice %12 {offsets = [4, 0], sizes = [1, 32], strides = [1, 1]} : vector<27x32xf32> to vector<1x32xf32>
    %64 = vector.shape_cast %63 : vector<1x32xf32> to vector<1x1x32xf32>
    %c1_53 = arith.constant 1 : index
    %c1_54 = arith.constant 1 : index
    %c0_55 = arith.constant 0 : index
    %65 = vector.load %arg14[%c1_53, %c1_54, %c0_55] : memref<10x10x32xf32, #tpu.memory_space<vmem>>, vector<8x8x32xf32>
    %66 = vector.broadcast %64 : vector<1x1x32xf32> to vector<8x8x32xf32>
    %67 = arith.mulf %65, %66 : vector<8x8x32xf32>
    %68 = arith.addf %62, %67 : vector<8x8x32xf32>
    %69 = vector.extract_strided_slice %12 {offsets = [5, 0], sizes = [1, 32], strides = [1, 1]} : vector<27x32xf32> to vector<1x32xf32>
    %70 = vector.shape_cast %69 : vector<1x32xf32> to vector<1x1x32xf32>
    %c1_56 = arith.constant 1 : index
    %c2_57 = arith.constant 2 : index
    %c0_58 = arith.constant 0 : index
    %71 = vector.load %arg14[%c1_56, %c2_57, %c0_58] : memref<10x10x32xf32, #tpu.memory_space<vmem>>, vector<8x8x32xf32>
    %72 = vector.broadcast %70 : vector<1x1x32xf32> to vector<8x8x32xf32>
    %73 = arith.mulf %71, %72 : vector<8x8x32xf32>
    %74 = arith.addf %68, %73 : vector<8x8x32xf32>
    %75 = vector.extract_strided_slice %12 {offsets = [6, 0], sizes = [1, 32], strides = [1, 1]} : vector<27x32xf32> to vector<1x32xf32>
    %76 = vector.shape_cast %75 : vector<1x32xf32> to vector<1x1x32xf32>
    %c2_59 = arith.constant 2 : index
    %c0_60 = arith.constant 0 : index
    %c0_61 = arith.constant 0 : index
    %77 = vector.load %arg14[%c2_59, %c0_60, %c0_61] : memref<10x10x32xf32, #tpu.memory_space<vmem>>, vector<8x8x32xf32>
    %78 = vector.broadcast %76 : vector<1x1x32xf32> to vector<8x8x32xf32>
    %79 = arith.mulf %77, %78 : vector<8x8x32xf32>
    %80 = arith.addf %74, %79 : vector<8x8x32xf32>
    %81 = vector.extract_strided_slice %12 {offsets = [7, 0], sizes = [1, 32], strides = [1, 1]} : vector<27x32xf32> to vector<1x32xf32>
    %82 = vector.shape_cast %81 : vector<1x32xf32> to vector<1x1x32xf32>
    %c2_62 = arith.constant 2 : index
    %c1_63 = arith.constant 1 : index
    %c0_64 = arith.constant 0 : index
    %83 = vector.load %arg14[%c2_62, %c1_63, %c0_64] : memref<10x10x32xf32, #tpu.memory_space<vmem>>, vector<8x8x32xf32>
    %84 = vector.broadcast %82 : vector<1x1x32xf32> to vector<8x8x32xf32>
    %85 = arith.mulf %83, %84 : vector<8x8x32xf32>
    %86 = arith.addf %80, %85 : vector<8x8x32xf32>
    %87 = vector.extract_strided_slice %12 {offsets = [8, 0], sizes = [1, 32], strides = [1, 1]} : vector<27x32xf32> to vector<1x32xf32>
    %88 = vector.shape_cast %87 : vector<1x32xf32> to vector<1x1x32xf32>
    %c2_65 = arith.constant 2 : index
    %c2_66 = arith.constant 2 : index
    %c0_67 = arith.constant 0 : index
    %89 = vector.load %arg14[%c2_65, %c2_66, %c0_67] : memref<10x10x32xf32, #tpu.memory_space<vmem>>, vector<8x8x32xf32>
    %90 = vector.broadcast %88 : vector<1x1x32xf32> to vector<8x8x32xf32>
    %91 = arith.mulf %89, %90 : vector<8x8x32xf32>
    %92 = arith.addf %86, %91 : vector<8x8x32xf32>
    %93 = vector.shape_cast %37 : vector<1x32xf32> to vector<1x1x32xf32>
    %94 = vector.broadcast %93 : vector<1x1x32xf32> to vector<8x8x32xf32>
    %95 = arith.addf %92, %94 : vector<8x8x32xf32>
    %96 = vector.shape_cast %95 : vector<8x8x32xf32> to vector<64x32xf32>
    %cst_68 = arith.constant 0.000000e+00 : f32
    %97 = vector.broadcast %cst_68 : f32 to vector<64x32xf32>
    %98 = arith.maximumf %96, %97 : vector<64x32xf32>
    %99 = arith.truncf %98 : vector<64x32xf32> to vector<64x32xbf16>
    %cst_69 = arith.constant dense<0.000000e+00> : vector<64x32xf32>
    %100 = tpu.matmul %99, %15, %cst_69 {dimension_numbers = #tpu.dot_dimension_numbers<[1], [0], [0], [1], [0, 0, 1, 1], [], []>} : vector<64x32xbf16>, vector<32x32xbf16>, vector<64x32xf32> -> vector<64x32xf32>
    %101 = vector.extract_strided_slice %13 {offsets = [2, 0], sizes = [1, 32], strides = [1, 1]} : vector<6x32xf32> to vector<1x32xf32>
    %102 = vector.broadcast %101 : vector<1x32xf32> to vector<64x32xf32>
    %103 = arith.addf %100, %102 : vector<64x32xf32>
    %104 = arith.addf %18, %103 : vector<64x32xf32>
    %105 = arith.mulf %104, %104 : vector<64x32xf32>
    %106 = arith.mulf %105, %104 : vector<64x32xf32>
    %cst_70 = arith.constant 4.471500e-02 : f32
    %107 = vector.broadcast %cst_70 : f32 to vector<64x32xf32>
    %108 = arith.mulf %107, %106 : vector<64x32xf32>
    %109 = arith.addf %104, %108 : vector<64x32xf32>
    %cst_71 = arith.constant 1.59576917 : f32
    %110 = vector.broadcast %cst_71 : f32 to vector<64x32xf32>
    %111 = arith.mulf %110, %109 : vector<64x32xf32>
    %112 = arith.negf %111 : vector<64x32xf32>
    %113 = math.exp %112 : vector<64x32xf32>
    %cst_72 = arith.constant 1.000000e+00 : f32
    %114 = vector.broadcast %cst_72 : f32 to vector<64x32xf32>
    %115 = arith.addf %114, %113 : vector<64x32xf32>
    %116 = arith.divf %114, %115 : vector<64x32xf32>
    %117 = arith.mulf %104, %116 : vector<64x32xf32>
    %118 = arith.truncf %117 : vector<64x32xf32> to vector<64x32xbf16>
    %c0_73 = arith.constant 0 : index
    %c0_74 = arith.constant 0 : index
    %119 = vector.load %arg7[%c0_73, %c0_74] : memref<32x64xbf16, #tpu.memory_space<vmem>>, vector<32x64xbf16>
    %cst_75 = arith.constant dense<0.000000e+00> : vector<64x64xf32>
    %120 = tpu.matmul %118, %119, %cst_75 {dimension_numbers = #tpu.dot_dimension_numbers<[1], [0], [0], [1], [0, 0, 1, 1], [], []>} : vector<64x32xbf16>, vector<32x64xbf16>, vector<64x64xf32> -> vector<64x64xf32>
    %cst_76 = arith.constant dense<0.000000e+00> : vector<64x32xf32>
    %121 = tpu.matmul %118, %16, %cst_76 {dimension_numbers = #tpu.dot_dimension_numbers<[1], [0], [0], [1], [0, 0, 1, 1], [], []>} : vector<64x32xbf16>, vector<32x32xbf16>, vector<64x32xf32> -> vector<64x32xf32>
    %c0_77 = arith.constant 0 : index
    %c0_78 = arith.constant 0 : index
    %122 = vector.load %arg4[%c0_77, %c0_78] : memref<9x64xf32, #tpu.memory_space<vmem>>, vector<9x64xf32>
    %c0_79 = arith.constant 0 : index
    %c0_80 = arith.constant 0 : index
    %123 = vector.load %arg5[%c0_79, %c0_80] : memref<1x64xf32, #tpu.memory_space<vmem>>, vector<1x64xf32>
    %124 = vector.shape_cast %120 : vector<64x64xf32> to vector<8x8x64xf32>
    %c1_81 = arith.constant 1 : index
    %c1_82 = arith.constant 1 : index
    %c0_83 = arith.constant 0 : index
    %125 = vector.load %arg15[%c1_81, %c1_82, %c0_83] : memref<10x10x64xf32, #tpu.memory_space<vmem>>, vector<8x8x64xf32>
    tpu.vector_store %arg15[%c1_81, %c1_82, %c0_83], %124 {strides = array<i32>} : memref<10x10x64xf32, #tpu.memory_space<vmem>>, vector<8x8x64xf32>,
    %c0_84 = arith.constant 0 : index
    %c0_85 = arith.constant 0 : index
    %c0_86 = arith.constant 0 : index
    %126 = vector.load %arg15[%c0_84, %c0_85, %c0_86] : memref<10x10x64xf32, #tpu.memory_space<vmem>>, vector<8x8x64xf32>
    %127 = vector.extract_strided_slice %122 {offsets = [0, 0], sizes = [1, 64], strides = [1, 1]} : vector<9x64xf32> to vector<1x64xf32>
    %128 = vector.shape_cast %127 : vector<1x64xf32> to vector<1x1x64xf32>
    %129 = vector.broadcast %128 : vector<1x1x64xf32> to vector<8x8x64xf32>
    %130 = arith.mulf %126, %129 : vector<8x8x64xf32>
    %131 = vector.extract_strided_slice %122 {offsets = [1, 0], sizes = [1, 64], strides = [1, 1]} : vector<9x64xf32> to vector<1x64xf32>
    %132 = vector.shape_cast %131 : vector<1x64xf32> to vector<1x1x64xf32>
    %c0_87 = arith.constant 0 : index
    %c1_88 = arith.constant 1 : index
    %c0_89 = arith.constant 0 : index
    %133 = vector.load %arg15[%c0_87, %c1_88, %c0_89] : memref<10x10x64xf32, #tpu.memory_space<vmem>>, vector<8x8x64xf32>
    %134 = vector.broadcast %132 : vector<1x1x64xf32> to vector<8x8x64xf32>
    %135 = arith.mulf %133, %134 : vector<8x8x64xf32>
    %136 = arith.addf %130, %135 : vector<8x8x64xf32>
    %137 = vector.extract_strided_slice %122 {offsets = [2, 0], sizes = [1, 64], strides = [1, 1]} : vector<9x64xf32> to vector<1x64xf32>
    %138 = vector.shape_cast %137 : vector<1x64xf32> to vector<1x1x64xf32>
    %c0_90 = arith.constant 0 : index
    %c2_91 = arith.constant 2 : index
    %c0_92 = arith.constant 0 : index
    %139 = vector.load %arg15[%c0_90, %c2_91, %c0_92] : memref<10x10x64xf32, #tpu.memory_space<vmem>>, vector<8x8x64xf32>
    %140 = vector.broadcast %138 : vector<1x1x64xf32> to vector<8x8x64xf32>
    %141 = arith.mulf %139, %140 : vector<8x8x64xf32>
    %142 = arith.addf %136, %141 : vector<8x8x64xf32>
    %143 = vector.extract_strided_slice %122 {offsets = [3, 0], sizes = [1, 64], strides = [1, 1]} : vector<9x64xf32> to vector<1x64xf32>
    %144 = vector.shape_cast %143 : vector<1x64xf32> to vector<1x1x64xf32>
    %c1_93 = arith.constant 1 : index
    %c0_94 = arith.constant 0 : index
    %c0_95 = arith.constant 0 : index
    %145 = vector.load %arg15[%c1_93, %c0_94, %c0_95] : memref<10x10x64xf32, #tpu.memory_space<vmem>>, vector<8x8x64xf32>
    %146 = vector.broadcast %144 : vector<1x1x64xf32> to vector<8x8x64xf32>
    %147 = arith.mulf %145, %146 : vector<8x8x64xf32>
    %148 = arith.addf %142, %147 : vector<8x8x64xf32>
    %149 = vector.extract_strided_slice %122 {offsets = [4, 0], sizes = [1, 64], strides = [1, 1]} : vector<9x64xf32> to vector<1x64xf32>
    %150 = vector.shape_cast %149 : vector<1x64xf32> to vector<1x1x64xf32>
    %c1_96 = arith.constant 1 : index
    %c1_97 = arith.constant 1 : index
    %c0_98 = arith.constant 0 : index
    %151 = vector.load %arg15[%c1_96, %c1_97, %c0_98] : memref<10x10x64xf32, #tpu.memory_space<vmem>>, vector<8x8x64xf32>
    %152 = vector.broadcast %150 : vector<1x1x64xf32> to vector<8x8x64xf32>
    %153 = arith.mulf %151, %152 : vector<8x8x64xf32>
    %154 = arith.addf %148, %153 : vector<8x8x64xf32>
    %155 = vector.extract_strided_slice %122 {offsets = [5, 0], sizes = [1, 64], strides = [1, 1]} : vector<9x64xf32> to vector<1x64xf32>
    %156 = vector.shape_cast %155 : vector<1x64xf32> to vector<1x1x64xf32>
    %c1_99 = arith.constant 1 : index
    %c2_100 = arith.constant 2 : index
    %c0_101 = arith.constant 0 : index
    %157 = vector.load %arg15[%c1_99, %c2_100, %c0_101] : memref<10x10x64xf32, #tpu.memory_space<vmem>>, vector<8x8x64xf32>
    %158 = vector.broadcast %156 : vector<1x1x64xf32> to vector<8x8x64xf32>
    %159 = arith.mulf %157, %158 : vector<8x8x64xf32>
    %160 = arith.addf %154, %159 : vector<8x8x64xf32>
    %161 = vector.extract_strided_slice %122 {offsets = [6, 0], sizes = [1, 64], strides = [1, 1]} : vector<9x64xf32> to vector<1x64xf32>
    %162 = vector.shape_cast %161 : vector<1x64xf32> to vector<1x1x64xf32>
    %c2_102 = arith.constant 2 : index
    %c0_103 = arith.constant 0 : index
    %c0_104 = arith.constant 0 : index
    %163 = vector.load %arg15[%c2_102, %c0_103, %c0_104] : memref<10x10x64xf32, #tpu.memory_space<vmem>>, vector<8x8x64xf32>
    %164 = vector.broadcast %162 : vector<1x1x64xf32> to vector<8x8x64xf32>
    %165 = arith.mulf %163, %164 : vector<8x8x64xf32>
    %166 = arith.addf %160, %165 : vector<8x8x64xf32>
    %167 = vector.extract_strided_slice %122 {offsets = [7, 0], sizes = [1, 64], strides = [1, 1]} : vector<9x64xf32> to vector<1x64xf32>
    %168 = vector.shape_cast %167 : vector<1x64xf32> to vector<1x1x64xf32>
    %c2_105 = arith.constant 2 : index
    %c1_106 = arith.constant 1 : index
    %c0_107 = arith.constant 0 : index
    %169 = vector.load %arg15[%c2_105, %c1_106, %c0_107] : memref<10x10x64xf32, #tpu.memory_space<vmem>>, vector<8x8x64xf32>
    %170 = vector.broadcast %168 : vector<1x1x64xf32> to vector<8x8x64xf32>
    %171 = arith.mulf %169, %170 : vector<8x8x64xf32>
    %172 = arith.addf %166, %171 : vector<8x8x64xf32>
    %173 = vector.extract_strided_slice %122 {offsets = [8, 0], sizes = [1, 64], strides = [1, 1]} : vector<9x64xf32> to vector<1x64xf32>
    %174 = vector.shape_cast %173 : vector<1x64xf32> to vector<1x1x64xf32>
    %c2_108 = arith.constant 2 : index
    %c2_109 = arith.constant 2 : index
    %c0_110 = arith.constant 0 : index
    %175 = vector.load %arg15[%c2_108, %c2_109, %c0_110] : memref<10x10x64xf32, #tpu.memory_space<vmem>>, vector<8x8x64xf32>
    %176 = vector.broadcast %174 : vector<1x1x64xf32> to vector<8x8x64xf32>
    %177 = arith.mulf %175, %176 : vector<8x8x64xf32>
    %178 = arith.addf %172, %177 : vector<8x8x64xf32>
    %179 = vector.shape_cast %123 : vector<1x64xf32> to vector<1x1x64xf32>
    %180 = vector.broadcast %179 : vector<1x1x64xf32> to vector<8x8x64xf32>
    %181 = arith.addf %178, %180 : vector<8x8x64xf32>
    %182 = vector.shape_cast %181 : vector<8x8x64xf32> to vector<64x64xf32>
    %cst_111 = arith.constant 0.000000e+00 : f32
    %183 = vector.broadcast %cst_111 : f32 to vector<64x64xf32>
    %184 = arith.maximumf %182, %183 : vector<64x64xf32>
    %185 = arith.truncf %184 : vector<64x64xf32> to vector<64x64xbf16>
    %c0_112 = arith.constant 0 : index
    %c0_113 = arith.constant 0 : index
    %186 = vector.load %arg8[%c0_112, %c0_113] : memref<64x2xbf16, #tpu.memory_space<vmem>>, vector<64x2xbf16>
    %cst_114 = arith.constant dense<0.000000e+00> : vector<64x2xf32>
    %187 = tpu.matmul %185, %186, %cst_114 {dimension_numbers = #tpu.dot_dimension_numbers<[1], [0], [0], [1], [0, 0, 1, 1], [], []>} : vector<64x64xbf16>, vector<64x2xbf16>, vector<64x2xf32> -> vector<64x2xf32>
    %188 = arith.negf %187 : vector<64x2xf32>
    %189 = math.exp %188 : vector<64x2xf32>
    %cst_115 = arith.constant 1.000000e+00 : f32
    %190 = vector.broadcast %cst_115 : f32 to vector<64x2xf32>
    %191 = arith.addf %190, %189 : vector<64x2xf32>
    %192 = arith.divf %190, %191 : vector<64x2xf32>
    %193 = tpu.iota {dimensions = array<i32: 1>} : vector<1x64xi32>
    %c32_i32 = arith.constant 32 : i32
    %194 = vector.broadcast %c32_i32 : i32 to vector<1x64xi32>
    %195 = arith.cmpi slt, %193, %194 : vector<1x64xi32>
    %196 = vector.extract_strided_slice %192 {offsets = [0, 0], sizes = [64, 1], strides = [1, 1]} : vector<64x2xf32> to vector<64x1xf32>
    %197 = vector.shape_cast %196 : vector<64x1xf32> to vector<64x1xf32>
    %198 = vector.broadcast %197 : vector<64x1xf32> to vector<64x64xf32>
    %199 = vector.extract_strided_slice %192 {offsets = [0, 1], sizes = [64, 1], strides = [1, 1]} : vector<64x2xf32> to vector<64x1xf32>
    %200 = vector.shape_cast %199 : vector<64x1xf32> to vector<64x1xf32>
    %201 = vector.broadcast %200 : vector<64x1xf32> to vector<64x64xf32>
    %202 = vector.shape_cast %195 : vector<1x64xi1> to vector<1x64xi1>
    %203 = vector.broadcast %202 : vector<1x64xi1> to vector<64x64xi1>
    %204 = arith.select %203, %198, %201 : vector<64x64xi1>, vector<64x64xf32>
    %205 = arith.mulf %120, %204 : vector<64x64xf32>
    %cst_116 = arith.constant dense<0.000000e+00> : vector<64xf32>
    %206 = vector.multi_reduction <add>, %205, %cst_116 [0] : vector<64x64xf32> to vector<64xf32>
    %207 = vector.shape_cast %206 : vector<64xf32> to vector<1x64xf32>
    %cst_117 = arith.constant 6.400000e+01 : f32
    %208 = vector.broadcast %cst_117 : f32 to vector<1x64xf32>
    %209 = arith.divf %207, %208 : vector<1x64xf32>
    %210 = arith.truncf %209 : vector<1x64xf32> to vector<1x64xbf16>
    %c0_118 = arith.constant 0 : index
    %c0_119 = arith.constant 0 : index
    %211 = vector.load %arg9[%c0_118, %c0_119] : memref<64x64xbf16, #tpu.memory_space<vmem>>, vector<64x64xbf16>
    %cst_120 = arith.constant dense<0.000000e+00> : vector<1x64xf32>
    %212 = tpu.matmul %210, %211, %cst_120 {dimension_numbers = #tpu.dot_dimension_numbers<[1], [0], [0], [1], [0, 0, 1, 1], [], []>} : vector<1x64xbf16>, vector<64x64xbf16>, vector<1x64xf32> -> vector<1x64xf32>
    %213 = arith.negf %212 : vector<1x64xf32>
    %214 = math.exp %213 : vector<1x64xf32>
    %cst_121 = arith.constant 1.000000e+00 : f32
    %215 = vector.broadcast %cst_121 : f32 to vector<1x64xf32>
    %216 = arith.addf %215, %214 : vector<1x64xf32>
    %217 = arith.divf %215, %216 : vector<1x64xf32>
    %218 = vector.broadcast %217 : vector<1x64xf32> to vector<64x64xf32>
    %219 = arith.mulf %205, %218 : vector<64x64xf32>
    %220 = vector.extract_strided_slice %219 {offsets = [0, 0], sizes = [64, 32], strides = [1, 1]} : vector<64x64xf32> to vector<64x32xf32>
    %221 = vector.extract_strided_slice %219 {offsets = [0, 32], sizes = [64, 32], strides = [1, 1]} : vector<64x64xf32> to vector<64x32xf32>
    %222 = arith.addf %220, %221 : vector<64x32xf32>
    %223 = vector.extract_strided_slice %13 {offsets = [3, 0], sizes = [1, 32], strides = [1, 1]} : vector<6x32xf32> to vector<1x32xf32>
    %224 = vector.shape_cast %222 : vector<64x32xf32> to vector<8x8x32xf32>
    %c1_122 = arith.constant 1 : index
    %c1_123 = arith.constant 1 : index
    %c0_124 = arith.constant 0 : index
    %225 = vector.load %arg14[%c1_122, %c1_123, %c0_124] : memref<10x10x32xf32, #tpu.memory_space<vmem>>, vector<8x8x32xf32>
    tpu.vector_store %arg14[%c1_122, %c1_123, %c0_124], %224 {strides = array<i32>} : memref<10x10x32xf32, #tpu.memory_space<vmem>>, vector<8x8x32xf32>,
    %c0_125 = arith.constant 0 : index
    %c0_126 = arith.constant 0 : index
    %c0_127 = arith.constant 0 : index
    %226 = vector.load %arg14[%c0_125, %c0_126, %c0_127] : memref<10x10x32xf32, #tpu.memory_space<vmem>>, vector<8x8x32xf32>
    %227 = vector.extract_strided_slice %12 {offsets = [9, 0], sizes = [1, 32], strides = [1, 1]} : vector<27x32xf32> to vector<1x32xf32>
    %228 = vector.shape_cast %227 : vector<1x32xf32> to vector<1x1x32xf32>
    %229 = vector.broadcast %228 : vector<1x1x32xf32> to vector<8x8x32xf32>
    %230 = arith.mulf %226, %229 : vector<8x8x32xf32>
    %231 = vector.extract_strided_slice %12 {offsets = [10, 0], sizes = [1, 32], strides = [1, 1]} : vector<27x32xf32> to vector<1x32xf32>
    %232 = vector.shape_cast %231 : vector<1x32xf32> to vector<1x1x32xf32>
    %c0_128 = arith.constant 0 : index
    %c1_129 = arith.constant 1 : index
    %c0_130 = arith.constant 0 : index
    %233 = vector.load %arg14[%c0_128, %c1_129, %c0_130] : memref<10x10x32xf32, #tpu.memory_space<vmem>>, vector<8x8x32xf32>
    %234 = vector.broadcast %232 : vector<1x1x32xf32> to vector<8x8x32xf32>
    %235 = arith.mulf %233, %234 : vector<8x8x32xf32>
    %236 = arith.addf %230, %235 : vector<8x8x32xf32>
    %237 = vector.extract_strided_slice %12 {offsets = [11, 0], sizes = [1, 32], strides = [1, 1]} : vector<27x32xf32> to vector<1x32xf32>
    %238 = vector.shape_cast %237 : vector<1x32xf32> to vector<1x1x32xf32>
    %c0_131 = arith.constant 0 : index
    %c2_132 = arith.constant 2 : index
    %c0_133 = arith.constant 0 : index
    %239 = vector.load %arg14[%c0_131, %c2_132, %c0_133] : memref<10x10x32xf32, #tpu.memory_space<vmem>>, vector<8x8x32xf32>
    %240 = vector.broadcast %238 : vector<1x1x32xf32> to vector<8x8x32xf32>
    %241 = arith.mulf %239, %240 : vector<8x8x32xf32>
    %242 = arith.addf %236, %241 : vector<8x8x32xf32>
    %243 = vector.extract_strided_slice %12 {offsets = [12, 0], sizes = [1, 32], strides = [1, 1]} : vector<27x32xf32> to vector<1x32xf32>
    %244 = vector.shape_cast %243 : vector<1x32xf32> to vector<1x1x32xf32>
    %c1_134 = arith.constant 1 : index
    %c0_135 = arith.constant 0 : index
    %c0_136 = arith.constant 0 : index
    %245 = vector.load %arg14[%c1_134, %c0_135, %c0_136] : memref<10x10x32xf32, #tpu.memory_space<vmem>>, vector<8x8x32xf32>
    %246 = vector.broadcast %244 : vector<1x1x32xf32> to vector<8x8x32xf32>
    %247 = arith.mulf %245, %246 : vector<8x8x32xf32>
    %248 = arith.addf %242, %247 : vector<8x8x32xf32>
    %249 = vector.extract_strided_slice %12 {offsets = [13, 0], sizes = [1, 32], strides = [1, 1]} : vector<27x32xf32> to vector<1x32xf32>
    %250 = vector.shape_cast %249 : vector<1x32xf32> to vector<1x1x32xf32>
    %c1_137 = arith.constant 1 : index
    %c1_138 = arith.constant 1 : index
    %c0_139 = arith.constant 0 : index
    %251 = vector.load %arg14[%c1_137, %c1_138, %c0_139] : memref<10x10x32xf32, #tpu.memory_space<vmem>>, vector<8x8x32xf32>
    %252 = vector.broadcast %250 : vector<1x1x32xf32> to vector<8x8x32xf32>
    %253 = arith.mulf %251, %252 : vector<8x8x32xf32>
    %254 = arith.addf %248, %253 : vector<8x8x32xf32>
    %255 = vector.extract_strided_slice %12 {offsets = [14, 0], sizes = [1, 32], strides = [1, 1]} : vector<27x32xf32> to vector<1x32xf32>
    %256 = vector.shape_cast %255 : vector<1x32xf32> to vector<1x1x32xf32>
    %c1_140 = arith.constant 1 : index
    %c2_141 = arith.constant 2 : index
    %c0_142 = arith.constant 0 : index
    %257 = vector.load %arg14[%c1_140, %c2_141, %c0_142] : memref<10x10x32xf32, #tpu.memory_space<vmem>>, vector<8x8x32xf32>
    %258 = vector.broadcast %256 : vector<1x1x32xf32> to vector<8x8x32xf32>
    %259 = arith.mulf %257, %258 : vector<8x8x32xf32>
    %260 = arith.addf %254, %259 : vector<8x8x32xf32>
    %261 = vector.extract_strided_slice %12 {offsets = [15, 0], sizes = [1, 32], strides = [1, 1]} : vector<27x32xf32> to vector<1x32xf32>
    %262 = vector.shape_cast %261 : vector<1x32xf32> to vector<1x1x32xf32>
    %c2_143 = arith.constant 2 : index
    %c0_144 = arith.constant 0 : index
    %c0_145 = arith.constant 0 : index
    %263 = vector.load %arg14[%c2_143, %c0_144, %c0_145] : memref<10x10x32xf32, #tpu.memory_space<vmem>>, vector<8x8x32xf32>
    %264 = vector.broadcast %262 : vector<1x1x32xf32> to vector<8x8x32xf32>
    %265 = arith.mulf %263, %264 : vector<8x8x32xf32>
    %266 = arith.addf %260, %265 : vector<8x8x32xf32>
    %267 = vector.extract_strided_slice %12 {offsets = [16, 0], sizes = [1, 32], strides = [1, 1]} : vector<27x32xf32> to vector<1x32xf32>
    %268 = vector.shape_cast %267 : vector<1x32xf32> to vector<1x1x32xf32>
    %c2_146 = arith.constant 2 : index
    %c1_147 = arith.constant 1 : index
    %c0_148 = arith.constant 0 : index
    %269 = vector.load %arg14[%c2_146, %c1_147, %c0_148] : memref<10x10x32xf32, #tpu.memory_space<vmem>>, vector<8x8x32xf32>
    %270 = vector.broadcast %268 : vector<1x1x32xf32> to vector<8x8x32xf32>
    %271 = arith.mulf %269, %270 : vector<8x8x32xf32>
    %272 = arith.addf %266, %271 : vector<8x8x32xf32>
    %273 = vector.extract_strided_slice %12 {offsets = [17, 0], sizes = [1, 32], strides = [1, 1]} : vector<27x32xf32> to vector<1x32xf32>
    %274 = vector.shape_cast %273 : vector<1x32xf32> to vector<1x1x32xf32>
    %c2_149 = arith.constant 2 : index
    %c2_150 = arith.constant 2 : index
    %c0_151 = arith.constant 0 : index
    %275 = vector.load %arg14[%c2_149, %c2_150, %c0_151] : memref<10x10x32xf32, #tpu.memory_space<vmem>>, vector<8x8x32xf32>
    %276 = vector.broadcast %274 : vector<1x1x32xf32> to vector<8x8x32xf32>
    %277 = arith.mulf %275, %276 : vector<8x8x32xf32>
    %278 = arith.addf %272, %277 : vector<8x8x32xf32>
    %279 = vector.shape_cast %223 : vector<1x32xf32> to vector<1x1x32xf32>
    %280 = vector.broadcast %279 : vector<1x1x32xf32> to vector<8x8x32xf32>
    %281 = arith.addf %278, %280 : vector<8x8x32xf32>
    %282 = vector.shape_cast %281 : vector<8x8x32xf32> to vector<64x32xf32>
    %283 = arith.mulf %282, %121 : vector<64x32xf32>
    %284 = vector.extract_strided_slice %13 {offsets = [4, 0], sizes = [1, 32], strides = [1, 1]} : vector<6x32xf32> to vector<1x32xf32>
    %285 = vector.shape_cast %283 : vector<64x32xf32> to vector<8x8x32xf32>
    %c1_152 = arith.constant 1 : index
    %c1_153 = arith.constant 1 : index
    %c0_154 = arith.constant 0 : index
    %286 = vector.load %arg14[%c1_152, %c1_153, %c0_154] : memref<10x10x32xf32, #tpu.memory_space<vmem>>, vector<8x8x32xf32>
    tpu.vector_store %arg14[%c1_152, %c1_153, %c0_154], %285 {strides = array<i32>} : memref<10x10x32xf32, #tpu.memory_space<vmem>>, vector<8x8x32xf32>,
    %c0_155 = arith.constant 0 : index
    %c0_156 = arith.constant 0 : index
    %c0_157 = arith.constant 0 : index
    %287 = vector.load %arg14[%c0_155, %c0_156, %c0_157] : memref<10x10x32xf32, #tpu.memory_space<vmem>>, vector<8x8x32xf32>
    %288 = vector.extract_strided_slice %12 {offsets = [18, 0], sizes = [1, 32], strides = [1, 1]} : vector<27x32xf32> to vector<1x32xf32>
    %289 = vector.shape_cast %288 : vector<1x32xf32> to vector<1x1x32xf32>
    %290 = vector.broadcast %289 : vector<1x1x32xf32> to vector<8x8x32xf32>
    %291 = arith.mulf %287, %290 : vector<8x8x32xf32>
    %292 = vector.extract_strided_slice %12 {offsets = [19, 0], sizes = [1, 32], strides = [1, 1]} : vector<27x32xf32> to vector<1x32xf32>
    %293 = vector.shape_cast %292 : vector<1x32xf32> to vector<1x1x32xf32>
    %c0_158 = arith.constant 0 : index
    %c1_159 = arith.constant 1 : index
    %c0_160 = arith.constant 0 : index
    %294 = vector.load %arg14[%c0_158, %c1_159, %c0_160] : memref<10x10x32xf32, #tpu.memory_space<vmem>>, vector<8x8x32xf32>
    %295 = vector.broadcast %293 : vector<1x1x32xf32> to vector<8x8x32xf32>
    %296 = arith.mulf %294, %295 : vector<8x8x32xf32>
    %297 = arith.addf %291, %296 : vector<8x8x32xf32>
    %298 = vector.extract_strided_slice %12 {offsets = [20, 0], sizes = [1, 32], strides = [1, 1]} : vector<27x32xf32> to vector<1x32xf32>
    %299 = vector.shape_cast %298 : vector<1x32xf32> to vector<1x1x32xf32>
    %c0_161 = arith.constant 0 : index
    %c2_162 = arith.constant 2 : index
    %c0_163 = arith.constant 0 : index
    %300 = vector.load %arg14[%c0_161, %c2_162, %c0_163] : memref<10x10x32xf32, #tpu.memory_space<vmem>>, vector<8x8x32xf32>
    %301 = vector.broadcast %299 : vector<1x1x32xf32> to vector<8x8x32xf32>
    %302 = arith.mulf %300, %301 : vector<8x8x32xf32>
    %303 = arith.addf %297, %302 : vector<8x8x32xf32>
    %304 = vector.extract_strided_slice %12 {offsets = [21, 0], sizes = [1, 32], strides = [1, 1]} : vector<27x32xf32> to vector<1x32xf32>
    %305 = vector.shape_cast %304 : vector<1x32xf32> to vector<1x1x32xf32>
    %c1_164 = arith.constant 1 : index
    %c0_165 = arith.constant 0 : index
    %c0_166 = arith.constant 0 : index
    %306 = vector.load %arg14[%c1_164, %c0_165, %c0_166] : memref<10x10x32xf32, #tpu.memory_space<vmem>>, vector<8x8x32xf32>
    %307 = vector.broadcast %305 : vector<1x1x32xf32> to vector<8x8x32xf32>
    %308 = arith.mulf %306, %307 : vector<8x8x32xf32>
    %309 = arith.addf %303, %308 : vector<8x8x32xf32>
    %310 = vector.extract_strided_slice %12 {offsets = [22, 0], sizes = [1, 32], strides = [1, 1]} : vector<27x32xf32> to vector<1x32xf32>
    %311 = vector.shape_cast %310 : vector<1x32xf32> to vector<1x1x32xf32>
    %c1_167 = arith.constant 1 : index
    %c1_168 = arith.constant 1 : index
    %c0_169 = arith.constant 0 : index
    %312 = vector.load %arg14[%c1_167, %c1_168, %c0_169] : memref<10x10x32xf32, #tpu.memory_space<vmem>>, vector<8x8x32xf32>
    %313 = vector.broadcast %311 : vector<1x1x32xf32> to vector<8x8x32xf32>
    %314 = arith.mulf %312, %313 : vector<8x8x32xf32>
    %315 = arith.addf %309, %314 : vector<8x8x32xf32>
    %316 = vector.extract_strided_slice %12 {offsets = [23, 0], sizes = [1, 32], strides = [1, 1]} : vector<27x32xf32> to vector<1x32xf32>
    %317 = vector.shape_cast %316 : vector<1x32xf32> to vector<1x1x32xf32>
    %c1_170 = arith.constant 1 : index
    %c2_171 = arith.constant 2 : index
    %c0_172 = arith.constant 0 : index
    %318 = vector.load %arg14[%c1_170, %c2_171, %c0_172] : memref<10x10x32xf32, #tpu.memory_space<vmem>>, vector<8x8x32xf32>
    %319 = vector.broadcast %317 : vector<1x1x32xf32> to vector<8x8x32xf32>
    %320 = arith.mulf %318, %319 : vector<8x8x32xf32>
    %321 = arith.addf %315, %320 : vector<8x8x32xf32>
    %322 = vector.extract_strided_slice %12 {offsets = [24, 0], sizes = [1, 32], strides = [1, 1]} : vector<27x32xf32> to vector<1x32xf32>
    %323 = vector.shape_cast %322 : vector<1x32xf32> to vector<1x1x32xf32>
    %c2_173 = arith.constant 2 : index
    %c0_174 = arith.constant 0 : index
    %c0_175 = arith.constant 0 : index
    %324 = vector.load %arg14[%c2_173, %c0_174, %c0_175] : memref<10x10x32xf32, #tpu.memory_space<vmem>>, vector<8x8x32xf32>
    %325 = vector.broadcast %323 : vector<1x1x32xf32> to vector<8x8x32xf32>
    %326 = arith.mulf %324, %325 : vector<8x8x32xf32>
    %327 = arith.addf %321, %326 : vector<8x8x32xf32>
    %328 = vector.extract_strided_slice %12 {offsets = [25, 0], sizes = [1, 32], strides = [1, 1]} : vector<27x32xf32> to vector<1x32xf32>
    %329 = vector.shape_cast %328 : vector<1x32xf32> to vector<1x1x32xf32>
    %c2_176 = arith.constant 2 : index
    %c1_177 = arith.constant 1 : index
    %c0_178 = arith.constant 0 : index
    %330 = vector.load %arg14[%c2_176, %c1_177, %c0_178] : memref<10x10x32xf32, #tpu.memory_space<vmem>>, vector<8x8x32xf32>
    %331 = vector.broadcast %329 : vector<1x1x32xf32> to vector<8x8x32xf32>
    %332 = arith.mulf %330, %331 : vector<8x8x32xf32>
    %333 = arith.addf %327, %332 : vector<8x8x32xf32>
    %334 = vector.extract_strided_slice %12 {offsets = [26, 0], sizes = [1, 32], strides = [1, 1]} : vector<27x32xf32> to vector<1x32xf32>
    %335 = vector.shape_cast %334 : vector<1x32xf32> to vector<1x1x32xf32>
    %c2_179 = arith.constant 2 : index
    %c2_180 = arith.constant 2 : index
    %c0_181 = arith.constant 0 : index
    %336 = vector.load %arg14[%c2_179, %c2_180, %c0_181] : memref<10x10x32xf32, #tpu.memory_space<vmem>>, vector<8x8x32xf32>
    %337 = vector.broadcast %335 : vector<1x1x32xf32> to vector<8x8x32xf32>
    %338 = arith.mulf %336, %337 : vector<8x8x32xf32>
    %339 = arith.addf %333, %338 : vector<8x8x32xf32>
    %340 = vector.shape_cast %284 : vector<1x32xf32> to vector<1x1x32xf32>
    %341 = vector.broadcast %340 : vector<1x1x32xf32> to vector<8x8x32xf32>
    %342 = arith.addf %339, %341 : vector<8x8x32xf32>
    %343 = vector.shape_cast %342 : vector<8x8x32xf32> to vector<64x32xf32>
    %344 = arith.addf %104, %343 : vector<64x32xf32>
    %345 = arith.mulf %344, %344 : vector<64x32xf32>
    %346 = arith.mulf %345, %344 : vector<64x32xf32>
    %cst_182 = arith.constant 4.471500e-02 : f32
    %347 = vector.broadcast %cst_182 : f32 to vector<64x32xf32>
    %348 = arith.mulf %347, %346 : vector<64x32xf32>
    %349 = arith.addf %344, %348 : vector<64x32xf32>
    %cst_183 = arith.constant 1.59576917 : f32
    %350 = vector.broadcast %cst_183 : f32 to vector<64x32xf32>
    %351 = arith.mulf %350, %349 : vector<64x32xf32>
    %352 = arith.negf %351 : vector<64x32xf32>
    %353 = math.exp %352 : vector<64x32xf32>
    %cst_184 = arith.constant 1.000000e+00 : f32
    %354 = vector.broadcast %cst_184 : f32 to vector<64x32xf32>
    %355 = arith.addf %354, %353 : vector<64x32xf32>
    %356 = arith.divf %354, %355 : vector<64x32xf32>
    %357 = arith.mulf %344, %356 : vector<64x32xf32>
    %358 = arith.truncf %357 : vector<64x32xf32> to vector<64x32xbf16>
    %c0_185 = arith.constant 0 : index
    %c0_186 = arith.constant 0 : index
    %359 = vector.load %arg10[%c0_185, %c0_186] : memref<32x128xbf16, #tpu.memory_space<vmem>>, vector<32x128xbf16>
    %cst_187 = arith.constant dense<0.000000e+00> : vector<64x128xf32>
    %360 = tpu.matmul %358, %359, %cst_187 {dimension_numbers = #tpu.dot_dimension_numbers<[1], [0], [0], [1], [0, 0, 1, 1], [], []>} : vector<64x32xbf16>, vector<32x128xbf16>, vector<64x128xf32> -> vector<64x128xf32>
    %c0_188 = arith.constant 0 : index
    %c0_189 = arith.constant 0 : index
    %361 = vector.load %arg11[%c0_188, %c0_189] : memref<1x128xf32, #tpu.memory_space<vmem>>, vector<1x128xf32>
    %362 = vector.broadcast %361 : vector<1x128xf32> to vector<64x128xf32>
    %363 = arith.addf %360, %362 : vector<64x128xf32>
    %cst_190 = arith.constant 0.000000e+00 : f32
    %364 = vector.broadcast %cst_190 : f32 to vector<64x128xf32>
    %365 = arith.maximumf %363, %364 : vector<64x128xf32>
    %366 = arith.truncf %365 : vector<64x128xf32> to vector<64x128xbf16>
    %c0_191 = arith.constant 0 : index
    %c0_192 = arith.constant 0 : index
    %367 = vector.load %arg12[%c0_191, %c0_192] : memref<128x32xbf16, #tpu.memory_space<vmem>>, vector<128x32xbf16>
    %cst_193 = arith.constant dense<0.000000e+00> : vector<64x32xf32>
    %368 = tpu.matmul %366, %367, %cst_193 {dimension_numbers = #tpu.dot_dimension_numbers<[1], [0], [0], [1], [0, 0, 1, 1], [], []>} : vector<64x128xbf16>, vector<128x32xbf16>, vector<64x32xf32> -> vector<64x32xf32>
    %369 = vector.extract_strided_slice %13 {offsets = [5, 0], sizes = [1, 32], strides = [1, 1]} : vector<6x32xf32> to vector<1x32xf32>
    %370 = vector.broadcast %369 : vector<1x32xf32> to vector<64x32xf32>
    %371 = arith.addf %368, %370 : vector<64x32xf32>
    %372 = arith.addf %344, %371 : vector<64x32xf32>
    %c0_194 = arith.constant 0 : index
    %c0_195 = arith.constant 0 : index
    %c0_196 = arith.constant 0 : index
    %373 = vector.load %arg13[%c0_194, %c0_195, %c0_196] : memref<1x64x32xf32, #tpu.memory_space<vmem>>, vector<1x64x32xf32>
    %374 = vector.shape_cast %373 : vector<1x64x32xf32> to vector<64x32xf32>
    %375 = vector.shape_cast %372 : vector<64x32xf32> to vector<1x64x32xf32>
    tpu.vector_store %arg13[%c0_194, %c0_195, %c0_196], %375 {strides = array<i32>} : memref<1x64x32xf32, #tpu.memory_space<vmem>>, vector<1x64x32xf32>,
    return
  }
  func.func @transform_0(%arg0: i32) -> (i32, i32, i32) {
    %c0_i32 = arith.constant 0 : i32
    %c0_i32_0 = arith.constant 0 : i32
    %c0_i32_1 = arith.constant 0 : i32
    return %arg0, %c0_i32, %c0_i32_0 : i32, i32, i32
  }
  func.func @transform_1(%arg0: i32) -> (i32, i32) {
    %c0_i32 = arith.constant 0 : i32
    %c0_i32_0 = arith.constant 0 : i32
    %c0_i32_1 = arith.constant 0 : i32
    return %c0_i32, %c0_i32_0 : i32, i32
  }
  func.func @transform_2(%arg0: i32) -> (i32, i32) {
    %c0_i32 = arith.constant 0 : i32
    %c0_i32_0 = arith.constant 0 : i32
    %c0_i32_1 = arith.constant 0 : i32
    return %c0_i32, %c0_i32_0 : i32, i32
  }
  func.func @transform_3(%arg0: i32) -> (i32, i32) {
    %c0_i32 = arith.constant 0 : i32
    %c0_i32_0 = arith.constant 0 : i32
    %c0_i32_1 = arith.constant 0 : i32
    return %c0_i32, %c0_i32_0 : i32, i32
  }
  func.func @transform_4(%arg0: i32) -> (i32, i32) {
    %c0_i32 = arith.constant 0 : i32
    %c0_i32_0 = arith.constant 0 : i32
    %c0_i32_1 = arith.constant 0 : i32
    return %c0_i32, %c0_i32_0 : i32, i32
  }
  func.func @transform_5(%arg0: i32) -> (i32, i32) {
    %c0_i32 = arith.constant 0 : i32
    %c0_i32_0 = arith.constant 0 : i32
    %c0_i32_1 = arith.constant 0 : i32
    return %c0_i32, %c0_i32_0 : i32, i32
  }
  func.func @transform_6(%arg0: i32) -> (i32, i32) {
    %c0_i32 = arith.constant 0 : i32
    %c0_i32_0 = arith.constant 0 : i32
    %c0_i32_1 = arith.constant 0 : i32
    return %c0_i32, %c0_i32_0 : i32, i32
  }
  func.func @transform_7(%arg0: i32) -> (i32, i32) {
    %c0_i32 = arith.constant 0 : i32
    %c0_i32_0 = arith.constant 0 : i32
    %c0_i32_1 = arith.constant 0 : i32
    return %c0_i32, %c0_i32_0 : i32, i32
  }
  func.func @transform_8(%arg0: i32) -> (i32, i32) {
    %c0_i32 = arith.constant 0 : i32
    %c0_i32_0 = arith.constant 0 : i32
    %c0_i32_1 = arith.constant 0 : i32
    return %c0_i32, %c0_i32_0 : i32, i32
  }
  func.func @transform_9(%arg0: i32) -> (i32, i32) {
    %c0_i32 = arith.constant 0 : i32
    %c0_i32_0 = arith.constant 0 : i32
    %c0_i32_1 = arith.constant 0 : i32
    return %c0_i32, %c0_i32_0 : i32, i32
  }
  func.func @transform_10(%arg0: i32) -> (i32, i32) {
    %c0_i32 = arith.constant 0 : i32
    %c0_i32_0 = arith.constant 0 : i32
    %c0_i32_1 = arith.constant 0 : i32
    return %c0_i32, %c0_i32_0 : i32, i32
  }
  func.func @transform_11(%arg0: i32) -> (i32, i32) {
    %c0_i32 = arith.constant 0 : i32
    %c0_i32_0 = arith.constant 0 : i32
    %c0_i32_1 = arith.constant 0 : i32
    return %c0_i32, %c0_i32_0 : i32, i32
  }
  func.func @transform_12(%arg0: i32) -> (i32, i32, i32) {
    %c0_i32 = arith.constant 0 : i32
    %c0_i32_0 = arith.constant 0 : i32
    %c0_i32_1 = arith.constant 0 : i32
    return %arg0, %c0_i32, %c0_i32_0 : i32, i32, i32
  }
}

</mosaic_0001>

<bundles_post_ra>
// kernel: tpu_custom_call.1
= control target key start
LH: loop header
LB: loop body
LE: loop exit
PB: predicated region body
PF: predicated region fallthrough
CT: control target
= control target key end

     0   :  { %s3450_s21 = smov 0   ;;  %s4832_s0 = inlined_call_operand.vmem [shape: f32[2,64,32], index: 0, kind: input, shape index: {}]   ;;  %s4833_s1 = inlined_call_operand.vmem [shape: f32[27,32], index: 1, kind: input, shape index: {}]   ;;  %s4834_s2 = inlined_call_operand.vmem [shape: f32[6,32], index: 2, kind: input, shape index: {}]   ;;  %s4835_s3 = inlined_call_operand.vmem [shape: f32[9,64], index: 3, kind: input, shape index: {}]   ;;  %s4836_s4 = inlined_call_operand.vmem [shape: f32[1,64], index: 4, kind: input, shape index: {}]   ;;  %s4837_s5 = inlined_call_operand.vmem [shape: bf16[96,32], index: 5, kind: input, shape index: {}]   ;;  %s4838_s6 = inlined_call_operand.vmem [shape: bf16[32,64], index: 6, kind: input, shape index: {}]   ;;  %s4839_s7 = inlined_call_operand.vmem [shape: bf16[64,2], index: 7, kind: input, shape index: {}]   ;;  %s4840_s8 = inlined_call_operand.vmem [shape: bf16[64,64], index: 8, kind: input, shape index: {}]   ;;  %s4841_s9 = inlined_call_operand.vmem [shape: bf16[32,128], index: 9, kind: input, shape index: {}]   ;;  %s4842_s10 = inlined_call_operand.vmem [shape: f32[1,128], index: 10, kind: input, shape index: {}]   ;;  %s4843_s11 = inlined_call_operand.vmem [shape: bf16[128,32], index: 11, kind: input, shape index: {}]   ;;  %s4844_s12 = inlined_call_operand.vmem [shape: f32[2,64,32], index: 12, kind: output, shape index: {}]  }
   0x1 LB: > { %s3001_s22 = sadd.s32 4294967295, %s3378_s21   ;;  %p3005_p0 = scmp.ge.s32.totalorder %s3378_s21, 1  ;;  %s3378_s21 = sphi %s3450_s21, %s22_s21  }
   0x2   : > { %p362_p1 = scmp.lt.s32.totalorder %s3378_s21, 3 }
   0x4   : > { %p363_p2 = pnand %p3005_p0, %p362_p1 }
   0x6   : > { %366 = sbr.rel (%p363_p2) target bundleno = 1639 (0x667), region = 68 }
   0xb   : > { %v3177_v0 = vld [vmem:[%s4837_s5 + $0x8] sm:$0xff]  ;;  %p404_p3 = scmp.lt.s32.totalorder %s3001_s22, 1  ;;  %v3176_v1 = vld [vmem:[%s4837_s5] sm:$0xff]  ;;  %vm415_vm0 = vcmask 261120   ;;  %vm417_vm1 = vcmask 254976   ;;  %v3380_v26 = vmov 0.0  }
   0xc   : > { %525 = vmatpush.bf16.msra.mxu0 %v3177_v0  ;;  %v3501_v14 = vld [vmem:[%s4834_s2] sm:$0x3f]  ;;  %416 = vst.msk [vmem:[#allocation2] sm:$0xff] %vm415_vm0, %v3380_v26  ;;  %vm423_vm2 = vcmask 253952   ;;  %s3384_s25 = smov 96  }
   0xd   : > { %s4908_s22 = smov (!%p404_p3, %s3001_s22), 1  ;;  %v3504_v15 = vperm.slane %v3501_v14, 0  ;;  %418 = vst.msk [vmem:[#allocation2 + $0x8] sm:$0x3] %vm417_vm1, %v3380_v26  ;;  %v3576_v52 = vld [vmem:[%s4833_s1] sm:$0xff] }
   0xe   : > { %s3174_s27 = sshll.u32 %s4908_s22, 6  ;;  %420 = vst.msk [vmem:[#allocation2 + $0x90] sm:$0xff] %vm415_vm0, %v3380_v26  ;;  %v3584_v59 = vperm.slane %v3576_v52, 0  ;;  %v3589_v0 = vperm.slane %v3576_v52, 1 }
   0xf   : > { %s3472_s30 = scalar_lea.vmem %s4832_s0, %s3174_s27  ;;  %421 = vst.msk [vmem:[#allocation2 + $0x98] sm:$0x3] %vm417_vm1, %v3380_v26  ;;  %s413_s14 = scalar_lea.vmem %s4844_s12, %s3174_s27 }
  0x10   : > { %526 = vmatpush.bf16.msra.mxu0 %v3176_v1  ;;  %v3475_v2 = vld [vmem:[%s3472_s30] sm:$0xff]  ;;  %v3478_v3 = vld [vmem:[%s3472_s30 + $0x8] sm:$0xff]  ;;  %v3484_v5 = vld [vmem:[%s3472_s30 + $0x10] sm:$0xff]  ;;  %424 = vst.msk [vmem:[#allocation2 + $0x10] sm:$0x1] %vm423_vm2, %v3380_v26 }
  0x11   : > { %v490_v4 = vpack.c.bf16 %v3478_v3, %v3475_v2  ;;  %v3487_v6 = vld [vmem:[%s3472_s30 + $0x18] sm:$0xff]  ;;  %v486_v8 = vld [vmem:[%s3472_s30 + $0x20] sm:$0xff]  ;;  %v487_v9 = vld [vmem:[%s3472_s30 + $0x28] sm:$0xff]  ;;  %425 = vst.msk [vmem:[#allocation2 + $0x20] sm:$0x1] %vm423_vm2, %v3380_v26 }
  0x12   : > { %v491_v7 = vpack.c.bf16 %v3487_v6, %v3484_v5  ;;  %v492_v10 = vpack.c.bf16 %v487_v9, %v486_v8  ;;  %v488_v11 = vld [vmem:[%s3472_s30 + $0x30] sm:$0xff]  ;;  %v489_v12 = vld [vmem:[%s3472_s30 + $0x38] sm:$0xff]  ;;  %426 = vst.msk [vmem:[#allocation2 + $0x30] sm:$0x1] %vm423_vm2, %v3380_v26 }
  0x13   : > { %3018 = vmatmul.msk.bf16.vlgmr.msra.gmra.mxu0 %vm415_vm0, %v490_v4  ;;  %v493_v13 = vpack.c.bf16 %v489_v12, %v488_v11  ;;  %432 = vst.msk [vmem:[#allocation2 + $0x19] sm:$0x1] %vm423_vm2, %v3380_v26  ;;  %v756_v63 = vld [vmem:[#allocation2] sm:$0xff] }
  0x14   : > { %433 = vst.msk [vmem:[#allocation2 + $0x29] sm:$0x1] %vm423_vm2, %v3380_v26  ;;  %v773_v9 = vld [vmem:[#allocation2 + $0x1] sm:$0xff] }
  0x15   : > { %434 = vst.msk [vmem:[#allocation2 + $0x39] sm:$0x1] %vm423_vm2, %v3380_v26 }
  0x16   : > { %427 = vst.msk [vmem:[#allocation2 + $0x40] sm:$0x1] %vm423_vm2, %v3380_v26 }
  0x17   : > { %428 = vst.msk [vmem:[#allocation2 + $0x50] sm:$0x1] %vm423_vm2, %v3380_v26 }
  0x18   : > { %429 = vst.msk [vmem:[#allocation2 + $0x60] sm:$0x1] %vm423_vm2, %v3380_v26 }
  0x19   : > { %430 = vst.msk [vmem:[#allocation2 + $0x70] sm:$0x1] %vm423_vm2, %v3380_v26 }
  0x1a   : > { %431 = vst.msk [vmem:[#allocation2 + $0x80] sm:$0x1] %vm423_vm2, %v3380_v26 }
  0x1b   : > { %435 = vst.msk [vmem:[#allocation2 + $0x49] sm:$0x1] %vm423_vm2, %v3380_v26 }
  0x1c   : > { %436 = vst.msk [vmem:[#allocation2 + $0x59] sm:$0x1] %vm423_vm2, %v3380_v26 }
  0x1d   : > { %437 = vst.msk [vmem:[#allocation2 + $0x69] sm:$0x1] %vm423_vm2, %v3380_v26 }
  0x1e   : > { %438 = vst.msk [vmem:[#allocation2 + $0x79] sm:$0x1] %vm423_vm2, %v3380_v26 }
  0x1f   : > { %439 = vst.msk [vmem:[#allocation2 + $0x89] sm:$0x1] %vm423_vm2, %v3380_v26 }
  0x23   : > { %3019 = vmatmul.msk.bf16.gmra.mxu0 %vm415_vm0, %v491_v7 }
  0x33   : > { %3020 = vmatmul.msk.bf16.gmra.mxu0 %vm415_vm0, %v492_v10 }
  0x43   : > { %3021 = vmatmul.msk.bf16.gmra.mxu0 %vm415_vm0, %v493_v13  ;;  %v765_v13 = vmul.f32 %v3584_v59, %v756_v63  ;;  %v3639_v63 = vld [vmem:[%s4833_s1 + $0x8] sm:$0xff] }
  0x90   : > { %v528_v16 = vpop.f32.mrf.mxu0 }
  0x91   : > { %v3507_v17 = vadd.f32 %v528_v16, %v3504_v15 }
  0x93   : > { %v548_v18 = vmul.f32 %v3507_v17, %v3507_v17 }
  0x95   : > { %v556_v19 = vmul.f32 %v548_v18, %v3507_v17 }
  0x97   : > { %v564_v20 = vmul.f32 0.044715, %v556_v19 }
  0x98   : > { %v530_v21 = vpop.f32.mrf.mxu0 }
  0x99   : > { %v572_v22 = vadd.f32 %v564_v20, %v3507_v17  ;;  %v3514_v23 = vadd.f32 %v530_v21, %v3504_v15  ;;  %v782_v21 = vmul.f32 %v3589_v0, %v773_v9  ;;  %v3645_v9 = vperm.slane %v3576_v52, 6 }
  0x9b   : > { %v3022_v24 = vmul.f32 -1.5957692, %v572_v22  ;;  %v549_v25 = vmul.f32 %v3514_v23, %v3514_v23  ;;  %v3599_v22 = vperm.slane %v3576_v52, 2 }
  0x9d   : > { %v596_v27 = vmul.f32 1.442695, %v3022_v24  ;;  %v557_v28 = vmul.f32 %v549_v25, %v3514_v23 }
  0x9f   : > { %3229 = vpow2.f32 %v596_v27  ;;  %v565_v29 = vmul.f32 0.044715, %v557_v28  ;;  %v798_v28 = vld [vmem:[#allocation2 + $0x2] sm:$0xff] }
  0xa0   : > { %v533_v30 = vpop.f32.mrf.mxu0 }
  0xa1   : > { %v573_v31 = vadd.f32 %v565_v29, %v3514_v23  ;;  %v3531_v32 = vadd.f32 %v533_v30, %v3504_v15 }
  0xa3   : > { %v3023_v33 = vmul.f32 -1.5957692, %v573_v31  ;;  %v550_v34 = vmul.f32 %v3531_v32, %v3531_v32 }
  0xa5   : > { %v3230_v35 = vpop.eup %3229  ;;  %v598_v36 = vmul.f32 1.442695, %v3023_v33  ;;  %v558_v37 = vmul.f32 %v550_v34, %v3531_v32 }
  0xa6   : > { %v612_v38 = vadd.f32 1.0, %v3230_v35 }
  0xa7   : > { %3231 = vpow2.f32 %v598_v36  ;;  %v566_v39 = vmul.f32 0.044715, %v558_v37  ;;  %v790_v36 = vadd.f32 %v782_v21, %v765_v13  ;;  %v807_v37 = vmul.f32 %v3599_v22, %v798_v28 }
  0xa8   : > { %3233 = vrcp.f32 %v612_v38  ;;  %v535_v40 = vpop.f32.mrf.mxu0  ;;  %v629_v57 = vand.u32 2147483647, %v612_v38  ;;  %v631_v58 = vand.u32 2147483648, %v612_v38  ;;  %vm625_vm4 = vweird.f32 %v612_v38 }
  0xa9   : > { %v574_v41 = vadd.f32 %v566_v39, %v3531_v32  ;;  %v3554_v42 = vadd.f32 %v535_v40, %v3504_v15 }
  0xaa   : > { %v632_v11 = vor.u32 1.1754944e-38, %v631_v58  ;;  %vm630_vm6 = vcmp.eq.f32.partialorder %v629_v57, 8.507059e+37  ;;  %v3178_v57 = vld [vmem:[%s4837_s5 + $0x10] sm:$0xff]  ;;  %v815_v58 = vadd.f32 %v807_v37, %v790_v36 }
  0xab   : > { %v3024_v43 = vmul.f32 -1.5957692, %v574_v41  ;;  %v551_v44 = vmul.f32 %v3554_v42, %v3554_v42 }
  0xad   : > { %v3232_v45 = vpop.eup %3231  ;;  %v600_v46 = vmul.f32 1.442695, %v3024_v43  ;;  %v559_v47 = vmul.f32 %v551_v44, %v3554_v42  ;;  %v3620_v43 = vperm.slane %v3576_v52, 4 }
  0xae   : > { %v3234_v48 = vpop.eup %3233  ;;  %v3569_v49 = vadd.f32 1.0, %v3232_v45 }
  0xaf   : > { %v621_v50 = vmul.f32 %v3234_v48, %v612_v38  ;;  %3235 = vpow2.f32 %v600_v46  ;;  %v567_v51 = vmul.f32 0.044715, %v559_v47  ;;  %vm626_vm3 = vweird.f32 %v3234_v48 }
  0xb0   : > { %3237 = vrcp.f32 %v3569_v49  ;;  %v538_v53 = vpop.f32.mrf.mxu0  ;;  %vm627_vm5 = vmor %vm625_vm4, %vm626_vm3  ;;  %v646_v29 = vand.u32 2147483648, %v3569_v49  ;;  %v644_v33 = vand.u32 2147483647, %v3569_v49  ;;  %v3616_v38 = vperm.slane %v3576_v52, 3 }
  0xb1   : > { %v622_v54 = vsub.f32 1.0, %v621_v50  ;;  %v575_v55 = vadd.f32 %v567_v51, %v3554_v42  ;;  %v3581_v56 = vadd.f32 %v538_v53, %v3504_v15  ;;  %vm640_vm8 = vweird.f32 %v3569_v49 }
  0xb2   : > { %v647_v45 = vor.u32 1.1754944e-38, %v646_v29  ;;  %vm645_vm10 = vcmp.eq.f32.partialorder %v644_v33, 8.507059e+37 }
  0xb3   : > { %v623_v60 = vmul.f32 %v3234_v48, %v622_v54  ;;  %v3025_v61 = vmul.f32 -1.5957692, %v575_v55  ;;  %v552_v62 = vmul.f32 %v3581_v56, %v3581_v56 }
  0xb5   : > { %v3236_v1 = vpop.eup %3235  ;;  %v624_v4 = vadd.f32 %v3234_v48, %v623_v60  ;;  %v602_v7 = vmul.f32 1.442695, %v3025_v61  ;;  %v560_v8 = vmul.f32 %v552_v62, %v3581_v56 }
  0xb6   : > { %v3238_v10 = vpop.eup %3237  ;;  %v3592_v12 = vadd.f32 1.0, %v3236_v1 }
  0xb7   : > { %v628_v16 = vsel %vm627_vm5, %v3234_v48, %v624_v4  ;;  %v636_v18 = vmul.f32 %v3238_v10, %v3569_v49  ;;  %3239 = vpow2.f32 %v602_v7  ;;  %v568_v27 = vmul.f32 0.044715, %v560_v8 }
  0xb8   : > { %v633_v19 = vsel %vm630_vm6, %v632_v11, %v628_v16  ;;  %3241 = vrcp.f32 %v3592_v12  ;;  %v540_v20 = vpop.f32.mrf.mxu0  ;;  %vm641_vm7 = vweird.f32 %v3238_v10  ;;  %v3626_v48 = vperm.slane %v3576_v52, 5 }
  0xb9   : > { %v740_v24 = vmul.f32 %v633_v19, %v3507_v17  ;;  %v637_v25 = vsub.f32 1.0, %v636_v18  ;;  %v3604_v30 = vadd.f32 %v540_v20, %v3504_v15  ;;  %v576_v34 = vadd.f32 %v568_v27, %v3581_v56  ;;  %v3179_v17 = vld [vmem:[%s4837_s5 + $0x18] sm:$0xff]  ;;  %vm642_vm9 = vmor %vm640_vm8, %vm641_vm7 }
  0xba   : > { %1026 = vmatpush.bf16.msra.mxu1 %v3179_v17  ;;  %v659_v54 = vand.u32 2147483647, %v3592_v12  ;;  %v661_v62 = vand.u32 2147483648, %v3592_v12  ;;  %v3658_v20 = vperm.slane %v3639_v63, 0  ;;  %vm655_vm12 = vweird.f32 %v3592_v12 }
  0xbb   : > { %748 = vst.msk [vmem:[#allocation2 + $0x11] sm:$0xff] %vm415_vm0, %v740_v24  ;;  %v638_v31 = vmul.f32 %v3238_v10, %v637_v25  ;;  %v553_v35 = vmul.f32 %v3604_v30, %v3604_v30  ;;  %v3026_v41 = vmul.f32 -1.5957692, %v576_v34 }
  0xbc   : > { %vm660_vm13 = vcmp.eq.f32.partialorder %v659_v54, 8.507059e+37  ;;  %v662_v21 = vor.u32 1.1754944e-38, %v661_v62 }
  0xbd   : > { %v3240_v39 = vpop.eup %3239  ;;  %v639_v40 = vadd.f32 %v3238_v10, %v638_v31  ;;  %v561_v47 = vmul.f32 %v553_v35, %v3604_v30  ;;  %v604_v49 = vmul.f32 1.442695, %v3026_v41 }
  0xbe   : > { %v3242_v44 = vpop.eup %3241  ;;  %v3622_v46 = vadd.f32 1.0, %v3240_v39  ;;  %1027 = vmatpush.bf16.msra.mxu1 %v3178_v57 }
  0xbf   : > { %v643_v50 = vsel %vm642_vm9, %v3238_v10, %v639_v40  ;;  %v651_v51 = vmul.f32 %v3242_v44, %v3592_v12  ;;  %v569_v1 = vmul.f32 0.044715, %v561_v47  ;;  %vm656_vm11 = vweird.f32 %v3242_v44 }
  0xc0   : > { %v648_v53 = vsel %vm645_vm10, %v647_v45, %v643_v50  ;;  %3243 = vrcp.f32 %v3622_v46  ;;  %v543_v55 = vpop.f32.mrf.mxu0  ;;  %vm657_vm14 = vmor %vm655_vm12, %vm656_vm11  ;;  %v674_v25 = vand.u32 2147483647, %v3622_v46  ;;  %v676_v50 = vand.u32 2147483648, %v3622_v46 }
  0xc1   : > { %v741_v60 = vmul.f32 %v648_v53, %v3514_v23  ;;  %v652_v61 = vsub.f32 1.0, %v651_v51  ;;  %3245 = vpow2.f32 %v604_v49  ;;  %v3642_v4 = vadd.f32 %v543_v55, %v3504_v15 }
  0xc2   : > { %v757_v7 = vld [vmem:[#allocation2 + $0x10] sm:$0xff]  ;;  %v3648_v23 = vperm.slane %v3576_v52, 7  ;;  %v577_v16 = vadd.f32 %v569_v1, %v3604_v30  ;;  %vm670_vm1 = vweird.f32 %v3622_v46  ;;  %v677_v62 = vor.u32 1.1754944e-38, %v676_v50 }
  0xc3   : > { %v774_v8 = vld [vmem:[#allocation2 + $0x11] sm:$0xff]  ;;  %749 = vst.msk [vmem:[#allocation2 + $0x21] sm:$0xff] %vm415_vm0, %v741_v60  ;;  %v653_v10 = vmul.f32 %v3242_v44, %v652_v61  ;;  %v766_v11 = vmul.f32 %v3584_v59, %v757_v7  ;;  %v554_v18 = vmul.f32 %v3642_v4, %v3642_v4  ;;  %v832_v19 = vmul.f32 %v3616_v38, %v757_v7 }
  0xc4   : > { %v783_v13 = vmul.f32 %v3589_v0, %v774_v8  ;;  %v3027_v27 = vmul.f32 -1.5957692, %v577_v16  ;;  %v799_v17 = vld [vmem:[#allocation2 + $0x12] sm:$0xff]  ;;  %v857_v36 = vmul.f32 %v3620_v43, %v774_v8  ;;  %vm675_vm3 = vcmp.eq.f32.partialorder %v674_v25, 8.507059e+37 }
  0xc5   : > { %v654_v52 = vadd.f32 %v3242_v44, %v653_v10  ;;  %v562_v28 = vmul.f32 %v554_v18, %v3642_v4  ;;  %v840_v29 = vadd.f32 %v832_v19, %v815_v58  ;;  %v882_v60 = vmul.f32 %v3626_v48, %v799_v17 }
  0xc6   : > { %v3244_v24 = vpop.eup %3243  ;;  %v791_v35 = vadd.f32 %v783_v13, %v766_v11  ;;  %v606_v39 = vmul.f32 1.442695, %v3027_v27 }
  0xc7   : > { %v3246_v31 = vpop.eup %3245  ;;  %v658_v33 = vsel %vm657_vm14, %v3242_v44, %v654_v52  ;;  %v666_v34 = vmul.f32 %v3244_v24, %v3622_v46  ;;  %v570_v40 = vmul.f32 0.044715, %v562_v28  ;;  %vm671_vm15 = vweird.f32 %v3244_v24 }
  0xc8   : > { %v663_v37 = vsel %vm660_vm13, %v662_v21, %v658_v33  ;;  %v3665_v12 = vadd.f32 1.0, %v3246_v31  ;;  %v545_v41 = vpop.f32.mrf.mxu0  ;;  %v808_v44 = vmul.f32 %v3599_v22, %v799_v17  ;;  %v865_v53 = vadd.f32 %v857_v36, %v840_v29  ;;  %vm672_vm2 = vmor %vm670_vm1, %vm671_vm15 }
  0xc9   : > { %v742_v45 = vmul.f32 %v663_v37, %v3531_v32  ;;  %v667_v47 = vsub.f32 1.0, %v666_v34  ;;  %v3670_v51 = vadd.f32 %v545_v41, %v3504_v15  ;;  %v578_v32 = vadd.f32 %v570_v40, %v3642_v4 }
  0xca   : > { %3247 = vrcp.f32 %v3665_v12  ;;  %v3674_v49 = vld [vmem:[#allocation2 + $0x20] sm:$0xff]  ;;  %v816_v15 = vadd.f32 %v808_v44, %v791_v35  ;;  %v890_v46 = vadd.f32 %v882_v60, %v865_v53  ;;  %v689_v40 = vand.u32 2147483647, %v3665_v12 }
  0xcb   : > { %750 = vst.msk [vmem:[#allocation2 + $0x31] sm:$0xff] %vm415_vm0, %v742_v45  ;;  %v668_v54 = vmul.f32 %v3244_v24, %v667_v47  ;;  %3249 = vpow2.f32 %v606_v39  ;;  %v555_v55 = vmul.f32 %v3670_v51, %v3670_v51  ;;  %v3680_v57 = vld [vmem:[#allocation2 + $0x21] sm:$0xff]  ;;  %v833_v58 = vmul.f32 %v3616_v38, %v3674_v49 }
  0xcc   : > { %v3028_v1 = vmul.f32 -1.5957692, %v578_v32  ;;  %v858_v10 = vmul.f32 %v3620_v43, %v3680_v57  ;;  %v3690_v11 = vld [vmem:[#allocation2 + $0x22] sm:$0xff]  ;;  %v908_v13 = vmul.f32 %v3645_v9, %v3674_v49  ;;  %v933_v29 = vmul.f32 %v3648_v23, %v3680_v57 }
  0xcd   : > { %v669_v61 = vadd.f32 %v3244_v24, %v668_v54  ;;  %v563_v7 = vmul.f32 %v555_v55, %v3670_v51  ;;  %v841_v8 = vadd.f32 %v833_v58, %v816_v15  ;;  %v883_v35 = vmul.f32 %v3626_v48, %v3690_v11 }
  0xce   : > { %v608_v18 = vmul.f32 1.442695, %v3028_v1  ;;  %v916_v28 = vadd.f32 %v908_v13, %v890_v46  ;;  %v691_v45 = vand.u32 2147483648, %v3665_v12  ;;  %v958_v50 = vmul.f32 %v3658_v20, %v3690_v11 }
  0xcf   : > { %v673_v16 = vsel %vm672_vm2, %v3244_v24, %v669_v61  ;;  %v571_v19 = vmul.f32 0.044715, %v563_v7  ;;  %v866_v27 = vadd.f32 %v858_v10, %v841_v8  ;;  %vm685_vm5 = vweird.f32 %v3665_v12 }
  0xd0   : > { %v3248_v52 = vpop.eup %3247  ;;  %v678_v21 = vsel %vm675_vm3, %v677_v62, %v673_v16  ;;  %3251 = vpow2.f32 %v608_v18  ;;  %v941_v37 = vadd.f32 %v933_v29, %v916_v28  ;;  %v3718_v15 = vperm.slane %v3501_v14, 1 }
  0xd1   : > { %v3250_v31 = vpop.eup %3249  ;;  %v743_v33 = vmul.f32 %v678_v21, %v3554_v42  ;;  %v681_v34 = vmul.f32 %v3248_v52, %v3665_v12  ;;  %v579_v25 = vadd.f32 %v571_v19, %v3670_v51  ;;  %v891_v42 = vadd.f32 %v883_v35, %v866_v27 }
  0xd2   : > { %v3700_v24 = vadd.f32 1.0, %v3250_v31  ;;  %v900_v17 = vld [vmem:[#allocation2 + $0x30] sm:$0xff]  ;;  %vm686_vm4 = vweird.f32 %v3248_v52  ;;  %v966_v55 = vadd.f32 %v958_v50, %v941_v37  ;;  %v692_v7 = vor.u32 1.1754944e-38, %v691_v45 }
  0xd3   : > { %v3703_v36 = vld [vmem:[#allocation2 + $0x31] sm:$0xff]  ;;  %751 = vst.msk [vmem:[#allocation2 + $0x41] sm:$0xff] %vm415_vm0, %v743_v33  ;;  %v682_v39 = vsub.f32 1.0, %v681_v34  ;;  %v909_v41 = vmul.f32 %v3645_v9, %v900_v17  ;;  %v3029_v53 = vmul.f32 -1.5957692, %v579_v25  ;;  %vm687_vm6 = vmor %vm685_vm5, %vm686_vm4  ;;  %vm690_vm7 = vcmp.eq.f32.partialorder %v689_v40, 8.507059e+37 }
  0xd4   : > { %3253 = vrcp.f32 %v3700_v24  ;;  %v3710_v47 = vld [vmem:[#allocation2 + $0x32] sm:$0xff]  ;;  %v934_v32 = vmul.f32 %v3648_v23, %v3703_v36  ;;  %v704_v8 = vand.u32 2147483647, %v3700_v24  ;;  %v706_v10 = vand.u32 2147483648, %v3700_v24 }
  0xd5   : > { %v683_v44 = vmul.f32 %v3248_v52, %v682_v39  ;;  %v917_v54 = vadd.f32 %v909_v41, %v891_v42  ;;  %v610_v61 = vmul.f32 1.442695, %v3029_v53  ;;  %v959_v1 = vmul.f32 %v3658_v20, %v3710_v47 }
  0xd6   : > { %v3252_v58 = vpop.eup %3251  ;;  %v975_v19 = vadd.f32 %v3718_v15, %v966_v55  ;;  %v767_v28 = vmul.f32 %v3674_v49, %v3584_v59  ;;  %v768_v29 = vmul.f32 %v900_v17, %v3584_v59  ;;  %vm700_vm8 = vweird.f32 %v3700_v24 }
  0xd7   : > { %v684_v60 = vadd.f32 %v3248_v52, %v683_v44  ;;  %v942_v62 = vadd.f32 %v934_v32, %v917_v54  ;;  %v3725_v46 = vadd.f32 1.0, %v3252_v58  ;;  %3255 = vpow2.f32 %v610_v61 }
  0xd8   : > { %vm3735_vm9 = vcmp.eq.f32.partialorder %v704_v8, 8.507059e+37  ;;  %v707_v31 = vor.u32 1.1754944e-38, %v706_v10  ;;  %v784_v49 = vmul.f32 %v3680_v57, %v3589_v0  ;;  %v983_v25 = vmax.f32 %v975_v19, 0.0 }
  0xd9   : > { %v688_v12 = vsel %vm687_vm6, %v3248_v52, %v684_v60  ;;  %v967_v13 = vadd.f32 %v959_v1, %v942_v62  ;;  %3257 = vrcp.f32 %v3725_v46  ;;  %v721_v35 = vand.u32 2147483648, %v3725_v46 }
  0xda   : > { %v3254_v16 = vpop.eup %3253  ;;  %v693_v18 = vsel %vm690_vm7, %v692_v7, %v688_v12  ;;  %v785_v39 = vmul.f32 %v3703_v36, %v3589_v0  ;;  %v826_v40 = vld [vmem:[#allocation2 + $0x40] sm:$0xff]  ;;  %vm715_vm11 = vweird.f32 %v3725_v46  ;;  %v792_v45 = vadd.f32 %v784_v49, %v767_v28 }
  0xdb   : > { %v744_v21 = vmul.f32 %v693_v18, %v3581_v56  ;;  %v696_v27 = vmul.f32 %v3254_v16, %v3700_v24  ;;  %v976_v33 = vadd.f32 %v3718_v15, %v967_v13  ;;  %vm701_vm10 = vweird.f32 %v3254_v16  ;;  %v851_v1 = vld [vmem:[#allocation2 + $0x41] sm:$0xff] }
  0xdc   : > { %v719_v56 = vand.u32 2147483647, %v3725_v46  ;;  %v809_v50 = vmul.f32 %v3690_v11, %v3599_v22  ;;  %v834_v44 = vmul.f32 %v900_v17, %v3616_v38  ;;  %v793_v32 = vadd.f32 %v785_v39, %v768_v29  ;;  %vm702_vm13 = vmor %vm700_vm8, %vm701_vm10  ;;  %v876_v18 = vld [vmem:[#allocation2 + $0x42] sm:$0xff] }
  0xdd   : > { %752 = vst.msk [vmem:[#allocation2 + $0x51] sm:$0xff] %vm415_vm0, %v744_v21  ;;  %v697_v34 = vsub.f32 1.0, %v696_v27  ;;  %v984_v37 = vmax.f32 %v976_v33, 0.0  ;;  %v3256_v42 = vpop.eup %3255  ;;  %v810_v55 = vmul.f32 %v3710_v47, %v3599_v22  ;;  %v835_v11 = vmul.f32 %v3616_v38, %v826_v40 }
  0xde   : > { %v3751_v57 = vadd.f32 1.0, %v3256_v42  ;;  %vm3756_vm12 = vcmp.eq.f32.partialorder %v719_v56, 8.507059e+37  ;;  %v817_v62 = vadd.f32 %v809_v50, %v792_v45  ;;  %v722_v17 = vor.u32 1.1754944e-38, %v721_v35 }
  0xdf   : > { %v698_v41 = vmul.f32 %v3254_v16, %v697_v34  ;;  %v3258_v53 = vpop.eup %3257  ;;  %v991_v54 = vpack.c.bf16 %v984_v37, %v983_v25  ;;  %v859_v7 = vmul.f32 %v3703_v36, %v3620_v43  ;;  %v818_v12 = vadd.f32 %v810_v55, %v793_v32 }
  0xe0   : > { %v711_v60 = vmul.f32 %v3258_v53, %v3725_v46  ;;  %vm716_vm14 = vweird.f32 %v3258_v53  ;;  %3259 = vrcp.f32 %v3751_v57  ;;  %v842_v13 = vadd.f32 %v834_v44, %v817_v62 }
  0xe1   : > { %v699_v58 = vadd.f32 %v3254_v16, %v698_v41  ;;  %3038 = vmatmul.msk.bf16.vlgmr.msra.gmra.mxu1 %vm415_vm0, %v991_v54  ;;  %v734_v24 = vand.u32 2147483647, %v3751_v57  ;;  %v736_v21 = vand.u32 2147483648, %v3751_v57  ;;  %v860_v27 = vmul.f32 %v3620_v43, %v851_v1  ;;  %vm717_vm1 = vmor %vm715_vm11, %vm716_vm14 }
  0xe2   : > { %v712_v10 = vsub.f32 1.0, %v711_v60  ;;  %v843_v36 = vadd.f32 %v835_v11, %v818_v12  ;;  %v884_v49 = vmul.f32 %v3710_v47, %v3626_v48  ;;  %v885_v52 = vmul.f32 %v3626_v48, %v876_v18 }
  0xe3   : > { %v703_v8 = vsel %vm702_vm13, %v3254_v16, %v699_v58  ;;  %v867_v16 = vadd.f32 %v859_v7, %v842_v13  ;;  %vm730_vm15 = vweird.f32 %v3751_v57  ;;  %v960_v41 = vmul.f32 %v3658_v20, %v876_v18 }
  0xe4   : > { %v708_v19 = vsel %vm3735_vm9, %v707_v31, %v703_v8  ;;  %v902_v28 = vld [vmem:[#allocation2 + $0x50] sm:$0xff]  ;;  %v713_v34 = vmul.f32 %v3258_v53, %v712_v10  ;;  %v910_v31 = vmul.f32 %v3645_v9, %v826_v40  ;;  %v868_v37 = vadd.f32 %v860_v27, %v843_v36 }
  0xe5   : > { %v927_v29 = vld [vmem:[#allocation2 + $0x51] sm:$0xff]  ;;  %v745_v33 = vmul.f32 %v708_v19, %v3604_v30  ;;  %v911_v35 = vmul.f32 %v3645_v9, %v902_v28  ;;  %v935_v30 = vmul.f32 %v3648_v23, %v851_v1  ;;  %v892_v47 = vadd.f32 %v884_v49, %v867_v16 }
  0xe6   : > { %v952_v56 = vld [vmem:[#allocation2 + $0x52] sm:$0xff]  ;;  %v714_v25 = vadd.f32 %v3258_v53, %v713_v34  ;;  %v936_v39 = vmul.f32 %v3648_v23, %v927_v29  ;;  %v3260_v42 = vpop.eup %3259  ;;  %v769_v50 = vmul.f32 %v826_v40, %v3584_v59  ;;  %v893_v32 = vadd.f32 %v885_v52, %v868_v37 }
  0xe7   : > { %753 = vst.msk [vmem:[#allocation2 + $0x61] sm:$0xff] %vm415_vm0, %v745_v33  ;;  %v961_v45 = vmul.f32 %v3658_v20, %v952_v56  ;;  %v726_v54 = vmul.f32 %v3260_v42, %v3751_v57  ;;  %vm731_vm2 = vweird.f32 %v3260_v42  ;;  %v918_v58 = vadd.f32 %v910_v31, %v892_v47 }
  0xe8   : > { %v718_v44 = vsel %vm717_vm1, %v3258_v53, %v714_v25  ;;  %v770_v60 = vmul.f32 %v902_v28, %v3584_v59  ;;  %v786_v46 = vmul.f32 %v851_v1, %v3589_v0  ;;  %v919_v7 = vadd.f32 %v911_v35, %v893_v32  ;;  %vm732_vm4 = vmor %vm730_vm15, %vm731_vm2 }
  0xe9   : > { %v723_v55 = vsel %vm3756_vm12, %v722_v17, %v718_v44  ;;  %v727_v11 = vsub.f32 1.0, %v726_v54  ;;  %v787_v8 = vmul.f32 %v927_v29, %v3589_v0  ;;  %v943_v40 = vadd.f32 %v935_v30, %v918_v58 }
  0xea   : > { %v746_v62 = vmul.f32 %v723_v55, %v3642_v4  ;;  %v794_v53 = vadd.f32 %v786_v46, %v769_v50  ;;  %v811_v10 = vmul.f32 %v876_v18, %v3599_v22  ;;  %v812_v12 = vmul.f32 %v952_v56, %v3599_v22 }
  0xeb   : > { %v728_v61 = vmul.f32 %v3260_v42, %v727_v11  ;;  %v944_v17 = vadd.f32 %v936_v39, %v919_v7  ;;  %v795_v13 = vadd.f32 %v787_v8, %v770_v60  ;;  %v836_v19 = vmul.f32 %v902_v28, %v3616_v38 }
  0xec   : > { %754 = vst.msk [vmem:[#allocation2 + $0x71] sm:$0xff] %vm415_vm0, %v746_v62  ;;  %vm3800_vm3 = vcmp.eq.f32.partialorder %v734_v24, 8.507059e+37  ;;  %v737_v4 = vor.u32 1.1754944e-38, %v736_v21  ;;  %v968_v27 = vadd.f32 %v960_v41, %v943_v40  ;;  %v819_v33 = vadd.f32 %v811_v10, %v794_v53 }
  0xed   : > { %v729_v16 = vadd.f32 %v3260_v42, %v728_v61  ;;  %v969_v18 = vadd.f32 %v961_v45, %v944_v17  ;;  %v820_v49 = vadd.f32 %v812_v12, %v795_v13  ;;  %v861_v35 = vmul.f32 %v927_v29, %v3620_v43 }
  0xee   : > { %v828_v34 = vld [vmem:[#allocation2 + $0x60] sm:$0xff]  ;;  %v977_v24 = vadd.f32 %v3718_v15, %v968_v27  ;;  %v844_v28 = vadd.f32 %v836_v19, %v819_v33  ;;  %v886_v21 = vmul.f32 %v952_v56, %v3626_v48  ;;  %v3830_v13 = vperm.slane %v3639_v63, 7  ;;  %v906_v33 = vld [vmem:[#allocation2 + $0x90] sm:$0xff] }
  0xef   : > { %v853_v36 = vld [vmem:[#allocation2 + $0x61] sm:$0xff]  ;;  %v837_v52 = vmul.f32 %v3616_v38, %v828_v34  ;;  %v733_v25 = vsel %vm732_vm4, %v3260_v42, %v729_v16  ;;  %v978_v37 = vadd.f32 %v3718_v15, %v969_v18  ;;  %v912_v45 = vmul.f32 %v3645_v9, %v828_v34 }
  0xf0   : > { %v878_v31 = vld [vmem:[#allocation2 + $0x62] sm:$0xff]  ;;  %v862_v39 = vmul.f32 %v3620_v43, %v853_v36  ;;  %v738_v47 = vsel %vm3800_vm3, %v737_v4, %v733_v25  ;;  %v869_v41 = vadd.f32 %v861_v35, %v844_v28  ;;  %v985_v44 = vmax.f32 %v977_v24, 0.0 }
  0xf1   : > { %v845_v30 = vadd.f32 %v837_v52, %v820_v49  ;;  %v887_v57 = vmul.f32 %v3626_v48, %v878_v31  ;;  %v747_v50 = vmul.f32 %v738_v47, %v3670_v51  ;;  %v986_v29 = vmax.f32 %v978_v37, 0.0 }
  0xf2   : > { %v894_v56 = vadd.f32 %v886_v21, %v869_v41  ;;  %v771_v55 = vmul.f32 %v828_v34, %v3584_v59  ;;  %v788_v58 = vmul.f32 %v853_v36, %v3589_v0  ;;  %v937_v11 = vmul.f32 %v3648_v23, %v853_v36 }
  0xf3   : > { %v870_v54 = vadd.f32 %v862_v39, %v845_v30  ;;  %v904_v42 = vld [vmem:[#allocation2 + $0x70] sm:$0xff]  ;;  %755 = vst.msk [vmem:[#allocation2 + $0x81] sm:$0xff] %vm415_vm0, %v747_v50  ;;  %v992_v60 = vpack.c.bf16 %v986_v29, %v985_v44  ;;  %v813_v53 = vmul.f32 %v878_v31, %v3599_v22  ;;  %v962_v1 = vmul.f32 %v3658_v20, %v878_v31 }
  0xf4   : > { %v929_v32 = vld [vmem:[#allocation2 + $0x71] sm:$0xff]  ;;  %v913_v62 = vmul.f32 %v3645_v9, %v904_v42  ;;  %v920_v7 = vadd.f32 %v912_v45, %v894_v56  ;;  %v772_v8 = vmul.f32 %v904_v42, %v3584_v59  ;;  %v796_v61 = vadd.f32 %v788_v58, %v771_v55 }
  0xf5   : > { %v895_v46 = vadd.f32 %v887_v57, %v870_v54  ;;  %v954_v51 = vld [vmem:[#allocation2 + $0x72] sm:$0xff]  ;;  %v789_v40 = vmul.f32 %v929_v32, %v3589_v0  ;;  %3039 = vmatmul.msk.bf16.gmra.mxu1 %vm415_vm0, %v992_v60  ;;  %v938_v12 = vmul.f32 %v3648_v23, %v929_v32  ;;  %v838_v17 = vmul.f32 %v904_v42, %v3616_v38 }
  0xf6   : > { %v945_v19 = vadd.f32 %v937_v11, %v920_v7  ;;  %v963_v0 = vmul.f32 %v3658_v20, %v954_v51  ;;  %v821_v27 = vadd.f32 %v813_v53, %v796_v61  ;;  %v814_v36 = vmul.f32 %v954_v51, %v3599_v22  ;;  %v931_v45 = vld [vmem:[#allocation2 + $0x91] sm:$0xff] }
  0xf7   : > { %v921_v10 = vadd.f32 %v913_v62, %v895_v46  ;;  %v797_v4 = vadd.f32 %v789_v40, %v772_v8  ;;  %v3836_v16 = vmul.f32 %v3830_v13, %v906_v33  ;;  %v863_v63 = vmul.f32 %v929_v32, %v3620_v43  ;;  %v956_v56 = vld [vmem:[#allocation2 + $0x92] sm:$0xff] }
  0xf8   : > { %v970_v34 = vadd.f32 %v962_v1, %v945_v19  ;;  %v846_v49 = vadd.f32 %v838_v17, %v821_v27  ;;  %v888_v22 = vmul.f32 %v954_v51, %v3626_v48  ;;  %v915_v57 = vmul.f32 %v3645_v9, %v906_v33 }
  0xf9   : > { %v946_v59 = vadd.f32 %v938_v12, %v921_v10  ;;  %4865 = vst [vmem:[#allocation4_spill] sm:$0xff] %v3836_v16  ;;  %v822_v52 = vadd.f32 %v814_v36, %v797_v4  ;;  %v940_v55 = vmul.f32 %v3648_v23, %v931_v45 }
  0xfa   : > { %v830_v24 = vld [vmem:[#allocation2 + $0x80] sm:$0xff]  ;;  %v979_v31 = vadd.f32 %v3718_v15, %v970_v34  ;;  %v871_v25 = vadd.f32 %v863_v63, %v846_v49 }
  0xfb   : > { %v971_v18 = vadd.f32 %v963_v0, %v946_v59  ;;  %v855_v28 = vld [vmem:[#allocation2 + $0x81] sm:$0xff]  ;;  %v839_v21 = vmul.f32 %v3616_v38, %v830_v24  ;;  %v914_v41 = vmul.f32 %v3645_v9, %v830_v24 }
  0xfc   : > { %v880_v37 = vld [vmem:[#allocation2 + $0x82] sm:$0xff]  ;;  %v864_v47 = vmul.f32 %v3620_v43, %v855_v28  ;;  %v987_v50 = vmax.f32 %v979_v31, 0.0  ;;  %v896_v54 = vadd.f32 %v888_v22, %v871_v25  ;;  %v939_v60 = vmul.f32 %v3648_v23, %v855_v28 }
  0xfd   : > { %v980_v35 = vadd.f32 %v3718_v15, %v971_v18  ;;  %v847_v39 = vadd.f32 %v839_v21, %v822_v52  ;;  %v889_v29 = vmul.f32 %v3626_v48, %v880_v37  ;;  %v965_v43 = vmul.f32 %v3658_v20, %v956_v56  ;;  %v3180_v56 = vld [vmem:[%s4837_s5 + $0x20] sm:$0xff] }
  0xfe   : > { %v922_v32 = vadd.f32 %v914_v41, %v896_v54  ;;  %v964_v62 = vmul.f32 %v3658_v20, %v880_v37  ;;  %v3856_v23 = vperm.slane %v3501_v14, 2  ;;  %v3181_v41 = vld [vmem:[%s4837_s5 + $0x28] sm:$0xff]  ;;  %v3182_v54 = vld [vmem:[%s4838_s6] sm:$0xff] }
  0xff   : > { %v988_v30 = vmax.f32 %v980_v35, 0.0  ;;  %v872_v44 = vadd.f32 %v864_v47, %v847_v39  ;;  %v3183_v47 = vld [vmem:[%s4838_s6 + $0x8] sm:$0xff]  ;;  %1336 = vmatpush.bf16.msra.mxu3 %v3181_v41 }
 0x100   : > { %v947_v9 = vadd.f32 %v939_v60, %v922_v32  ;;  %1295 = vmatpush.bf16.msra.mxu2 %v3183_v47 }
 0x101   : > { %v993_v38 = vpack.c.bf16 %v988_v30, %v987_v50  ;;  %v897_v42 = vadd.f32 %v889_v29, %v872_v44 }
 0x102   : > { %v972_v48 = vadd.f32 %v964_v62, %v947_v9 }
 0x103   : > { %v923_v58 = vadd.f32 %v915_v57, %v897_v42  ;;  %1337 = vmatpush.bf16.msra.mxu3 %v3180_v56 }
 0x104   : > { %v981_v51 = vadd.f32 %v3718_v15, %v972_v48  ;;  %1296 = vmatpush.bf16.msra.mxu2 %v3182_v54 }
 0x105   : > { %3040 = vmatmul.msk.bf16.gmra.mxu1 %vm415_vm0, %v993_v38  ;;  %v948_v46 = vadd.f32 %v940_v55, %v923_v58 }
 0x106   : > { %v989_v40 = vmax.f32 %v981_v51, 0.0 }
 0x107   : > { %v973_v11 = vadd.f32 %v965_v43, %v948_v46  ;;  %v3363_v43 = vld [vmem:[%s3472_s30 + $0x20] sm:$0xff] }
 0x109   : > { %v982_v7 = vadd.f32 %v3718_v15, %v973_v11 }
 0x10b   : > { %v990_v8 = vmax.f32 %v982_v7, 0.0 }
 0x10d   : > { %v994_v53 = vpack.c.bf16 %v990_v8, %v989_v40 }
 0x115   : > { %3041 = vmatmul.msk.bf16.gmra.mxu1 %vm415_vm0, %v994_v53 }
 0x15e   : > { %v1029_v10 = vpop.f32.mrf.mxu1 }
 0x15f   : > { %v1030_v12 = vadd.f32 %v1029_v10, %v3856_v23 }
 0x161   : > { %v3860_v61 = vadd.f32 %v1030_v12, %v3475_v2 }
 0x163   : > { %4866 = vst [vmem:[#allocation5_spill] sm:$0xff] %v3860_v61  ;;  %v1057_v20 = vmul.f32 %v3860_v61, %v3860_v61 }
 0x165   : > { %v1065_v17 = vmul.f32 %v1057_v20, %v3860_v61 }
 0x166   : > { %v1031_v15 = vpop.f32.mrf.mxu1 }
 0x167   : > { %v1073_v19 = vmul.f32 0.044715, %v1065_v17  ;;  %v1032_v1 = vadd.f32 %v1031_v15, %v3856_v23 }
 0x169   : > { %v1081_v4 = vadd.f32 %v1073_v19, %v3860_v61  ;;  %v3868_v14 = vadd.f32 %v1032_v1, %v3478_v3 }
 0x16b   : > { %4867 = vst [vmem:[#allocation6_spill] sm:$0xff] %v3868_v14  ;;  %v3042_v59 = vmul.f32 -1.5957692, %v1081_v4  ;;  %v1058_v0 = vmul.f32 %v3868_v14, %v3868_v14 }
 0x16d   : > { %v1105_v2 = vmul.f32 1.442695, %v3042_v59  ;;  %v1066_v27 = vmul.f32 %v1058_v0, %v3868_v14 }
 0x16f   : > { %3261 = vpow2.f32 %v1105_v2  ;;  %v1074_v33 = vmul.f32 0.044715, %v1066_v27 }
 0x171   : > { %v1082_v34 = vadd.f32 %v1074_v33, %v3868_v14 }
 0x172   : > { %v1034_v18 = vpop.f32.mrf.mxu1 }
 0x173   : > { %v3043_v36 = vmul.f32 -1.5957692, %v1082_v34  ;;  %v1035_v49 = vadd.f32 %v1034_v18, %v3856_v23  ;;  %v3364_v34 = vld [vmem:[%s3472_s30 + $0x28] sm:$0xff] }
 0x175   : > { %v3262_v63 = vpop.eup %3261  ;;  %v1107_v52 = vmul.f32 1.442695, %v3043_v36  ;;  %v3878_v3 = vadd.f32 %v1035_v49, %v3484_v5 }
 0x176   : > { %v3875_v24 = vadd.f32 1.0, %v3262_v63 }
 0x177   : > { %4868 = vst [vmem:[#allocation7_spill] sm:$0xff] %v3878_v3  ;;  %3263 = vpow2.f32 %v1107_v52  ;;  %v1059_v28 = vmul.f32 %v3878_v3, %v3878_v3 }
 0x178   : > { %3265 = vrcp.f32 %v3875_v24  ;;  %v1140_v7 = vand.u32 2147483648, %v3875_v24  ;;  %vm1134_vm6 = vweird.f32 %v3875_v24  ;;  %v1138_v51 = vand.u32 2147483647, %v3875_v24 }
 0x179   : > { %v1067_v31 = vmul.f32 %v1059_v28, %v3878_v3 }
 0x17a   : > { %v1036_v35 = vpop.f32.mrf.mxu1  ;;  %v1141_v2 = vor.u32 1.1754944e-38, %v1140_v7  ;;  %vm1139_vm9 = vcmp.eq.f32.partialorder %v1138_v51, 8.507059e+37  ;;  %v3366_v51 = vld [vmem:[%s3472_s30 + $0x38] sm:$0xff] }
 0x17b   : > { %v1075_v21 = vmul.f32 0.044715, %v1067_v31  ;;  %v1037_v25 = vadd.f32 %v1036_v35, %v3856_v23 }
 0x17d   : > { %v3264_v37 = vpop.eup %3263  ;;  %v1083_v39 = vadd.f32 %v1075_v21, %v3878_v3  ;;  %v3889_v5 = vadd.f32 %v1037_v25, %v3487_v6 }
 0x17e   : > { %v3266_v22 = vpop.eup %3265  ;;  %v3885_v30 = vadd.f32 1.0, %v3264_v37 }
 0x17f   : > { %4869 = vst [vmem:[#allocation8_spill] sm:$0xff] %v3889_v5  ;;  %v1130_v57 = vmul.f32 %v3266_v22, %v3875_v24  ;;  %v3044_v45 = vmul.f32 -1.5957692, %v1083_v39  ;;  %v1060_v50 = vmul.f32 %v3889_v5, %v3889_v5  ;;  %vm1135_vm5 = vweird.f32 %v3266_v22 }
 0x180   : > { %3267 = vrcp.f32 %v3885_v30  ;;  %vm3920_vm7 = vmor %vm1134_vm6, %vm1135_vm5  ;;  %v1153_v20 = vand.u32 2147483647, %v3885_v30  ;;  %v1155_v17 = vand.u32 2147483648, %v3885_v30  ;;  %vm1149_vm10 = vweird.f32 %v3885_v30 }
 0x181   : > { %v1131_v6 = vsub.f32 1.0, %v1130_v57  ;;  %v1109_v44 = vmul.f32 1.442695, %v3044_v45  ;;  %v1068_v29 = vmul.f32 %v1060_v50, %v3889_v5  ;;  %vm440_vm6 = vcmask 523264  }
 0x182   : > { %v1039_v38 = vpop.f32.mrf.mxu1  ;;  %v1156_v49 = vor.u32 1.1754944e-38, %v1155_v17  ;;  %vm1154_vm12 = vcmp.eq.f32.partialorder %v1153_v20, 8.507059e+37  ;;  %441 = vst.msk [vmem:[#allocation3] sm:$0xff] %vm440_vm6, %v3380_v26 }
 0x183   : > { %v1132_v42 = vmul.f32 %v3266_v22, %v1131_v6  ;;  %3269 = vpow2.f32 %v1109_v44  ;;  %v1076_v32 = vmul.f32 0.044715, %v1068_v29  ;;  %v1040_v55 = vadd.f32 %v1039_v38, %v3856_v23  ;;  %v3365_v6 = vld [vmem:[%s3472_s30 + $0x30] sm:$0xff]  ;;  %445 = vst.msk [vmem:[#allocation3 + $0x90] sm:$0xff] %vm440_vm6, %v3380_v26 }
 0x185   : > { %v1084_v60 = vadd.f32 %v1076_v32, %v3889_v5  ;;  %v3911_v9 = vadd.f32 %v3363_v43, %v1040_v55  ;;  %v1133_v46 = vadd.f32 %v3266_v22, %v1132_v42 }
 0x186   : > { %v3268_v58 = vpop.eup %3267 }
 0x187   : > { %4870 = vst [vmem:[#allocation9_spill] sm:$0xff] %v3911_v9  ;;  %v1145_v62 = vmul.f32 %v3268_v58, %v3885_v30  ;;  %v3045_v11 = vmul.f32 -1.5957692, %v1084_v60  ;;  %v1061_v48 = vmul.f32 %v3911_v9, %v3911_v9  ;;  %v1137_v1 = vsel %vm3920_vm7, %v3266_v22, %v1133_v46 }
 0x188   : > { %vm1150_vm8 = vweird.f32 %v3268_v58  ;;  %v1142_v18 = vsel %vm1139_vm9, %v1141_v2, %v1137_v1 }
 0x189   : > { %v1146_v8 = vsub.f32 1.0, %v1145_v62  ;;  %v3270_v40 = vpop.eup %3269  ;;  %v1111_v53 = vmul.f32 1.442695, %v3045_v11  ;;  %v1069_v10 = vmul.f32 %v1061_v48, %v3911_v9  ;;  %vm1151_vm11 = vmor %vm1149_vm10, %vm1150_vm8  ;;  %v1249_v31 = vmul.f32 %v1142_v18, %v3860_v61 }
 0x18a   : > { %v3926_v15 = vadd.f32 1.0, %v3270_v40  ;;  %v1041_v19 = vpop.f32.mrf.mxu1 }
 0x18b   : > { %v1147_v4 = vmul.f32 %v3268_v58, %v1146_v8  ;;  %3271 = vpow2.f32 %v1111_v53  ;;  %v1077_v59 = vmul.f32 0.044715, %v1069_v10  ;;  %v1042_v0 = vadd.f32 %v1041_v19, %v3856_v23 }
 0x18c   : > { %3273 = vrcp.f32 %v3926_v15  ;;  %v1168_v40 = vand.u32 2147483647, %v3926_v15  ;;  %v1170_v53 = vand.u32 2147483648, %v3926_v15  ;;  %vm1164_vm14 = vweird.f32 %v3926_v15 }
 0x18d   : > { %v1148_v27 = vadd.f32 %v3268_v58, %v1147_v4  ;;  %v1085_v33 = vadd.f32 %v1077_v59, %v3911_v9  ;;  %v3935_v36 = vadd.f32 %v3364_v34, %v1042_v0 }
 0x18e   : > { %vm1169_vm2 = vcmp.eq.f32.partialorder %v1168_v40, 8.507059e+37  ;;  %v1171_v2 = vor.u32 1.1754944e-38, %v1170_v53 }
 0x18f   : > { %4873 = vst [vmem:[#allocation10_spill] sm:$0xff] %v3935_v36  ;;  %v1152_v63 = vsel %vm1151_vm11, %v3268_v58, %v1148_v27  ;;  %v3046_v52 = vmul.f32 -1.5957692, %v1085_v33  ;;  %v1062_v24 = vmul.f32 %v3935_v36, %v3935_v36 }
 0x190   : > { %v1157_v28 = vsel %vm1154_vm12, %v1156_v49, %v1152_v63 }
 0x191   : > { %v1250_v35 = vmul.f32 %v1157_v28, %v3868_v14  ;;  %v3272_v21 = vpop.eup %3271  ;;  %v1113_v25 = vmul.f32 1.442695, %v3046_v52  ;;  %v1070_v37 = vmul.f32 %v1062_v24, %v3935_v36 }
 0x192   : > { %v3274_v22 = vpop.eup %3273  ;;  %v3942_v30 = vadd.f32 1.0, %v3272_v21  ;;  %v1044_v39 = vpop.f32.mrf.mxu1 }
 0x193   : > { %v1257_v47 = vpack.c.bf16 %v1250_v35, %v1249_v31  ;;  %3275 = vpow2.f32 %v1113_v25  ;;  %v1078_v41 = vmul.f32 0.044715, %v1070_v37  ;;  %v1045_v57 = vadd.f32 %v1044_v39, %v3856_v23 }
 0x194   : > { %v1160_v45 = vmul.f32 %v3274_v22, %v3926_v15  ;;  %3277 = vrcp.f32 %v3942_v30  ;;  %vm1165_vm13 = vweird.f32 %v3274_v22  ;;  %v1183_v4 = vand.u32 2147483647, %v3942_v30 }
 0x195   : > { %3058 = vmatmul.msk.bf16.vlgmr.msra.gmra.mxu2 %vm415_vm0, %v1257_v47  ;;  %3070 = vmatmul.msk.bf16.vlgmr.msra.gmra.mxu3 %vm415_vm0, %v1257_v47  ;;  %v1086_v50 = vadd.f32 %v1078_v41, %v3935_v36  ;;  %v3951_v44 = vadd.f32 %v3365_v6, %v1045_v57  ;;  %vm3971_vm15 = vmor %vm1164_vm14, %vm1165_vm13  ;;  %vm1179_vm3 = vweird.f32 %v3942_v30 }
 0x196   : > { %v1161_v29 = vsub.f32 1.0, %v1160_v45  ;;  %vm1184_vm5 = vcmp.eq.f32.partialorder %v1183_v4, 8.507059e+37  ;;  %v3187_v45 = vld [vmem:[%s4839_s7 + $0x18] sm:$0xff] }
 0x197   : > { %4874 = vst [vmem:[#allocation11_spill] sm:$0xff] %v3951_v44  ;;  %v3047_v54 = vmul.f32 -1.5957692, %v1086_v50  ;;  %v1063_v56 = vmul.f32 %v3951_v44, %v3951_v44  ;;  %1659 = vmatpush.bf16.msrb.mxu0 %v3187_v45 }
 0x198   : > { %v1162_v38 = vmul.f32 %v3274_v22, %v1161_v29 }
 0x199   : > { %v3276_v42 = vpop.eup %3275  ;;  %v1115_v32 = vmul.f32 1.442695, %v3047_v54  ;;  %v1071_v55 = vmul.f32 %v1063_v56, %v3951_v44  ;;  %v3186_v54 = vld [vmem:[%s4839_s7 + $0x10] sm:$0xff] }
 0x19a   : > { %v3278_v58 = vpop.eup %3277  ;;  %v3956_v60 = vadd.f32 1.0, %v3276_v42  ;;  %v1046_v43 = vpop.f32.mrf.mxu1  ;;  %v1163_v11 = vadd.f32 %v3274_v22, %v1162_v38 }
 0x19b   : > { %3279 = vpow2.f32 %v1115_v32  ;;  %v1079_v46 = vmul.f32 0.044715, %v1071_v55  ;;  %v1047_v62 = vadd.f32 %v1046_v43, %v3856_v23  ;;  %v1175_v48 = vmul.f32 %v3278_v58, %v3942_v30  ;;  %1660 = vmatpush.bf16.msrb.mxu0 %v3186_v54 }
 0x19c   : > { %3281 = vrcp.f32 %v3956_v60  ;;  %v1185_v23 = vand.u32 2147483648, %v3942_v30  ;;  %v1167_v19 = vsel %vm3971_vm15, %v3274_v22, %v1163_v11  ;;  %vm1180_vm1 = vweird.f32 %v3278_v58 }
 0x19d   : > { %v1087_v7 = vadd.f32 %v1079_v46, %v3951_v44  ;;  %v3963_v8 = vadd.f32 %v3366_v51, %v1047_v62  ;;  %v1176_v10 = vsub.f32 1.0, %v1175_v48  ;;  %v1172_v63 = vsel %vm1169_vm2, %v1171_v2, %v1167_v19  ;;  %vm1181_vm4 = vmor %vm1179_vm3, %vm1180_vm1 }
 0x19e   : > { %v1186_v18 = vor.u32 1.1754944e-38, %v1185_v23  ;;  %v1251_v21 = vmul.f32 %v1172_v63, %v3878_v3  ;;  %v1200_v29 = vand.u32 2147483648, %v3956_v60  ;;  %vm1194_vm8 = vweird.f32 %v3956_v60 }
 0x19f   : > { %4875 = vst [vmem:[#allocation12_spill] sm:$0xff] %v3963_v8  ;;  %v3048_v12 = vmul.f32 -1.5957692, %v1087_v7  ;;  %v1064_v20 = vmul.f32 %v3963_v8, %v3963_v8  ;;  %v1177_v1 = vmul.f32 %v3278_v58, %v1176_v10  ;;  %v1198_v56 = vand.u32 2147483647, %v3956_v60 }
 0x1a0   : > { %v1201_v43 = vor.u32 1.1754944e-38, %v1200_v29 }
 0x1a1   : > { %v3280_v59 = vpop.eup %3279  ;;  %v1117_v15 = vmul.f32 1.442695, %v3048_v12  ;;  %v1072_v0 = vmul.f32 %v1064_v20, %v3963_v8  ;;  %v1178_v34 = vadd.f32 %v3278_v58, %v1177_v1  ;;  %vm1199_vm11 = vcmp.eq.f32.partialorder %v1198_v56, 8.507059e+37 }
 0x1a2   : > { %v3282_v27 = vpop.eup %3281  ;;  %v1126_v33 = vadd.f32 1.0, %v3280_v59 }
 0x1a3   : > { %3283 = vpow2.f32 %v1117_v15  ;;  %v1080_v49 = vmul.f32 0.044715, %v1072_v0  ;;  %v1190_v52 = vmul.f32 %v3282_v27, %v3956_v60  ;;  %v1182_v24 = vsel %vm1181_vm4, %v3278_v58, %v1178_v34 }
 0x1a4   : > { %3285 = vrcp.f32 %v1126_v33  ;;  %v1187_v31 = vsel %vm1184_vm5, %v1186_v18, %v1182_v24  ;;  %vm1195_vm7 = vweird.f32 %v3282_v27  ;;  %v1215_v42 = vand.u32 2147483648, %v1126_v33 }
 0x1a5   : > { %v1088_v28 = vadd.f32 %v1080_v49, %v3963_v8  ;;  %v1191_v35 = vsub.f32 1.0, %v1190_v52  ;;  %v1252_v25 = vmul.f32 %v1187_v31, %v3889_v5  ;;  %vm1196_vm9 = vmor %vm1194_vm8, %vm1195_vm7  ;;  %v1213_v58 = vand.u32 2147483647, %v1126_v33 }
 0x1a6   : > { %vm1209_vm12 = vweird.f32 %v1126_v33  ;;  %v1216_v51 = vor.u32 1.1754944e-38, %v1215_v42 }
 0x1a7   : > { %v3049_v37 = vmul.f32 -1.5957692, %v1088_v28  ;;  %v1192_v22 = vmul.f32 %v3282_v27, %v1191_v35  ;;  %v1258_v30 = vpack.c.bf16 %v1252_v25, %v1251_v21  ;;  %vm1214_vm14 = vcmp.eq.f32.partialorder %v1213_v58, 8.507059e+37  ;;  %v3185_v25 = vld [vmem:[%s4839_s7 + $0x8] sm:$0xff] }
 0x1a8   : > { %1661 = vmatpush.bf16.msrb.mxu0 %v3185_v25 }
 0x1a9   : > { %v3284_v39 = vpop.eup %3283  ;;  %v1119_v47 = vmul.f32 1.442695, %v3049_v37  ;;  %3059 = vmatmul.msk.bf16.gmra.mxu2 %vm415_vm0, %v1258_v30  ;;  %3071 = vmatmul.msk.bf16.gmra.mxu3 %vm415_vm0, %v1258_v30  ;;  %v1193_v50 = vadd.f32 %v3282_v27, %v1192_v22  ;;  %v3184_v37 = vld [vmem:[%s4839_s7] sm:$0xff] }
 0x1aa   : > { %v3286_v41 = vpop.eup %3285  ;;  %v1127_v57 = vadd.f32 1.0, %v3284_v39  ;;  %v1359_v22 = vld [vmem:[%s4835_s3] sm:$0xff] }
 0x1ab   : > { %3287 = vpow2.f32 %v1119_v47  ;;  %v1205_v6 = vmul.f32 %v3286_v41, %v1126_v33  ;;  %v1197_v32 = vsel %vm1196_vm9, %v3282_v27, %v1193_v50  ;;  %vm1210_vm10 = vweird.f32 %v3286_v41  ;;  %v1370_v47 = vld [vmem:[#allocation3] sm:$0xff] }
 0x1ac   : > { %3289 = vrcp.f32 %v1127_v57  ;;  %v1202_v7 = vsel %vm1199_vm11, %v1201_v43, %v1197_v32  ;;  %vm1211_vm13 = vmor %vm1209_vm12, %vm1210_vm10  ;;  %v1230_v59 = vand.u32 2147483648, %v1127_v57  ;;  %vm1224_vm1 = vweird.f32 %v1127_v57  ;;  %1662 = vmatpush.bf16.msrb.mxu0 %v3184_v37 }
 0x1ad   : > { %v1206_v38 = vsub.f32 1.0, %v1205_v6  ;;  %v1253_v10 = vmul.f32 %v1202_v7, %v3911_v9  ;;  %v1228_v15 = vand.u32 2147483647, %v1127_v57  ;;  %vm442_vm9 = vcmask 517120  }
 0x1ae   : > { %v1231_v18 = vor.u32 1.1754944e-38, %v1230_v59  ;;  %443 = vst.msk [vmem:[#allocation3 + $0x8] sm:$0x3] %vm442_vm9, %v3380_v26  ;;  %vm448_vm10 = vcmask 516096   ;;  %v4041_v30 = vperm.slane %v1359_v22, 0  ;;  %v4043_v39 = vperm.slane %v1359_v22, 1 }
 0x1af   : > { %v1207_v55 = vmul.f32 %v3286_v41, %v1206_v38  ;;  %vm1229_vm4 = vcmp.eq.f32.partialorder %v1228_v15, 8.507059e+37  ;;  %446 = vst.msk [vmem:[#allocation3 + $0x98] sm:$0x3] %vm442_vm9, %v3380_v26  ;;  %v4057_v6 = vperm.slane %v1359_v22, 2  ;;  %v4064_v38 = vperm.slane %v1359_v22, 3 }
 0x1b0   : > { %449 = vst.msk [vmem:[#allocation3 + $0x10] sm:$0x1] %vm448_vm10, %v3380_v26  ;;  %v1379_v45 = vmul.f32 %v4041_v30, %v1370_v47  ;;  %v4086_v15 = vperm.slane %v1359_v22, 7 }
 0x1b1   : > { %v3288_v46 = vpop.eup %3287  ;;  %v1208_v62 = vadd.f32 %v3286_v41, %v1207_v55  ;;  %450 = vst.msk [vmem:[#allocation3 + $0x20] sm:$0x1] %vm448_vm10, %v3380_v26 }
 0x1b2   : > { %v3290_v11 = vpop.eup %3289  ;;  %v1128_v48 = vadd.f32 1.0, %v3288_v46  ;;  %451 = vst.msk [vmem:[#allocation3 + $0x30] sm:$0x1] %vm448_vm10, %v3380_v26  ;;  %v4071_v46 = vperm.slane %v1359_v22, 4 }
 0x1b3   : > { %v1212_v40 = vsel %vm1211_vm13, %v3286_v41, %v1208_v62  ;;  %v1220_v60 = vmul.f32 %v3290_v11, %v1127_v57  ;;  %vm1225_vm15 = vweird.f32 %v3290_v11  ;;  %457 = vst.msk [vmem:[#allocation3 + $0x19] sm:$0x1] %vm448_vm10, %v3380_v26 }
 0x1b4   : > { %3291 = vrcp.f32 %v1128_v48  ;;  %v1217_v53 = vsel %vm1214_vm14, %v1216_v51, %v1212_v40  ;;  %vm1226_vm2 = vmor %vm1224_vm1, %vm1225_vm15  ;;  %v1245_v2 = vand.u32 2147483648, %v1128_v48  ;;  %v1243_v34 = vand.u32 2147483647, %v1128_v48  ;;  %458 = vst.msk [vmem:[#allocation3 + $0x29] sm:$0x1] %vm448_vm10, %v3380_v26 }
 0x1b5   : > { %v1254_v23 = vmul.f32 %v1217_v53, %v3935_v36  ;;  %v1221_v12 = vsub.f32 1.0, %v1220_v60  ;;  %vm1239_vm5 = vweird.f32 %v1128_v48  ;;  %459 = vst.msk [vmem:[#allocation3 + $0x39] sm:$0x1] %vm448_vm10, %v3380_v26  ;;  %v1387_v41 = vld [vmem:[#allocation3 + $0x1] sm:$0xff]  ;;  %v4076_v40 = vperm.slane %v1359_v22, 5 }
 0x1b6   : > { %v1246_v52 = vor.u32 1.1754944e-38, %v1245_v2  ;;  %vm1244_vm8 = vcmp.eq.f32.partialorder %v1243_v34, 8.507059e+37  ;;  %452 = vst.msk [vmem:[#allocation3 + $0x40] sm:$0x1] %vm448_vm10, %v3380_v26  ;;  %v1396_v50 = vmul.f32 %v4043_v39, %v1387_v41  ;;  %v1412_v29 = vld [vmem:[#allocation3 + $0x2] sm:$0xff]  ;;  %v4078_v60 = vperm.slane %v1359_v22, 6 }
 0x1b7   : > { %v1259_v20 = vpack.c.bf16 %v1254_v23, %v1253_v10  ;;  %v1222_v17 = vmul.f32 %v3290_v11, %v1221_v12  ;;  %453 = vst.msk [vmem:[#allocation3 + $0x50] sm:$0x1] %vm448_vm10, %v3380_v26  ;;  %v1421_v56 = vmul.f32 %v4057_v6, %v1412_v29 }
 0x1b8   : > { %454 = vst.msk [vmem:[#allocation3 + $0x60] sm:$0x1] %vm448_vm10, %v3380_v26  ;;  %v1404_v54 = vadd.f32 %v1396_v50, %v1379_v45 }
 0x1b9   : > { %3060 = vmatmul.msk.bf16.gmra.mxu2 %vm415_vm0, %v1259_v20  ;;  %3072 = vmatmul.msk.bf16.gmra.mxu3 %vm415_vm0, %v1259_v20  ;;  %v1223_v1 = vadd.f32 %v3290_v11, %v1222_v17  ;;  %455 = vst.msk [vmem:[#allocation3 + $0x70] sm:$0x1] %vm448_vm10, %v3380_v26 }
 0x1ba   : > { %v3292_v19 = vpop.eup %3291  ;;  %456 = vst.msk [vmem:[#allocation3 + $0x80] sm:$0x1] %vm448_vm10, %v3380_v26  ;;  %v1429_v58 = vadd.f32 %v1421_v56, %v1404_v54  ;;  %v4111_v54 = vld [vmem:[%s4836_s4] ss:$0 sm:$0xff] }
 0x1bb   : > { %v1235_v4 = vmul.f32 %v3292_v19, %v1128_v48  ;;  %v1227_v27 = vsel %vm1226_vm2, %v3290_v11, %v1223_v1  ;;  %vm1240_vm3 = vweird.f32 %v3292_v19  ;;  %460 = vst.msk [vmem:[#allocation3 + $0x49] sm:$0x1] %vm448_vm10, %v3380_v26 }
 0x1bc   : > { %v1232_v63 = vsel %vm1229_vm4, %v1231_v18, %v1227_v27  ;;  %vm1241_vm7 = vmor %vm1239_vm5, %vm1240_vm3  ;;  %461 = vst.msk [vmem:[#allocation3 + $0x59] sm:$0x1] %vm448_vm10, %v3380_v26 }
 0x1bd   : > { %v1236_v0 = vsub.f32 1.0, %v1235_v4  ;;  %v1255_v31 = vmul.f32 %v1232_v63, %v3951_v44  ;;  %462 = vst.msk [vmem:[#allocation3 + $0x69] sm:$0x1] %vm448_vm10, %v3380_v26  ;;  %v4097_v63 = vld [vmem:[%s4835_s3 + $0x8] ss:$0 sm:$0xff] }
 0x1be   : > { %463 = vst.msk [vmem:[#allocation3 + $0x79] sm:$0x1] %vm448_vm10, %v3380_v26 }
 0x1bf   : > { %v1237_v33 = vmul.f32 %v3292_v19, %v1236_v0  ;;  %464 = vst.msk [vmem:[#allocation3 + $0x89] sm:$0x1] %vm448_vm10, %v3380_v26 }
 0x1c1   : > { %v1238_v49 = vadd.f32 %v3292_v19, %v1237_v33 }
 0x1c3   : > { %v1242_v24 = vsel %vm1241_vm7, %v3292_v19, %v1238_v49 }
 0x1c4   : > { %v1247_v28 = vsel %vm1244_vm8, %v1246_v52, %v1242_v24 }
 0x1c5   : > { %v1256_v35 = vmul.f32 %v1247_v28, %v3963_v8 }
 0x1c7   : > { %v1260_v21 = vpack.c.bf16 %v1256_v35, %v1255_v31 }
 0x1c9   : > { %3061 = vmatmul.msk.bf16.gmra.mxu2 %vm415_vm0, %v1260_v21  ;;  %3073 = vmatmul.msk.bf16.gmra.mxu3 %vm415_vm0, %v1260_v21 }
 0x218   : > { %v4049_v57 = vpop.f32.mrf.mxu2 }
 0x219   : > { %1362 = vst.msk [vmem:[#allocation3 + $0x11] sm:$0xff] %vm440_vm6, %v4049_v57 }
 0x220   : > { %v4066_v42 = vpop.f32.mrf.mxu2  ;;  %v1371_v32 = vld [vmem:[#allocation3 + $0x10] sm:$0xff] }
 0x221   : > { %1363 = vst.msk [vmem:[#allocation3 + $0x21] sm:$0xff] %vm440_vm6, %v4066_v42  ;;  %v1388_v55 = vld [vmem:[#allocation3 + $0x11] sm:$0xff]  ;;  %v1446_v43 = vmul.f32 %v4064_v38, %v1371_v32  ;;  %v1380_v62 = vmul.f32 %v4041_v30, %v1371_v32 }
 0x222   : > { %v1397_v26 = vmul.f32 %v4043_v39, %v1388_v55  ;;  %v1413_v48 = vld [vmem:[#allocation3 + $0x12] sm:$0xff]  ;;  %v1471_v51 = vmul.f32 %v4071_v46, %v1388_v55 }
 0x223   : > { %v1454_v11 = vadd.f32 %v1446_v43, %v1429_v58  ;;  %v1422_v23 = vmul.f32 %v4057_v6, %v1413_v48  ;;  %v1496_v20 = vmul.f32 %v4076_v40, %v1413_v48 }
 0x224   : > { %v1405_v53 = vadd.f32 %v1397_v26, %v1380_v62 }
 0x225   : > { %v1479_v10 = vadd.f32 %v1471_v51, %v1454_v11 }
 0x226   : > { %v1430_v19 = vadd.f32 %v1422_v23, %v1405_v53 }
 0x227   : > { %v1504_v59 = vadd.f32 %v1496_v20, %v1479_v10 }
 0x228   : > { %v1438_v7 = vld [vmem:[#allocation3 + $0x20] sm:$0xff] }
 0x229   : > { %v1447_v12 = vmul.f32 %v4064_v38, %v1438_v7  ;;  %v1522_v17 = vmul.f32 %v4078_v60, %v1438_v7  ;;  %v1463_v1 = vld [vmem:[#allocation3 + $0x21] sm:$0xff]  ;;  %v1381_v27 = vmul.f32 %v1438_v7, %v4041_v30 }
 0x22a   : > { %v1398_v33 = vmul.f32 %v1463_v1, %v4043_v39  ;;  %v1472_v34 = vmul.f32 %v4071_v46, %v1463_v1  ;;  %v1488_v18 = vld [vmem:[#allocation3 + $0x22] sm:$0xff]  ;;  %v1547_v49 = vmul.f32 %v4086_v15, %v1463_v1 }
 0x22b   : > { %v1455_v0 = vadd.f32 %v1447_v12, %v1430_v19  ;;  %v1530_v2 = vadd.f32 %v1522_v17, %v1504_v59  ;;  %v1497_v31 = vmul.f32 %v4076_v40, %v1488_v18  ;;  %v1572_v37 = vmul.f32 %v4097_v63, %v1488_v18 }
 0x22c   : > { %v4084_v4 = vpop.f32.mrf.mxu2  ;;  %v1406_v28 = vadd.f32 %v1398_v33, %v1381_v27  ;;  %v1423_v22 = vmul.f32 %v1488_v18, %v4057_v6 }
 0x22d   : > { %1364 = vst.msk [vmem:[#allocation3 + $0x31] sm:$0xff] %vm440_vm6, %v4084_v4  ;;  %v1480_v52 = vadd.f32 %v1472_v34, %v1455_v0  ;;  %v1555_v24 = vadd.f32 %v1547_v49, %v1530_v2 }
 0x22e   : > { %v1431_v32 = vadd.f32 %v1423_v22, %v1406_v28 }
 0x22f   : > { %v1505_v47 = vadd.f32 %v1497_v31, %v1480_v52  ;;  %v1580_v29 = vadd.f32 %v1572_v37, %v1555_v24 }
 0x231   : > { %v1591_v51 = vadd.f32 %v4111_v54, %v1580_v29 }
 0x233   : > { %v1599_v2 = vmax.f32 %v1591_v51, 0.0 }
 0x234   : > { %v4100_v35 = vpop.f32.mrf.mxu2  ;;  %v1514_v21 = vld [vmem:[#allocation3 + $0x30] sm:$0xff] }
 0x235   : > { %v1539_v25 = vld [vmem:[#allocation3 + $0x31] sm:$0xff]  ;;  %1365 = vst.msk [vmem:[#allocation3 + $0x41] sm:$0xff] %vm440_vm6, %v4100_v35  ;;  %v1523_v41 = vmul.f32 %v4078_v60, %v1514_v21  ;;  %v1382_v45 = vmul.f32 %v1514_v21, %v4041_v30  ;;  %v1448_v55 = vmul.f32 %v1514_v21, %v4064_v38 }
 0x236   : > { %v1564_v50 = vld [vmem:[#allocation3 + $0x32] sm:$0xff]  ;;  %v1399_v56 = vmul.f32 %v1539_v25, %v4043_v39  ;;  %v1548_v43 = vmul.f32 %v4086_v15, %v1539_v25  ;;  %v1473_v26 = vmul.f32 %v1539_v25, %v4071_v46 }
 0x237   : > { %v1531_v58 = vadd.f32 %v1523_v41, %v1505_v47  ;;  %v1456_v62 = vadd.f32 %v1448_v55, %v1431_v32  ;;  %v1573_v48 = vmul.f32 %v4097_v63, %v1564_v50  ;;  %v1424_v23 = vmul.f32 %v1564_v50, %v4057_v6 }
 0x238   : > { %v1407_v7 = vadd.f32 %v1399_v56, %v1382_v45  ;;  %v1498_v19 = vmul.f32 %v1564_v50, %v4076_v40 }
 0x239   : > { %v1556_v11 = vadd.f32 %v1548_v43, %v1531_v58  ;;  %v1481_v53 = vadd.f32 %v1473_v26, %v1456_v62 }
 0x23a   : > { %v1432_v59 = vadd.f32 %v1424_v23, %v1407_v7 }
 0x23b   : > { %v1581_v10 = vadd.f32 %v1573_v48, %v1556_v11  ;;  %v1506_v27 = vadd.f32 %v1498_v19, %v1481_v53 }
 0x23c   : > { %v4120_v12 = vpop.f32.mrf.mxu2  ;;  %v1440_v20 = vld [vmem:[#allocation3 + $0x40] sm:$0xff] }
 0x23d   : > { %v1465_v17 = vld [vmem:[#allocation3 + $0x41] sm:$0xff]  ;;  %1366 = vst.msk [vmem:[#allocation3 + $0x51] sm:$0xff] %vm440_vm6, %v4120_v12  ;;  %v1592_v1 = vadd.f32 %v4111_v54, %v1581_v10  ;;  %v1449_v0 = vmul.f32 %v4064_v38, %v1440_v20  ;;  %v1524_v33 = vmul.f32 %v4078_v60, %v1440_v20  ;;  %v1383_v34 = vmul.f32 %v1440_v20, %v4041_v30 }
 0x23e   : > { %v1474_v52 = vmul.f32 %v4071_v46, %v1465_v17  ;;  %v1400_v24 = vmul.f32 %v1465_v17, %v4043_v39  ;;  %v1490_v28 = vld [vmem:[#allocation3 + $0x42] sm:$0xff]  ;;  %v1549_v21 = vmul.f32 %v4086_v15, %v1465_v17 }
 0x23f   : > { %v1600_v18 = vmax.f32 %v1592_v1, 0.0  ;;  %v1457_v49 = vadd.f32 %v1449_v0, %v1432_v59  ;;  %v1532_v31 = vadd.f32 %v1524_v33, %v1506_v27  ;;  %v1499_v41 = vmul.f32 %v4076_v40, %v1490_v28 }
 0x240   : > { %v1408_v47 = vadd.f32 %v1400_v24, %v1383_v34  ;;  %v1574_v56 = vmul.f32 %v4097_v63, %v1490_v28  ;;  %v1425_v32 = vmul.f32 %v1490_v28, %v4057_v6 }
 0x241   : > { %v1607_v25 = vpack.c.bf16 %v1600_v18, %v1599_v2  ;;  %v1482_v37 = vadd.f32 %v1474_v52, %v1457_v49  ;;  %v1557_v22 = vadd.f32 %v1549_v21, %v1532_v31 }
 0x242   : > { %v1433_v48 = vadd.f32 %v1425_v32, %v1408_v47 }
 0x243   : > { %3090 = vmatmul.msk.bf16.vlgmr.msrb.gmra.mxu0 %vm440_vm6, %v1607_v25  ;;  %v1507_v55 = vadd.f32 %v1499_v41, %v1482_v37  ;;  %v1582_v26 = vadd.f32 %v1574_v56, %v1557_v22 }
 0x244   : > { %v4134_v45 = vpop.f32.mrf.mxu2  ;;  %v1516_v50 = vld [vmem:[#allocation3 + $0x50] sm:$0xff] }
 0x245   : > { %v1541_v29 = vld [vmem:[#allocation3 + $0x51] sm:$0xff]  ;;  %1367 = vst.msk [vmem:[#allocation3 + $0x61] sm:$0xff] %vm440_vm6, %v4134_v45  ;;  %v1525_v58 = vmul.f32 %v4078_v60, %v1516_v50  ;;  %v1384_v43 = vmul.f32 %v1516_v50, %v4041_v30  ;;  %v1450_v7 = vmul.f32 %v1516_v50, %v4064_v38  ;;  %v1593_v1 = vadd.f32 %v4111_v54, %v1582_v26 }
 0x246   : > { %v1566_v62 = vld [vmem:[#allocation3 + $0x52] sm:$0xff]  ;;  %v1401_v11 = vmul.f32 %v1541_v29, %v4043_v39  ;;  %v1550_v53 = vmul.f32 %v4086_v15, %v1541_v29  ;;  %v1475_v23 = vmul.f32 %v1541_v29, %v4071_v46 }
 0x247   : > { %v1533_v51 = vadd.f32 %v1525_v58, %v1507_v55  ;;  %v1458_v10 = vadd.f32 %v1450_v7, %v1433_v48  ;;  %v1575_v17 = vmul.f32 %v4097_v63, %v1566_v62  ;;  %v1426_v2 = vmul.f32 %v1566_v62, %v4057_v6 }
 0x248   : > { %v1409_v19 = vadd.f32 %v1401_v11, %v1384_v43  ;;  %v1500_v18 = vmul.f32 %v1566_v62, %v4076_v40  ;;  %v1601_v28 = vmax.f32 %v1593_v1, 0.0 }
 0x249   : > { %v1558_v20 = vadd.f32 %v1550_v53, %v1533_v51  ;;  %v1483_v59 = vadd.f32 %v1475_v23, %v1458_v10 }
 0x24a   : > { %v1434_v52 = vadd.f32 %v1426_v2, %v1409_v19 }
 0x24b   : > { %v1583_v0 = vadd.f32 %v1575_v17, %v1558_v20  ;;  %v1508_v31 = vadd.f32 %v1500_v18, %v1483_v59 }
 0x24c   : > { %v4149_v27 = vpop.f32.mrf.mxu2  ;;  %v1442_v33 = vld [vmem:[#allocation3 + $0x60] sm:$0xff] }
 0x24d   : > { %v1467_v34 = vld [vmem:[#allocation3 + $0x61] sm:$0xff]  ;;  %1368 = vst.msk [vmem:[#allocation3 + $0x71] sm:$0xff] %vm440_vm6, %v4149_v27  ;;  %v1594_v49 = vadd.f32 %v4111_v54, %v1583_v0  ;;  %v1451_v24 = vmul.f32 %v4064_v38, %v1442_v33  ;;  %v1526_v21 = vmul.f32 %v4078_v60, %v1442_v33  ;;  %v1385_v25 = vmul.f32 %v1442_v33, %v4041_v30 }
 0x24e   : > { %v1476_v47 = vmul.f32 %v4071_v46, %v1467_v34  ;;  %v1402_v41 = vmul.f32 %v1467_v34, %v4043_v39  ;;  %v1492_v50 = vld [vmem:[#allocation3 + $0x62] sm:$0xff]  ;;  %v1551_v55 = vmul.f32 %v4086_v15, %v1467_v34 }
 0x24f   : > { %v1602_v37 = vmax.f32 %v1594_v49, 0.0  ;;  %v1459_v22 = vadd.f32 %v1451_v24, %v1434_v52  ;;  %v1534_v29 = vadd.f32 %v1526_v21, %v1508_v31  ;;  %v1501_v43 = vmul.f32 %v4076_v40, %v1492_v50 }
 0x250   : > { %v1410_v58 = vadd.f32 %v1402_v41, %v1385_v25  ;;  %v1427_v7 = vmul.f32 %v1492_v50, %v4057_v6  ;;  %v1576_v10 = vmul.f32 %v4097_v63, %v1492_v50  ;;  %v1520_v41 = vld [vmem:[#allocation3 + $0x90] sm:$0xff] }
 0x251   : > { %v1608_v56 = vpack.c.bf16 %v1602_v37, %v1601_v28  ;;  %v1484_v32 = vadd.f32 %v1476_v47, %v1459_v22  ;;  %v1559_v62 = vadd.f32 %v1551_v55, %v1534_v29 }
 0x252   : > { %v1435_v19 = vadd.f32 %v1427_v7, %v1410_v58 }
 0x253   : > { %3091 = vmatmul.msk.bf16.gmra.mxu0 %vm440_vm6, %v1608_v56  ;;  %v1509_v51 = vadd.f32 %v1501_v43, %v1484_v32  ;;  %v1584_v2 = vadd.f32 %v1576_v10, %v1559_v62 }
 0x254   : > { %v4163_v26 = vpop.f32.mrf.mxu2  ;;  %v1518_v11 = vld [vmem:[#allocation3 + $0x70] sm:$0xff] }
 0x255   : > { %v1543_v48 = vld [vmem:[#allocation3 + $0x71] sm:$0xff]  ;;  %1369 = vst.msk [vmem:[#allocation3 + $0x81] sm:$0xff] %vm440_vm6, %v4163_v26  ;;  %v1527_v53 = vmul.f32 %v4078_v60, %v1518_v11  ;;  %v1386_v23 = vmul.f32 %v1518_v11, %v4041_v30  ;;  %v1452_v1 = vmul.f32 %v1518_v11, %v4064_v38  ;;  %v1595_v30 = vadd.f32 %v4111_v54, %v1584_v2 }
 0x256   : > { %v1568_v20 = vld [vmem:[#allocation3 + $0x72] sm:$0xff]  ;;  %v1403_v17 = vmul.f32 %v1543_v48, %v4043_v39  ;;  %v1552_v0 = vmul.f32 %v4086_v15, %v1543_v48  ;;  %v1477_v34 = vmul.f32 %v1543_v48, %v4071_v46 }
 0x257   : > { %v1535_v59 = vadd.f32 %v1527_v53, %v1509_v51  ;;  %v1460_v33 = vadd.f32 %v1452_v1, %v1435_v19  ;;  %v1577_v49 = vmul.f32 %v4097_v63, %v1568_v20  ;;  %v1428_v39 = vmul.f32 %v1568_v20, %v4057_v6  ;;  %v1545_v11 = vld [vmem:[#allocation3 + $0x91] sm:$0xff] }
 0x258   : > { %v1411_v52 = vadd.f32 %v1403_v17, %v1386_v23  ;;  %v1502_v25 = vmul.f32 %v1568_v20, %v4076_v40  ;;  %v1603_v32 = vmax.f32 %v1595_v30, 0.0  ;;  %v1529_v6 = vmul.f32 %v4078_v60, %v1520_v41  ;;  %v1570_v53 = vld [vmem:[#allocation3 + $0x92] sm:$0xff] }
 0x259   : > { %v1560_v18 = vadd.f32 %v1552_v0, %v1535_v59  ;;  %v1485_v24 = vadd.f32 %v1477_v34, %v1460_v33  ;;  %v1554_v23 = vmul.f32 %v4086_v15, %v1545_v11 }
 0x25a   : > { %v1436_v22 = vadd.f32 %v1428_v39, %v1411_v52  ;;  %v3382_v52 = vmov 0  }
 0x25b   : > { %v1585_v28 = vadd.f32 %v1577_v49, %v1560_v18  ;;  %v1510_v29 = vadd.f32 %v1502_v25, %v1485_v24  ;;  %v3381_v49 = vmov 1   ;;  %3215 = vset.pattern.permute.xlu0 %v3382_v52  ;;  %3217 = vset.pattern.permute.xlu2 %v3382_v52 }
 0x25c   : > { %v1444_v31 = vld [vmem:[#allocation3 + $0x80] sm:$0xff]  ;;  %3216 = vset.pattern.permute.xlu1 %v3381_v49 }
 0x25d   : > { %v1469_v21 = vld [vmem:[#allocation3 + $0x81] sm:$0xff]  ;;  %v1596_v37 = vadd.f32 %v4111_v54, %v1585_v28  ;;  %v1453_v47 = vmul.f32 %v4064_v38, %v1444_v31  ;;  %v1528_v56 = vmul.f32 %v4078_v60, %v1444_v31  ;;  %v1579_v60 = vmul.f32 %v4097_v63, %v1570_v53 }
 0x25e   : > { %v1494_v50 = vld [vmem:[#allocation3 + $0x82] sm:$0xff]  ;;  %v1478_v43 = vmul.f32 %v4071_v46, %v1469_v21  ;;  %v1553_v38 = vmul.f32 %v4086_v15, %v1469_v21 }
 0x25f   : > { %v1604_v55 = vmax.f32 %v1596_v37, 0.0  ;;  %v1461_v58 = vadd.f32 %v1453_v47, %v1436_v22  ;;  %v1536_v62 = vadd.f32 %v1528_v56, %v1510_v29  ;;  %v1503_v51 = vmul.f32 %v4076_v40, %v1494_v50 }
 0x260   : > { %v1578_v46 = vmul.f32 %v4097_v63, %v1494_v50 }
 0x261   : > { %v1609_v48 = vpack.c.bf16 %v1604_v55, %v1603_v32  ;;  %v1486_v7 = vadd.f32 %v1478_v43, %v1461_v58  ;;  %v1561_v20 = vadd.f32 %v1553_v38, %v1536_v62 }
 0x263   : > { %3092 = vmatmul.msk.bf16.gmra.mxu0 %vm440_vm6, %v1609_v48  ;;  %v1511_v10 = vadd.f32 %v1503_v51, %v1486_v7  ;;  %v1586_v1 = vadd.f32 %v1578_v46, %v1561_v20 }
 0x265   : > { %v1537_v17 = vadd.f32 %v1529_v6, %v1511_v10  ;;  %v1597_v0 = vadd.f32 %v4111_v54, %v1586_v1 }
 0x267   : > { %v1562_v19 = vadd.f32 %v1554_v23, %v1537_v17  ;;  %v1605_v33 = vmax.f32 %v1597_v0, 0.0 }
 0x269   : > { %v1587_v59 = vadd.f32 %v1579_v60, %v1562_v19 }
 0x26b   : > { %v1598_v40 = vadd.f32 %v4111_v54, %v1587_v59 }
 0x26d   : > { %v1606_v2 = vmax.f32 %v1598_v40, 0.0 }
 0x26f   : > { %v1610_v34 = vpack.c.bf16 %v1606_v2, %v1605_v33 }
 0x273   : > { %3093 = vmatmul.msk.bf16.gmra.mxu0 %vm440_vm6, %v1610_v34 }
 0x2c0   : > { %v1664_v18 = vpop.f32.mrf.mxu0 }
 0x2c1   : > { %v3094_v15 = vmul.f32 -1.442695, %v1664_v18 }
 0x2c3   : > { %3293 = vpow2.f32 %v3094_v15 }
 0x2c8   : > { %v1666_v63 = vpop.f32.mrf.mxu0 }
 0x2c9   : > { %v3294_v24 = vpop.eup %3293  ;;  %v3095_v28 = vmul.f32 -1.442695, %v1666_v63 }
 0x2ca   : > { %v1708_v54 = vadd.f32 1.0, %v3294_v24 }
 0x2cb   : > { %3295 = vpow2.f32 %v3095_v28 }
 0x2cc   : > { %3297 = vrcp.f32 %v1708_v54  ;;  %v1727_v47 = vand.u32 2147483648, %v1708_v54  ;;  %v1725_v50 = vand.u32 2147483647, %v1708_v54  ;;  %vm1721_vm12 = vweird.f32 %v1708_v54 }
 0x2ce   : > { %v1728_v6 = vor.u32 1.1754944e-38, %v1727_v47  ;;  %vm1726_vm14 = vcmp.eq.f32.partialorder %v1725_v50, 8.507059e+37 }
 0x2d0   : > { %v1669_v30 = vpop.f32.mrf.mxu0 }
 0x2d1   : > { %v3296_v39 = vpop.eup %3295  ;;  %v3096_v31 = vmul.f32 -1.442695, %v1669_v30 }
 0x2d2   : > { %v3298_v21 = vpop.eup %3297  ;;  %v1709_v25 = vadd.f32 1.0, %v3296_v39 }
 0x2d3   : > { %3299 = vpow2.f32 %v3096_v31  ;;  %v1717_v37 = vmul.f32 %v3298_v21, %v1708_v54  ;;  %vm1722_vm11 = vweird.f32 %v3298_v21 }
 0x2d4   : > { %3301 = vrcp.f32 %v1709_v25  ;;  %vm1723_vm13 = vmor %vm1721_vm12, %vm1722_vm11  ;;  %v1742_v51 = vand.u32 2147483648, %v1709_v25  ;;  %v1740_v53 = vand.u32 2147483647, %v1709_v25  ;;  %vm1736_vm1 = vweird.f32 %v1709_v25 }
 0x2d5   : > { %v1718_v22 = vsub.f32 1.0, %v1717_v37 }
 0x2d6   : > { %v1743_v19 = vor.u32 1.1754944e-38, %v1742_v51  ;;  %vm1741_vm3 = vcmp.eq.f32.partialorder %v1740_v53, 8.507059e+37 }
 0x2d7   : > { %v1719_v41 = vmul.f32 %v3298_v21, %v1718_v22 }
 0x2d8   : > { %v1671_v29 = vpop.f32.mrf.mxu0 }
 0x2d9   : > { %v3300_v56 = vpop.eup %3299  ;;  %v3097_v32 = vmul.f32 -1.442695, %v1671_v29  ;;  %v1720_v55 = vadd.f32 %v3298_v21, %v1719_v41 }
 0x2da   : > { %v3302_v58 = vpop.eup %3301  ;;  %v1710_v43 = vadd.f32 1.0, %v3300_v56 }
 0x2db   : > { %3303 = vpow2.f32 %v3097_v32  ;;  %v1724_v62 = vsel %vm1723_vm13, %v3298_v21, %v1720_v55  ;;  %v1732_v11 = vmul.f32 %v3302_v58, %v1709_v25  ;;  %vm1737_vm15 = vweird.f32 %v3302_v58 }
 0x2dc   : > { %3305 = vrcp.f32 %v1710_v43  ;;  %v1729_v48 = vsel %vm1726_vm14, %v1728_v6, %v1724_v62  ;;  %vm1738_vm2 = vmor %vm1736_vm1, %vm1737_vm15  ;;  %v1757_v2 = vand.u32 2147483648, %v1710_v43  ;;  %v1755_v34 = vand.u32 2147483647, %v1710_v43 }
 0x2dd   : > { %1880 = vperm.xlu1 %3216, %v1729_v48   ;;  %1841 = vperm.xlu0 %3215, %v1729_v48   ;;  %v1733_v7 = vsub.f32 1.0, %v1732_v11  ;;  %vm1751_vm5 = vweird.f32 %v1710_v43 }
 0x2de   : > { %v1758_v30 = vor.u32 1.1754944e-38, %v1757_v2  ;;  %vm1756_vm8 = vcmp.eq.f32.partialorder %v1755_v34, 8.507059e+37 }
 0x2df   : > { %v1734_v38 = vmul.f32 %v3302_v58, %v1733_v7 }
 0x2e0   : > { %v1674_v10 = vpop.f32.mrf.mxu0 }
 0x2e1   : > { %v3304_v23 = vpop.eup %3303  ;;  %v3098_v20 = vmul.f32 -1.442695, %v1674_v10  ;;  %v1735_v17 = vadd.f32 %v3302_v58, %v1734_v38 }
 0x2e2   : > { %v3306_v46 = vpop.eup %3305  ;;  %v1711_v60 = vadd.f32 1.0, %v3304_v23 }
 0x2e3   : > { %3307 = vpow2.f32 %v3098_v20  ;;  %v1739_v1 = vsel %vm1738_vm2, %v3302_v58, %v1735_v17  ;;  %v1747_v59 = vmul.f32 %v3306_v46, %v1710_v43  ;;  %vm1752_vm4 = vweird.f32 %v3306_v46 }
 0x2e4   : > { %3309 = vrcp.f32 %v1711_v60  ;;  %v1744_v0 = vsel %vm1741_vm3, %v1743_v19, %v1739_v1  ;;  %vm1753_vm7 = vmor %vm1751_vm5, %vm1752_vm4  ;;  %v1772_v37 = vand.u32 2147483648, %v1711_v60  ;;  %v1770_v47 = vand.u32 2147483647, %v1711_v60 }
 0x2e5   : > { %1884 = vperm.xlu1 %3216, %v1744_v0   ;;  %1846 = vperm.xlu0 %3215, %v1744_v0   ;;  %v1748_v40 = vsub.f32 1.0, %v1747_v59  ;;  %vm1766_vm10 = vweird.f32 %v1711_v60 }
 0x2e6   : > { %v1773_v58 = vor.u32 1.1754944e-38, %v1772_v37  ;;  %vm1771_vm12 = vcmp.eq.f32.partialorder %v1770_v47, 8.507059e+37 }
 0x2e7   : > { %v1749_v33 = vmul.f32 %v3306_v46, %v1748_v40 }
 0x2e8   : > { %v1676_v18 = vpop.f32.mrf.mxu0 }
 0x2e9   : > { %v3308_v15 = vpop.eup %3307  ;;  %v3099_v63 = vmul.f32 -1.442695, %v1676_v18  ;;  %v1750_v24 = vadd.f32 %v3306_v46, %v1749_v33 }
 0x2ea   : > { %v3310_v28 = vpop.eup %3309  ;;  %v1712_v54 = vadd.f32 1.0, %v3308_v15 }
 0x2eb   : > { %3311 = vpow2.f32 %v3099_v63  ;;  %v1754_v39 = vsel %vm1753_vm7, %v3306_v46, %v1750_v24  ;;  %v1762_v31 = vmul.f32 %v3310_v28, %v1711_v60  ;;  %vm1767_vm9 = vweird.f32 %v3310_v28 }
 0x2ec   : > { %3313 = vrcp.f32 %v1712_v54  ;;  %v1759_v21 = vsel %vm1756_vm8, %v1758_v30, %v1754_v39  ;;  %vm1768_vm11 = vmor %vm1766_vm10, %vm1767_vm9  ;;  %v1787_v48 = vand.u32 2147483648, %v1712_v54  ;;  %v1785_v51 = vand.u32 2147483647, %v1712_v54 }
 0x2ed   : > { %1851 = vperm.xlu2 %3217, %v1759_v21   ;;  %v1763_v25 = vsub.f32 1.0, %v1762_v31  ;;  %vm1781_vm14 = vweird.f32 %v1712_v54 }
 0x2ee   : > { %v1788_v46 = vor.u32 1.1754944e-38, %v1787_v48  ;;  %vm1786_vm1 = vcmp.eq.f32.partialorder %v1785_v51, 8.507059e+37 }
 0x2ef   : > { %v1764_v22 = vmul.f32 %v3310_v28, %v1763_v25 }
 0x2f0   : > { %v1679_v41 = vpop.f32.mrf.mxu0 }
 0x2f1   : > { %v3312_v50 = vpop.eup %3311  ;;  %v3100_v29 = vmul.f32 -1.442695, %v1679_v41  ;;  %v1765_v56 = vadd.f32 %v3310_v28, %v1764_v22 }
 0x2f2   : > { %v3314_v32 = vpop.eup %3313  ;;  %v1713_v55 = vadd.f32 1.0, %v3312_v50 }
 0x2f3   : > { %3315 = vpow2.f32 %v3100_v29  ;;  %v1769_v43 = vsel %vm1768_vm11, %v3310_v28, %v1765_v56  ;;  %v1777_v6 = vmul.f32 %v3314_v32, %v1712_v54  ;;  %vm1782_vm13 = vweird.f32 %v3314_v32 }
 0x2f4   : > { %3317 = vrcp.f32 %v1713_v55  ;;  %v1774_v62 = vsel %vm1771_vm12, %v1773_v58, %v1769_v43  ;;  %vm1783_vm15 = vmor %vm1781_vm14, %vm1782_vm13  ;;  %v1802_v0 = vand.u32 2147483648, %v1713_v55  ;;  %v1800_v2 = vand.u32 2147483647, %v1713_v55 }
 0x2f5   : > { %3218 = vset.pattern.permute.xlu2 %v3381_v49  ;;  %1892 = vperm.xlu1 %3216, %v1774_v62   ;;  %v1778_v11 = vsub.f32 1.0, %v1777_v6  ;;  %vm1796_vm3 = vweird.f32 %v1713_v55 }
 0x2f6   : > { %1856 = vperm.xlu0 %3215, %v1774_v62   ;;  %1888 = vperm.xlu2 %3218, %v1759_v21   ;;  %v1803_v63 = vor.u32 1.1754944e-38, %v1802_v0  ;;  %vm1801_vm5 = vcmp.eq.f32.partialorder %v1800_v2, 8.507059e+37  ;;  %v3191_v62 = vld [vmem:[%s4840_s8 + $0x18] sm:$0xff] }
 0x2f7   : > { %v1779_v7 = vmul.f32 %v3314_v32, %v1778_v11  ;;  %1998 = vmatpush.bf16.msrb.mxu1 %v3191_v62  ;;  %v3190_v11 = vld [vmem:[%s4840_s8 + $0x10] sm:$0xff] }
 0x2f8   : > { %v1681_v38 = vpop.f32.mrf.mxu0 }
 0x2f9   : > { %v3316_v53 = vpop.eup %3315  ;;  %v3101_v10 = vmul.f32 -1.442695, %v1681_v38  ;;  %v1780_v23 = vadd.f32 %v3314_v32, %v1779_v7  ;;  %v3189_v7 = vld [vmem:[%s4840_s8 + $0x8] sm:$0xff] }
 0x2fa   : > { %v3318_v20 = vpop.eup %3317  ;;  %v1714_v17 = vadd.f32 1.0, %v3316_v53 }
 0x2fb   : > { %3319 = vpow2.f32 %v3101_v10  ;;  %v1784_v60 = vsel %vm1783_vm15, %v3314_v32, %v1780_v23  ;;  %v1792_v19 = vmul.f32 %v3318_v20, %v1713_v55  ;;  %vm1797_vm2 = vweird.f32 %v3318_v20  ;;  %1999 = vmatpush.bf16.msrb.mxu1 %v3190_v11 }
 0x2fc   : > { %3321 = vrcp.f32 %v1714_v17  ;;  %v1789_v1 = vsel %vm1786_vm1, %v1788_v46, %v1784_v60  ;;  %vm1798_vm4 = vmor %vm1796_vm3, %vm1797_vm2  ;;  %v1817_v39 = vand.u32 2147483648, %v1714_v17  ;;  %v1815_v21 = vand.u32 2147483647, %v1714_v17 }
 0x2fd   : > { %3221 = vset.pattern.permute.xlu1 %v3382_v52  ;;  %v1793_v59 = vsub.f32 1.0, %v1792_v19  ;;  %vm1811_vm8 = vweird.f32 %v1714_v17  ;;  %v1836_v23 = vlaneseq }
 0x2fe   : > { %3220 = vset.pattern.permute.xlu0 %v3381_v49  ;;  %3219 = vset.pattern.permute.xlu2 %v3382_v52  ;;  %v1818_v22 = vor.u32 1.1754944e-38, %v1817_v39  ;;  %vm1816_vm10 = vcmp.eq.f32.partialorder %v1815_v21, 8.507059e+37 }
 0x2ff   : > { %1896 = vperm.xlu0 %3220, %v1789_v1   ;;  %1861 = vperm.xlu2 %3219, %v1789_v1   ;;  %v1794_v40 = vmul.f32 %v3318_v20, %v1793_v59  ;;  %v1837_v46 = vand.u32 127, %v1836_v23 }
 0x300   : > { %2000 = vmatpush.bf16.msrb.mxu1 %v3189_v7 }
 0x301   : > { %v3320_v33 = vpop.eup %3319  ;;  %v1795_v34 = vadd.f32 %v3318_v20, %v1794_v40  ;;  %vm1838_vm15 = vcmp.lt.s32.totalorder %v1837_v46, 32  ;;  %v3188_v40 = vld [vmem:[%s4840_s8] sm:$0xff] }
 0x302   : > { %v3322_v18 = vpop.eup %3321  ;;  %v1715_v15 = vadd.f32 1.0, %v3320_v33 }
 0x303   : > { %v1799_v24 = vsel %vm1798_vm4, %v3318_v20, %v1795_v34  ;;  %v1807_v28 = vmul.f32 %v3322_v18, %v1714_v17  ;;  %vm1812_vm7 = vweird.f32 %v3322_v18 }
 0x304   : > { %3323 = vrcp.f32 %v1715_v15  ;;  %v1804_v54 = vsel %vm1801_vm5, %v1803_v63, %v1799_v24  ;;  %vm1813_vm9 = vmor %vm1811_vm8, %vm1812_vm7  ;;  %v1832_v56 = vand.u32 2147483648, %v1715_v15  ;;  %v1830_v55 = vand.u32 2147483647, %v1715_v15  ;;  %2001 = vmatpush.bf16.msrb.mxu1 %v3188_v40 }
 0x305   : > { %1866 = vperm.xlu1 %3221, %v1804_v54   ;;  %v1808_v30 = vsub.f32 1.0, %v1807_v28  ;;  %vm1826_vm12 = vweird.f32 %v1715_v15 }
 0x306   : > { %vm1831_vm14 = vcmp.eq.f32.partialorder %v1830_v55, 8.507059e+37 }
 0x307   : > { %3222 = vset.pattern.permute.xlu2 %v3381_v49  ;;  %v1809_v31 = vmul.f32 %v3322_v18, %v1808_v30  ;;  %3223 = vset.pattern.permute.xlu0 %v3382_v52  ;;  %v1833_v52 = vor.u32 1.1754944e-38, %v1832_v56 }
 0x308   : > { %1900 = vperm.xlu2 %3222, %v1804_v54  }
 0x309   : > { %v1810_v25 = vadd.f32 %v3322_v18, %v1809_v31  ;;  %v3383_v31 = vmov 64.0  }
 0x30a   : > { %v3324_v37 = vpop.eup %3323  ;;  %3325 = vrcp.f32 %v3383_v31 }
 0x30b   : > { %v1814_v47 = vsel %vm1813_vm9, %v3322_v18, %v1810_v25  ;;  %v1822_v41 = vmul.f32 %v3324_v37, %v1715_v15  ;;  %vm1827_vm11 = vweird.f32 %v3324_v37 }
 0x30c   : > { %v1819_v50 = vsel %vm1816_vm10, %v1818_v22, %v1814_v47  ;;  %vm1828_vm13 = vmor %vm1826_vm12, %vm1827_vm11 }
 0x30d   : > { %1871 = vperm.xlu1 %3221, %v1819_v50   ;;  %v1823_v29 = vsub.f32 1.0, %v1822_v41 }
 0x30f   : > { %v1824_v32 = vmul.f32 %v3324_v37, %v1823_v29 }
 0x310   : > { %1904 = vperm.xlu2 %3222, %v1819_v50   ;;  %v3326_v29 = vpop.eup %3325 }
 0x311   : > { %v1825_v58 = vadd.f32 %v3324_v37, %v1824_v32  ;;  %vm1955_vm1 = vweird.f32 %v3326_v29 }
 0x313   : > { %v1829_v43 = vsel %vm1828_vm13, %v3324_v37, %v1825_v58 }
 0x314   : > { %v1834_v6 = vsel %vm1831_vm14, %v1833_v52, %v1829_v43  ;;  %v1951_v43 = vmul.f32 64.0, %v3326_v29 }
 0x315   : > { %3224 = vset.pattern.permute.xlu1 %v3381_v49  ;;  %1876 = vperm.xlu0 %3223, %v1834_v6  }
 0x316   : > { %1908 = vperm.xlu1 %3224, %v1834_v6  }
 0x31d   : > { %3225 = vset.pattern.permute.xlu0 %v3381_v49 }
 0x347   : > { %v1852_v48 = vpop.permute.xlu2 %1851 }
 0x34f   : > { %v1881_v51 = vpop.permute.xlu1 %1880  ;;  %v1842_v38 = vpop.permute.xlu0 %1841 }
 0x350   : > { %v1889_v53 = vpop.permute.xlu2 %1888  ;;  %v1913_v59 = vsel %vm1838_vm15, %v1842_v38, %v1881_v51 }
 0x351   : > { %v4222_v33 = vmul.f32 %v1913_v59, %v4049_v57  ;;  %v1915_v18 = vsel %vm1838_vm15, %v1852_v48, %v1889_v53 }
 0x353   : > { %v1929_v28 = vsel %vm440_vm6, %v4222_v33, 0.0 }
 0x357   : > { %v1885_v49 = vpop.permute.xlu1 %1884  ;;  %v1847_v10 = vpop.permute.xlu0 %1846 }
 0x358   : > { %v1914_v19 = vsel %vm1838_vm15, %v1847_v10, %v1885_v49 }
 0x359   : > { %v1862_v20 = vpop.permute.xlu2 %1861  ;;  %v4219_v2 = vmul.f32 %v1914_v19, %v4066_v42  ;;  %v4232_v42 = vmul.f32 %v1915_v18, %v4084_v4 }
 0x35b   : > { %v1930_v63 = vsel %vm440_vm6, %v4219_v2, 0.0  ;;  %v1932_v22 = vsel %vm440_vm6, %v4232_v42, 0.0 }
 0x35c   : > { %v1931_v57 = vadd.f32 %v1930_v63, %v1929_v28 }
 0x35e   : > { %v1933_v47 = vadd.f32 %v1932_v22, %v1931_v57 }
 0x362   : > { %v1901_v1 = vpop.permute.xlu2 %1900 }
 0x367   : > { %v1893_v17 = vpop.permute.xlu1 %1892 }
 0x368   : > { %v1857_v60 = vpop.permute.xlu0 %1856 }
 0x369   : > { %v1916_v15 = vsel %vm1838_vm15, %v1857_v60, %v1893_v17 }
 0x36a   : > { %v4235_v54 = vmul.f32 %v1916_v15, %v4100_v35  ;;  %v1905_v21 = vpop.permute.xlu2 %1904 }
 0x36c   : > { %v1934_v4 = vsel %vm440_vm6, %v4235_v54, 0.0 }
 0x371   : > { %v1897_v34 = vpop.permute.xlu0 %1896 }
 0x372   : > { %v1917_v24 = vsel %vm1838_vm15, %v1862_v20, %v1897_v34 }
 0x373   : > { %v4239_v25 = vmul.f32 %v1917_v24, %v4120_v12  ;;  %v1935_v12 = vadd.f32 %v1934_v4, %v1933_v47 }
 0x375   : > { %v1936_v41 = vsel %vm440_vm6, %v4239_v25, 0.0 }
 0x376   : > { %v1937_v32 = vadd.f32 %v1936_v41, %v1935_v12 }
 0x377   : > { %v1867_v0 = vpop.permute.xlu1 %1866 }
 0x378   : > { %v1918_v30 = vsel %vm1838_vm15, %v1867_v0, %v1901_v1 }
 0x379   : > { %v4247_v35 = vmul.f32 %v1918_v30, %v4134_v45 }
 0x37b   : > { %v1938_v56 = vsel %vm440_vm6, %v4247_v35, 0.0 }
 0x37c   : > { %v1939_v6 = vadd.f32 %v1938_v56, %v1937_v32  ;;  %v4289_v32 = vld [vmem:[#allocation2] sm:$0xff] }
 0x37f   : > { %v1872_v39 = vpop.permute.xlu1 %1871 }
 0x380   : > { %v1919_v37 = vsel %vm1838_vm15, %v1872_v39, %v1905_v21 }
 0x381   : > { %v1927_v50 = vmul.f32 %v1919_v37, %v4149_v27  ;;  %v1952_v27 = vsub.f32 1.0, %v1951_v43  ;;  %v4300_v43 = vld [vmem:[#allocation2 + $0x2] sm:$0xff] }
 0x383   : > { %v1940_v58 = vsel %vm440_vm6, %v1927_v50, 0.0  ;;  %v1953_v38 = vmul.f32 %v3326_v29, %v1952_v27 }
 0x384   : > { %v1941_v11 = vadd.f32 %v1940_v58, %v1939_v6 }
 0x385   : > { %v1954_v10 = vadd.f32 %v3326_v29, %v1953_v38 }
 0x387   : > { %v1877_v55 = vpop.permute.xlu0 %1876  ;;  %v1956_v17 = vsel %vm1955_vm1, %v3326_v29, %v1954_v10 }
 0x388   : > { %v1909_v52 = vpop.permute.xlu1 %1908 }
 0x389   : > { %v1920_v45 = vsel %vm1838_vm15, %v1877_v55, %v1909_v52  ;;  %v4291_v55 = vld [vmem:[#allocation2 + $0x1] sm:$0xff] }
 0x38a   : > { %v1928_v62 = vmul.f32 %v1920_v45, %v4163_v26 }
 0x38c   : > { %v1942_v48 = vsel %vm440_vm6, %v1928_v62, 0.0 }
 0x38d   : > { %v1943_v7 = vadd.f32 %v1942_v48, %v1941_v11 }
 0x38f   : > { %v1944_v51 = vrot.slane %v1943_v7, 4 }
 0x391   : > { %v1945_v53 = vadd.f32 %v1944_v51, %v1943_v7 }
 0x393   : > { %v1946_v49 = vrot.slane %v1945_v53, 2 }
 0x395   : > { %v1947_v23 = vadd.f32 %v1946_v49, %v1945_v53 }
 0x397   : > { %v1948_v20 = vrot.slane %v1947_v23, 1 }
 0x399   : > { %v1949_v60 = vadd.f32 %v1948_v20, %v1947_v23 }
 0x39b   : > { %v1957_v19 = vmul.f32 %v1956_v17, %v1949_v60 }
 0x39d   : > { %v1958_v46 = vpack.c.bf16 %v1957_v19, %v1957_v19 }
 0x39f   : > { %3118 = vmatmul.msk.bf16.vlgmr.msrb.gmra.mxu1 %vm440_vm6, %v1958_v46 }
 0x41c   : > { %v2003_v26 = vpop.f32.mrf.mxu1 }
 0x41d   : > { %v3119_v1 = vmul.f32 -1.442695, %v2003_v26 }
 0x41f   : > { %3327 = vpow2.f32 %v3119_v1 }
 0x424   : > { %v2005_v59 = vpop.f32.mrf.mxu1 }
 0x425   : > { %v3328_v0 = vpop.eup %3327  ;;  %v4322_v59 = vld [vmem:[%s4833_s1 + $0x10] sm:$0xff] }
 0x426   : > { %v2010_v40 = vadd.f32 1.0, %v3328_v0 }
 0x428   : > { %3329 = vrcp.f32 %v2010_v40  ;;  %v2022_v63 = vand.u32 2147483648, %v2010_v40  ;;  %v2020_v28 = vand.u32 2147483647, %v2010_v40  ;;  %vm2016_vm3 = vweird.f32 %v2010_v40 }
 0x42a   : > { %v2023_v30 = vor.u32 1.1754944e-38, %v2022_v63  ;;  %vm2021_vm6 = vcmp.eq.f32.partialorder %v2020_v28, 8.507059e+37  ;;  %v4331_v28 = vperm.slane %v4322_v59, 1 }
 0x42e   : > { %v3330_v34 = vpop.eup %3329 }
 0x42f   : > { %v2012_v18 = vmul.f32 %v3330_v34, %v2010_v40  ;;  %vm2017_vm2 = vweird.f32 %v3330_v34 }
 0x430   : > { %vm2018_vm4 = vmor %vm2016_vm3, %vm2017_vm2 }
 0x431   : > { %v2013_v15 = vsub.f32 1.0, %v2012_v18 }
 0x433   : > { %v2014_v24 = vmul.f32 %v3330_v34, %v2013_v15 }
 0x435   : > { %v2015_v57 = vadd.f32 %v3330_v34, %v2014_v24  ;;  %v4328_v24 = vperm.slane %v4322_v59, 0 }
 0x437   : > { %v2019_v39 = vsel %vm2018_vm4, %v3330_v34, %v2015_v57 }
 0x438   : > { %v2024_v31 = vsel %vm2021_vm6, %v2023_v30, %v2019_v39 }
 0x439   : > { %v2026_v21 = vperm.slane %v2024_v31, 0 }
 0x43b   : > { %v4260_v37 = vmul.f32 %v2026_v21, %v4235_v54  ;;  %v4263_v22 = vmul.f32 %v2026_v21, %v4219_v2  ;;  %v2027_v4 = vmul.f32 %v2026_v21, %v4222_v33  ;;  %v4268_v47 = vmul.f32 %v2026_v21, %v1927_v50  ;;  %v4280_v54 = vpop.f32.mrf.mxu3 }
 0x43c   : > { %v4271_v41 = vmul.f32 %v2026_v21, %v4239_v25  ;;  %v2029_v29 = vmul.f32 %v2026_v21, %v4232_v42  ;;  %v4276_v2 = vmul.f32 %v2026_v21, %v1928_v62  ;;  %v2032_v33 = vmul.f32 %v2026_v21, %v4247_v35  ;;  %v3367_v42 = vld [vmem:[%s4833_s1 + $0x8] sm:$0xff] }
 0x43d   : > { %2049 = vrot.lane.b32.xlu0 %v4260_v37, %s3384_s25  ;;  %2045 = vrot.lane.b32.xlu1 %v4263_v22, %s3384_s25  ;;  %v4285_v25 = vperm.slane %v3367_v42, 1  ;;  %v4287_v56 = vperm.slane %v3367_v42, 2  ;;  %v4294_v35 = vperm.slane %v3367_v42, 3  ;;  %v4304_v11 = vperm.slane %v3367_v42, 4 }
 0x43e   : > { %2043 = vrot.lane.b32.xlu2 %v2027_v4, %s3384_s25  ;;  %v4310_v49 = vperm.slane %v3367_v42, 5  ;;  %v4317_v1 = vperm.slane %v3367_v42, 6 }
 0x43f   : > { %v2092_v58 = vmul.f32 %v4285_v25, %v4289_v32  ;;  %v2109_v52 = vmul.f32 %v4287_v56, %v4291_v55  ;;  %v2134_v27 = vmul.f32 %v4294_v35, %v4300_v43 }
 0x441   : > { %v2117_v48 = vadd.f32 %v2109_v52, %v2092_v58  ;;  %v3369_v58 = vld [vmem:[#allocation2 + $0x91] sm:$0xff] }
 0x442   : > { %v4345_v52 = vmul.f32 %v3369_v58, %v4328_v24 }
 0x443   : > { %v4302_v45 = vpop.f32.mrf.mxu3  ;;  %v2142_v51 = vadd.f32 %v2134_v27, %v2117_v48 }
 0x444   : > { %4879 = vst [vmem:[#allocation14_spill] sm:$0xff] %v4345_v52 }
 0x445   : > { %2055 = vrot.lane.b32.xlu0 %v4268_v47, %s3384_s25  ;;  %2051 = vrot.lane.b32.xlu1 %v4271_v41, %s3384_s25 }
 0x446   : > { %2047 = vrot.lane.b32.xlu2 %v2029_v29, %s3384_s25 }
 0x44b   : > { %v4314_v26 = vpop.f32.mrf.mxu3 }
 0x44d   : > { %2057 = vrot.lane.b32.xlu1 %v4276_v2, %s3384_s25 }
 0x44e   : > { %2053 = vrot.lane.b32.xlu2 %v2032_v33, %s3384_s25 }
 0x498   : > { %v2044_v50 = vpop.permute.xlu2 %2043 }
 0x499   : > { %v2067_v12 = vadd.f32 %v2044_v50, %v2027_v4  ;;  %v3368_v50 = vld [vmem:[%s4834_s2] sm:$0x3f] }
 0x49a   : > { %v4342_v42 = vperm.slane %v3368_v50, 4 }
 0x49b   : > { %2075 = vst.msk [vmem:[#allocation2 + $0x11] sm:$0xff] %vm415_vm0, %v2067_v12  ;;  %v4340_v12 = vperm.slane %v3368_v50, 3 }
 0x49c   : > { %4878 = vst [vmem:[#allocation13_spill] sm:$0xff] %v4342_v42 }
 0x4a0   : > { %v2048_v6 = vpop.permute.xlu2 %2047 }
 0x4a1   : > { %v2069_v62 = vadd.f32 %v2048_v6, %v2029_v29  ;;  %v3370_v6 = vld [vmem:[#allocation2 + $0x92] sm:$0xff] }
 0x4a2   : > { %v2084_v7 = vld [vmem:[#allocation2 + $0x10] sm:$0xff] }
 0x4a3   : > { %2077 = vst.msk [vmem:[#allocation2 + $0x31] sm:$0xff] %vm415_vm0, %v2069_v62  ;;  %v2159_v38 = vmul.f32 %v4304_v11, %v2084_v7  ;;  %v2101_v53 = vld [vmem:[#allocation2 + $0x11] sm:$0xff]  ;;  %v2093_v20 = vmul.f32 %v4285_v25, %v2084_v7  ;;  %v4348_v62 = vmul.f32 %v3370_v6, %v4331_v28 }
 0x4a4   : > { %v2110_v17 = vmul.f32 %v4287_v56, %v2101_v53  ;;  %v2126_v0 = vld [vmem:[#allocation2 + $0x12] sm:$0xff]  ;;  %v2184_v40 = vmul.f32 %v4310_v49, %v2101_v53 }
 0x4a5   : > { %v2167_v60 = vadd.f32 %v2159_v38, %v2142_v51  ;;  %v2135_v57 = vmul.f32 %v4294_v35, %v2126_v0  ;;  %v2209_v21 = vmul.f32 %v4317_v1, %v2126_v0  ;;  %4880 = vst [vmem:[#allocation15_spill] sm:$0xff] %v4348_v62 }
 0x4a6   : > { %v2118_v15 = vadd.f32 %v2110_v17, %v2093_v20 }
 0x4a7   : > { %v2192_v63 = vadd.f32 %v2184_v40, %v2167_v60 }
 0x4a8   : > { %v2054_v10 = vpop.permute.xlu2 %2053  ;;  %v4350_v48 = vadd.f32 %v2135_v57, %v2118_v15  ;;  %v4389_v15 = vperm.slane %v4322_v59, 3 }
 0x4a9   : > { %v2072_v23 = vadd.f32 %v2054_v10, %v2032_v33 }
 0x4aa   : > { %v2086_v19 = vld [vmem:[#allocation2 + $0x30] sm:$0xff]  ;;  %v2351_v50 = vmul.f32 %v4389_v15, %v4291_v55  ;;  %v4421_v55 = vperm.slane %v4322_v59, 6 }
 0x4ab   : > { %v2103_v46 = vld [vmem:[#allocation2 + $0x31] sm:$0xff]  ;;  %2080 = vst.msk [vmem:[#allocation2 + $0x61] sm:$0xff] %vm415_vm0, %v2072_v23  ;;  %v2095_v34 = vmul.f32 %v4285_v25, %v2086_v19  ;;  %v4356_v27 = vmul.f32 %v4304_v11, %v2086_v19  ;;  %v4366_v10 = vmul.f32 %v3830_v13, %v2086_v19 }
 0x4ac   : > { %v2112_v18 = vmul.f32 %v4287_v56, %v2103_v46  ;;  %v2128_v30 = vld [vmem:[#allocation2 + $0x32] sm:$0xff]  ;;  %v4360_v38 = vmul.f32 %v4310_v49, %v2103_v46  ;;  %v4369_v23 = vmul.f32 %v4328_v24, %v2103_v46  ;;  %v4386_v46 = vperm.slane %v4322_v59, 2  ;;  %4881 = vst [vmem:[#allocation16_spill] sm:$0xff] %v4421_v55 }
 0x4ad   : > { %v4363_v53 = vmul.f32 %v4317_v1, %v2128_v30  ;;  %v4373_v60 = vmul.f32 %v4331_v28, %v2128_v30 }
 0x4ae   : > { %v2120_v4 = vadd.f32 %v2112_v18, %v2095_v34  ;;  %v4377_v34 = vpop.f32.mrf.mxu3 }
 0x4af   : > { %v2050_v39 = vpop.permute.xlu0 %2049  ;;  %v2046_v31 = vpop.permute.xlu1 %2045 }
 0x4b0   : > { %v2070_v29 = vadd.f32 %v2050_v39, %v4260_v37  ;;  %v2068_v33 = vadd.f32 %v2046_v31, %v4263_v22  ;;  %v4352_v37 = vadd.f32 %v2209_v21, %v2192_v63  ;;  %v2137_v22 = vmul.f32 %v4294_v35, %v2128_v30 }
 0x4b1   : > { %v4396_v39 = vperm.slane %v4322_v59, 4 }
 0x4b2   : > { %v2155_v7 = vld [vmem:[#allocation2 + $0x60] sm:$0xff]  ;;  %2078 = vst.msk [vmem:[#allocation2 + $0x41] sm:$0xff] %vm415_vm0, %v2070_v29  ;;  %v2145_v17 = vadd.f32 %v2137_v22, %v2120_v4 }
 0x4b3   : > { %v2180_v51 = vld [vmem:[#allocation2 + $0x61] sm:$0xff]  ;;  %2076 = vst.msk [vmem:[#allocation2 + $0x21] sm:$0xff] %vm415_vm0, %v2068_v33  ;;  %v2098_v0 = vmul.f32 %v2155_v7, %v4285_v25  ;;  %v4380_v18 = vmul.f32 %v4304_v11, %v2155_v7  ;;  %v4399_v31 = vmul.f32 %v3830_v13, %v2155_v7  ;;  %v2334_v33 = vmul.f32 %v4386_v46, %v4289_v32 }
 0x4b4   : > { %v2205_v20 = vld [vmem:[#allocation2 + $0x62] sm:$0xff]  ;;  %v2115_v40 = vmul.f32 %v2180_v51, %v4287_v56  ;;  %v4383_v19 = vmul.f32 %v4310_v49, %v2180_v51  ;;  %v4402_v21 = vmul.f32 %v4328_v24, %v2180_v51  ;;  %v2376_v44 = vmul.f32 %v4396_v39, %v4300_v43 }
 0x4b5   : > { %v4392_v63 = vmul.f32 %v4317_v1, %v2205_v20  ;;  %v2140_v30 = vmul.f32 %v2205_v20, %v4294_v35  ;;  %v4409_v58 = vmul.f32 %v4331_v28, %v2205_v20  ;;  %v2359_v8 = vadd.f32 %v2351_v50, %v2334_v33 }
 0x4b6   : > { %v2123_v57 = vadd.f32 %v2115_v40, %v2098_v0  ;;  %v4418_v32 = vperm.slane %v4322_v59, 5 }
 0x4b7   : > { %v2056_v4 = vpop.permute.xlu0 %2055  ;;  %v2052_v29 = vpop.permute.xlu1 %2051 }
 0x4b8   : > { %v2073_v6 = vadd.f32 %v2056_v4, %v4268_v47  ;;  %v2071_v22 = vadd.f32 %v2052_v29, %v4271_v41  ;;  %v4413_v7 = vadd.f32 %v2140_v30, %v2123_v57  ;;  %v4428_v29 = vperm.slane %v4322_v59, 7 }
 0x4b9   : > { %v2087_v0 = vld [vmem:[#allocation2 + $0x40] sm:$0xff] }
 0x4ba   : > { %v2104_v51 = vld [vmem:[#allocation2 + $0x41] sm:$0xff]  ;;  %v2096_v20 = vmul.f32 %v4285_v25, %v2087_v0  ;;  %v2162_v41 = vmul.f32 %v4304_v11, %v2087_v0  ;;  %2081 = vst.msk [vmem:[#allocation2 + $0x71] sm:$0xff] %vm415_vm0, %v2073_v6  ;;  %v4434_v36 = vmul.f32 %v3830_v13, %v2087_v0 }
 0x4bb   : > { %v2129_v40 = vld [vmem:[#allocation2 + $0x42] sm:$0xff]  ;;  %v2113_v47 = vmul.f32 %v4287_v56, %v2104_v51  ;;  %4882 = vst [vmem:[#allocation17_spill] sm:$0xff] %v4428_v29  ;;  %v2187_v33 = vmul.f32 %v4310_v49, %v2104_v51  ;;  %v4438_v3 = vmul.f32 %v4328_v24, %v2104_v51  ;;  %v4452_v51 = vld [vmem:[%s4833_s1 + $0x18] sm:$0x7] }
 0x4bc   : > { %v2085_v57 = vld [vmem:[#allocation2 + $0x20] sm:$0xff]  ;;  %v2138_v43 = vmul.f32 %v4294_v35, %v2129_v40  ;;  %v2212_v50 = vmul.f32 %v4317_v1, %v2129_v40  ;;  %2079 = vst.msk [vmem:[#allocation2 + $0x51] sm:$0xff] %vm415_vm0, %v2071_v22  ;;  %v2170_v5 = vadd.f32 %v2162_v41, %v2145_v17  ;;  %v4442_v59 = vmul.f32 %v4331_v28, %v2129_v40  ;;  %v3193_v29 = vld [vmem:[%s4841_s9 + $0x8] sm:$0xff] }
 0x4bd   : > { %v2102_v30 = vld [vmem:[#allocation2 + $0x21] sm:$0xff]  ;;  %v2121_v9 = vadd.f32 %v2113_v47, %v2096_v20  ;;  %v2094_v6 = vmul.f32 %v4285_v25, %v2085_v57  ;;  %v2160_v42 = vmul.f32 %v4304_v11, %v2085_v57  ;;  %v2234_v17 = vmul.f32 %v3830_v13, %v2085_v57  ;;  %4883 = vst [vmem:[#allocation18_spill] sm:$0xff] %v4452_v51  ;;  %v4454_v20 = vpop.f32.mrf.mxu3 }
 0x4be   : > { %v2127_v4 = vld [vmem:[#allocation2 + $0x22] sm:$0xff]  ;;  %v2111_v14 = vmul.f32 %v4287_v56, %v2102_v30  ;;  %v2195_v62 = vadd.f32 %v2187_v33, %v2170_v5  ;;  %v2185_v22 = vmul.f32 %v4310_v49, %v2102_v30  ;;  %v2259_v52 = vmul.f32 %v4328_v24, %v2102_v30  ;;  %2801 = vmatpush.bf16.msrb.mxu2 %v3193_v29 }
 0x4bf   : > { %v2136_v61 = vmul.f32 %v4294_v35, %v2127_v4  ;;  %v2146_v0 = vadd.f32 %v2138_v43, %v2121_v9  ;;  %v2168_v47 = vadd.f32 %v2160_v42, %v4350_v48  ;;  %v2210_v41 = vmul.f32 %v4317_v1, %v2127_v4  ;;  %v2058_v9 = vpop.permute.xlu1 %2057 }
 0x4c0   : > { %v2119_v40 = vadd.f32 %v2111_v14, %v2094_v6  ;;  %v2220_v5 = vadd.f32 %v2212_v50, %v2195_v62  ;;  %v2242_v43 = vadd.f32 %v2234_v17, %v4352_v37  ;;  %v2284_v57 = vmul.f32 %v4331_v28, %v2127_v4 }
 0x4c1   : > { %v2074_v33 = vadd.f32 %v2058_v9, %v4276_v2  ;;  %v2193_v14 = vadd.f32 %v2185_v22, %v2168_v47  ;;  %v2230_v6 = vld [vmem:[#allocation2 + $0x70] sm:$0xff]  ;;  %v4465_v48 = vadd.f32 %v2376_v44, %v2359_v8  ;;  %v4468_v30 = vperm.slane %v4452_v51, 0 }
 0x4c2   : > { %v2144_v16 = vadd.f32 %v2136_v61, %v2119_v40  ;;  %v2255_v42 = vld [vmem:[#allocation2 + $0x71] sm:$0xff]  ;;  %v2267_v62 = vadd.f32 %v2259_v52, %v2242_v43  ;;  %v4471_v37 = vmul.f32 %v3830_v13, %v2230_v6  ;;  %v4478_v61 = vperm.slane %v4452_v51, 1  ;;  %v3192_v40 = vld [vmem:[%s4841_s9] sm:$0xff] }
 0x4c3   : > { %4884 = vst [vmem:[#allocation19_spill] sm:$0xff] %v4465_v48  ;;  %v4474_v4 = vmul.f32 %v4328_v24, %v2255_v42  ;;  %v2088_v2 = vld [vmem:[#allocation2 + $0x50] sm:$0xff]  ;;  %v2218_v8 = vadd.f32 %v2210_v41, %v2193_v14  ;;  %2802 = vmatpush.bf16.msrb.mxu2 %v3192_v40 }
 0x4c4   : > { %4885 = vst [vmem:[#allocation20_spill] sm:$0xff] %v4468_v30  ;;  %v2105_v50 = vld [vmem:[#allocation2 + $0x51] sm:$0xff]  ;;  %v2169_v44 = vadd.f32 %v4356_v27, %v2144_v16  ;;  %v2097_v22 = vmul.f32 %v4285_v25, %v2088_v2  ;;  %v2292_v47 = vadd.f32 %v2284_v57, %v2267_v62  ;;  %v2163_v43 = vmul.f32 %v4304_v11, %v2088_v2 }
 0x4c5   : > { %v2130_v17 = vld [vmem:[#allocation2 + $0x52] sm:$0xff]  ;;  %2082 = vst.msk [vmem:[#allocation2 + $0x81] sm:$0xff] %vm415_vm0, %v2074_v33  ;;  %v2114_v52 = vmul.f32 %v4287_v56, %v2105_v50  ;;  %v2188_v33 = vmul.f32 %v4310_v49, %v2105_v50  ;;  %v2243_v16 = vadd.f32 %v4366_v10, %v2218_v8  ;;  %v2237_v30 = vmul.f32 %v3830_v13, %v2088_v2 }
 0x4c6   : > { %4886 = vst [vmem:[#allocation21_spill] sm:$0xff] %v4478_v61  ;;  %v2139_v9 = vmul.f32 %v4294_v35, %v2130_v17  ;;  %v2194_v61 = vadd.f32 %v4360_v38, %v2169_v44  ;;  %v2213_v41 = vmul.f32 %v4317_v1, %v2130_v17  ;;  %v2301_v29 = vadd.f32 %v4340_v12, %v2292_v47  ;;  %v2280_v48 = vld [vmem:[#allocation2 + $0x72] sm:$0xff] }
 0x4c7   : > { %v2122_v27 = vadd.f32 %v2114_v52, %v2097_v22  ;;  %v2171_v14 = vadd.f32 %v2163_v43, %v2146_v0  ;;  %v2262_v57 = vmul.f32 %v4328_v24, %v2105_v50  ;;  %v2268_v51 = vadd.f32 %v4369_v23, %v2243_v16  ;;  %v4500_v0 = vpop.f32.mrf.mxu3 }
 0x4c8   : > { %v2219_v62 = vadd.f32 %v4363_v53, %v2194_v61  ;;  %v2287_v38 = vmul.f32 %v4331_v28, %v2130_v17  ;;  %v2309_v10 = vmul.f32 %v2301_v29, %v4280_v54  ;;  %v2245_v8 = vadd.f32 %v2237_v30, %v2220_v5 }
 0x4c9   : > { %v2147_v55 = vadd.f32 %v2139_v9, %v2122_v27  ;;  %v2196_v44 = vadd.f32 %v2188_v33, %v2171_v14  ;;  %v2099_v22 = vmul.f32 %v2230_v6, %v4285_v25  ;;  %v2293_v50 = vadd.f32 %v4373_v60, %v2268_v51 }
 0x4ca   : > { %v2244_v2 = vadd.f32 %v4434_v36, %v2219_v62  ;;  %v2116_v23 = vmul.f32 %v2255_v42, %v4287_v56  ;;  %2317 = vst.msk [vmem:[#allocation2 + $0x11] sm:$0xff] %vm415_vm0, %v2309_v10  ;;  %v2270_v61 = vadd.f32 %v2262_v57, %v2245_v8  ;;  %v2141_v54 = vmul.f32 %v2280_v48, %v4294_v35 }
 0x4cb   : > { %v2172_v53 = vadd.f32 %v4380_v18, %v2147_v55  ;;  %v2221_v17 = vadd.f32 %v2213_v41, %v2196_v44  ;;  %v2165_v5 = vmul.f32 %v2230_v6, %v4304_v11  ;;  %v2302_v30 = vadd.f32 %v4340_v12, %v2293_v50 }
 0x4cc   : > { %v2269_v25 = vadd.f32 %v4438_v3, %v2244_v2  ;;  %v2124_v52 = vadd.f32 %v2116_v23, %v2099_v22  ;;  %v2157_v60 = vld [vmem:[#allocation2 + $0x80] sm:$0xff]  ;;  %v2289_v18 = vmul.f32 %v4331_v28, %v2280_v48  ;;  %v2295_v55 = vadd.f32 %v2287_v38, %v2270_v61 }
 0x4cd   : > { %v2197_v36 = vadd.f32 %v4383_v19, %v2172_v53  ;;  %v2246_v56 = vadd.f32 %v4399_v31, %v2221_v17  ;;  %v2190_v51 = vmul.f32 %v2255_v42, %v4310_v49  ;;  %v2182_v40 = vld [vmem:[#allocation2 + $0x81] sm:$0xff]  ;;  %v2310_v6 = vmul.f32 %v2302_v30, %v4302_v45 }
 0x4ce   : > { %v2294_v35 = vadd.f32 %v4442_v59, %v2269_v25  ;;  %v2149_v47 = vadd.f32 %v2141_v54, %v2124_v52  ;;  %v2304_v19 = vadd.f32 %v4340_v12, %v2295_v55  ;;  %v2166_v43 = vmul.f32 %v4304_v11, %v2157_v60  ;;  %v2207_v31 = vld [vmem:[#allocation2 + $0x82] sm:$0xff] }
 0x4cf   : > { %v2222_v3 = vadd.f32 %v4392_v63, %v2197_v36  ;;  %v2271_v9 = vadd.f32 %v4402_v21, %v2246_v56  ;;  %v2173_v33 = vadd.f32 %v2165_v5, %v4413_v7  ;;  %2318 = vst.msk [vmem:[#allocation2 + $0x21] sm:$0xff] %vm415_vm0, %v2310_v6  ;;  %v2215_v45 = vmul.f32 %v2280_v48, %v4317_v1  ;;  %v1354_v38 = vpop.f32.mrf.mxu3  ;;  %v4887_v53 = vld [vmem:[#allocation16_spill] sm:$0xff]  ;;  %v4889_v5 = vld [vmem:[#allocation19_spill] sm:$0xff]  ;;  %v4890_v36 = vld [vmem:[#allocation18_spill] sm:$0xff] }
 0x4d0   : > { %v2303_v16 = vadd.f32 %v4340_v12, %v2294_v35  ;;  %v2191_v63 = vmul.f32 %v4310_v49, %v2182_v40  ;;  %v2312_v21 = vmul.f32 %v2304_v19, %v4377_v34  ;;  %v2174_v27 = vadd.f32 %v2166_v43, %v2149_v47  ;;  %v4891_v55 = vld [vmem:[#allocation17_spill] sm:$0xff]  ;;  %v4893_v43 = vld [vmem:[#allocation20_spill] sm:$0xff] }
 0x4d1   : > { %v2247_v59 = vadd.f32 %v4471_v37, %v2222_v3  ;;  %v2296_v42 = vadd.f32 %v4409_v58, %v2271_v9  ;;  %v2198_v41 = vadd.f32 %v2190_v51, %v2173_v33  ;;  %v2216_v29 = vmul.f32 %v4317_v1, %v2207_v31  ;;  %v2326_v57 = vld [vmem:[#allocation2 + $0x10] sm:$0xff] }
 0x4d2   : > { %v2311_v11 = vmul.f32 %v2303_v16, %v4314_v26  ;;  %v2240_v14 = vmul.f32 %v3830_v13, %v2157_v60  ;;  %v2343_v37 = vld [vmem:[#allocation2 + $0x11] sm:$0xff]  ;;  %2320 = vst.msk [vmem:[#allocation2 + $0x41] sm:$0xff] %vm415_vm0, %v2312_v21  ;;  %v2199_v49 = vadd.f32 %v2191_v63, %v2174_v27  ;;  %v2265_v34 = vmul.f32 %v4328_v24, %v2182_v40 }
 0x4d3   : > { %v2272_v7 = vadd.f32 %v4474_v4, %v2247_v59  ;;  %v2305_v48 = vadd.f32 %v4340_v12, %v2296_v42  ;;  %v2223_v58 = vadd.f32 %v2215_v45, %v2198_v41  ;;  %v2368_v62 = vld [vmem:[#allocation2 + $0x12] sm:$0xff]  ;;  %v2290_v4 = vmul.f32 %v4331_v28, %v2207_v31  ;;  %v4888_v28 = vld [vmem:[#allocation4_spill] sm:$0xff]  ;;  %v4894_v31 = vld [vmem:[#allocation21_spill] sm:$0xff] }
 0x4d4   : > { %2319 = vst.msk [vmem:[#allocation2 + $0x31] sm:$0xff] %vm415_vm0, %v2311_v11  ;;  %v2335_v1 = vmul.f32 %v4386_v46, %v2326_v57  ;;  %v2352_v13 = vmul.f32 %v4389_v15, %v2343_v37  ;;  %v2224_v44 = vadd.f32 %v2216_v29, %v2199_v49  ;;  %v2401_v22 = vmul.f32 %v4418_v32, %v2326_v57  ;;  %v4892_v40 = vld [vmem:[#allocation14_spill] sm:$0xff]  ;;  %v4895_v16 = vld [vmem:[#allocation15_spill] sm:$0xff] }
 0x4d5   : > { %v2297_v26 = vadd.f32 %v2289_v18, %v2272_v7  ;;  %v2313_v10 = vmul.f32 %v2305_v48, %v4454_v20  ;;  %v2248_v8 = vadd.f32 %v2240_v14, %v2223_v58  ;;  %v2377_v50 = vmul.f32 %v4396_v39, %v2368_v62 }
 0x4d6   : > { %v2360_v24 = vadd.f32 %v2352_v13, %v2335_v1  ;;  %v2426_v23 = vmul.f32 %v4887_v53, %v2343_v37  ;;  %v2249_v17 = vadd.f32 %v4888_v28, %v2224_v44  ;;  %v2393_v54 = vld [vmem:[#allocation2 + $0x20] sm:$0xff]  ;;  %v2409_v25 = vadd.f32 %v2401_v22, %v4889_v5 }
 0x4d7   : > { %v2306_v2 = vadd.f32 %v4340_v12, %v2297_v26  ;;  %2321 = vst.msk [vmem:[#allocation2 + $0x51] sm:$0xff] %vm415_vm0, %v2313_v10  ;;  %v2273_v61 = vadd.f32 %v2265_v34, %v2248_v8  ;;  %v2418_v20 = vld [vmem:[#allocation2 + $0x21] sm:$0xff]  ;;  %v4549_v52 = vperm.slane %v4890_v36, 2  ;;  %v2402_v56 = vmul.f32 %v4418_v32, %v2393_v54  ;;  %v1356_v58 = vpop.f32.mrf.mxu3 }
 0x4d8   : > { %v2443_v30 = vld [vmem:[#allocation2 + $0x22] sm:$0xff]  ;;  %v2385_v18 = vadd.f32 %v2377_v50, %v2360_v24  ;;  %v2451_v51 = vmul.f32 %v4891_v55, %v2368_v62  ;;  %v2274_v35 = vadd.f32 %v4892_v40, %v2249_v17  ;;  %v2427_v3 = vmul.f32 %v4887_v53, %v2418_v20 }
 0x4d9   : > { %v2314_v60 = vmul.f32 %v2306_v2, %v4500_v0  ;;  %v2298_v6 = vadd.f32 %v2290_v4, %v2273_v61  ;;  %v2434_v47 = vadd.f32 %v2426_v23, %v2409_v25  ;;  %v2452_v19 = vmul.f32 %v4891_v55, %v2443_v30  ;;  %v2395_v1 = vld [vmem:[#allocation2 + $0x40] sm:$0xff] }
 0x4da   : > { %v2410_v9 = vadd.f32 %v2402_v56, %v2385_v18  ;;  %v2476_v33 = vmul.f32 %v4893_v43, %v2393_v54  ;;  %v2501_v0 = vmul.f32 %v4894_v31, %v2418_v20  ;;  %v2299_v59 = vadd.f32 %v4895_v16, %v2274_v35  ;;  %v2420_v13 = vld [vmem:[#allocation2 + $0x41] sm:$0xff] }
 0x4db   : > { %2322 = vst.msk [vmem:[#allocation2 + $0x61] sm:$0xff] %vm415_vm0, %v2314_v60  ;;  %v2307_v45 = vadd.f32 %v4340_v12, %v2298_v6  ;;  %v2459_v63 = vadd.f32 %v2451_v51, %v2434_v47  ;;  %v2468_v42 = vld [vmem:[#allocation2 + $0x30] sm:$0xff]  ;;  %v2526_v41 = vmul.f32 %v4549_v52, %v2443_v30  ;;  %v2336_v14 = vmul.f32 %v2393_v54, %v4386_v46  ;;  %v2445_v50 = vld [vmem:[#allocation2 + $0x42] sm:$0xff] }
 0x4dc   : > { %v2493_v21 = vld [vmem:[#allocation2 + $0x31] sm:$0xff]  ;;  %v2435_v11 = vadd.f32 %v2427_v3, %v2410_v9  ;;  %v2477_v7 = vmul.f32 %v4893_v43, %v2468_v42  ;;  %v2308_v57 = vadd.f32 %v4340_v12, %v2299_v59  ;;  %v2337_v49 = vmul.f32 %v2468_v42, %v4386_v46  ;;  %v4896_v60 = vld [vmem:[#allocation13_spill] sm:$0xff] }
 0x4dd   : > { %v2518_v27 = vld [vmem:[#allocation2 + $0x32] sm:$0xff]  ;;  %v2502_v29 = vmul.f32 %v4894_v31, %v2493_v21  ;;  %v2315_v37 = vmul.f32 %v2307_v45, %v1354_v38  ;;  %v2484_v48 = vadd.f32 %v2476_v33, %v2459_v63  ;;  %v2353_v26 = vmul.f32 %v2418_v20, %v4389_v15  ;;  %v4897_v9 = vld [vmem:[#allocation5_spill] sm:$0xff] }
 0x4de   : > { %v2460_v34 = vadd.f32 %v2452_v19, %v2435_v11  ;;  %v2527_v62 = vmul.f32 %v4549_v52, %v2518_v27  ;;  %v2354_v4 = vmul.f32 %v2493_v21, %v4389_v15  ;;  %v2316_v10 = vmul.f32 %v2308_v57, %v1356_v58  ;;  %v2470_v23 = vld [vmem:[#allocation2 + $0x50] sm:$0xff] }
 0x4df   : > { %2323 = vst.msk [vmem:[#allocation2 + $0x71] sm:$0xff] %vm415_vm0, %v2315_v37  ;;  %v2509_v44 = vadd.f32 %v2501_v0, %v2484_v48  ;;  %v2378_v12 = vmul.f32 %v2443_v30, %v4396_v39  ;;  %v2379_v38 = vmul.f32 %v2518_v27, %v4396_v39  ;;  %v2361_v22 = vadd.f32 %v2353_v26, %v2336_v14  ;;  %v2495_v36 = vld [vmem:[#allocation2 + $0x51] sm:$0xff] }
 0x4e0   : > { %v2485_v8 = vadd.f32 %v2477_v7, %v2460_v34  ;;  %v2362_v2 = vadd.f32 %v2354_v4, %v2337_v49  ;;  %v2403_v24 = vmul.f32 %v2468_v42, %v4418_v32  ;;  %2324 = vst.msk [vmem:[#allocation2 + $0x81] sm:$0xff] %vm415_vm0, %v2316_v10  ;;  %v2404_v17 = vmul.f32 %v4418_v32, %v2395_v1  ;;  %v2520_v0 = vld [vmem:[#allocation2 + $0x52] sm:$0xff] }
 0x4e1   : > { %v2534_v28 = vadd.f32 %v2526_v41, %v2509_v44  ;;  %v2428_v61 = vmul.f32 %v2493_v21, %v4887_v53  ;;  %v2429_v54 = vmul.f32 %v4887_v53, %v2420_v13  ;;  %v2386_v25 = vadd.f32 %v2378_v12, %v2361_v22  ;;  %v4898_v14 = vld [vmem:[#allocation6_spill] sm:$0xff] }
 0x4e2   : > { %v2510_v5 = vadd.f32 %v2502_v29, %v2485_v8  ;;  %v2387_v20 = vadd.f32 %v2379_v38, %v2362_v2  ;;  %v2453_v30 = vmul.f32 %v2518_v27, %v4891_v55  ;;  %v2454_v56 = vmul.f32 %v4891_v55, %v2445_v50  ;;  %v2397_v29 = vld [vmem:[#allocation2 + $0x60] sm:$0xff] }
 0x4e3   : > { %v2543_v18 = vadd.f32 %v4896_v60, %v2534_v28  ;;  %v2478_v51 = vmul.f32 %v4893_v43, %v2395_v1  ;;  %v2479_v40 = vmul.f32 %v4893_v43, %v2470_v23  ;;  %v2411_v6 = vadd.f32 %v2403_v24, %v2386_v25  ;;  %v2422_v44 = vld [vmem:[#allocation2 + $0x61] sm:$0xff] }
 0x4e4   : > { %v2535_v35 = vadd.f32 %v2527_v62, %v2510_v5  ;;  %v2412_v3 = vadd.f32 %v2404_v17, %v2387_v20  ;;  %v2503_v47 = vmul.f32 %v4894_v31, %v2420_v13  ;;  %v2504_v33 = vmul.f32 %v4894_v31, %v2495_v36 }
 0x4e5   : > { %v4586_v19 = vadd.f32 %v2543_v18, %v4897_v9  ;;  %v2528_v16 = vmul.f32 %v4549_v52, %v2445_v50  ;;  %v2338_v59 = vmul.f32 %v2395_v1, %v4386_v46  ;;  %v2436_v63 = vadd.f32 %v2428_v61, %v2411_v6 }
 0x4e6   : > { %v2544_v45 = vadd.f32 %v4896_v60, %v2535_v35  ;;  %v2437_v42 = vadd.f32 %v2429_v54, %v2412_v3  ;;  %v2339_v21 = vmul.f32 %v2470_v23, %v4386_v46  ;;  %v2355_v41 = vmul.f32 %v2420_v13, %v4389_v15 }
 0x4e7   : > { %v2559_v27 = vmul.f32 %v4586_v19, %v4586_v19  ;;  %v2356_v11 = vmul.f32 %v2495_v36, %v4389_v15  ;;  %v2380_v7 = vmul.f32 %v2445_v50, %v4396_v39  ;;  %v2461_v37 = vadd.f32 %v2453_v30, %v2436_v63 }
 0x4e8   : > { %v4599_v57 = vadd.f32 %v2544_v45, %v4898_v14  ;;  %v2462_v48 = vadd.f32 %v2454_v56, %v2437_v42  ;;  %v2381_v49 = vmul.f32 %v2520_v0, %v4396_v39  ;;  %v2363_v34 = vadd.f32 %v2355_v41, %v2338_v59  ;;  %v2472_v56 = vld [vmem:[#allocation2 + $0x70] sm:$0xff]  ;;  %v4899_v42 = vld [vmem:[#allocation7_spill] sm:$0xff] }
 0x4e9   : > { %v2567_v58 = vmul.f32 %v2559_v27, %v4586_v19  ;;  %v2364_v62 = vadd.f32 %v2356_v11, %v2339_v21  ;;  %v2405_v26 = vmul.f32 %v2470_v23, %v4418_v32  ;;  %v2486_v1 = vadd.f32 %v2478_v51, %v2461_v37  ;;  %v2447_v23 = vld [vmem:[#allocation2 + $0x62] sm:$0xff] }
 0x4ea   : > { %v2560_v4 = vmul.f32 %v4599_v57, %v4599_v57  ;;  %v2487_v13 = vadd.f32 %v2479_v40, %v2462_v48  ;;  %v2406_v10 = vmul.f32 %v4418_v32, %v2397_v29  ;;  %v2529_v38 = vmul.f32 %v4549_v52, %v2520_v0  ;;  %v4900_v27 = vld [vmem:[#allocation8_spill] sm:$0xff] }
 0x4eb   : > { %v2575_v12 = vmul.f32 0.044715, %v2567_v58  ;;  %v2388_v8 = vadd.f32 %v2380_v7, %v2363_v34  ;;  %v2389_v22 = vadd.f32 %v2381_v49, %v2364_v62  ;;  %v2511_v24 = vadd.f32 %v2503_v47, %v2486_v1  ;;  %v4628_v7 = vld [vmem:[#allocation2 + $0x72] sm:$0xff] }
 0x4ec   : > { %v2568_v2 = vmul.f32 %v2560_v4, %v4599_v57  ;;  %v2512_v50 = vadd.f32 %v2504_v33, %v2487_v13  ;;  %v2430_v28 = vmul.f32 %v2495_v36, %v4887_v53  ;;  %v2431_v5 = vmul.f32 %v4887_v53, %v2422_v44  ;;  %v4618_v33 = vld [vmem:[#allocation2 + $0x71] sm:$0xff] }
 0x4ed   : > { %v2583_v17 = vadd.f32 %v2575_v12, %v4586_v19  ;;  %v2413_v61 = vadd.f32 %v2405_v26, %v2388_v8  ;;  %v2414_v54 = vadd.f32 %v2406_v10, %v2389_v22  ;;  %v2536_v20 = vadd.f32 %v2528_v16, %v2511_v24 }
 0x4ee   : > { %v2576_v25 = vmul.f32 0.044715, %v2568_v2  ;;  %v2537_v30 = vadd.f32 %v2529_v38, %v2512_v50  ;;  %v2455_v18 = vmul.f32 %v2520_v0, %v4891_v55  ;;  %v2456_v6 = vmul.f32 %v4891_v55, %v2447_v23 }
 0x4ef   : > { %v3120_v51 = vmul.f32 -1.5957692, %v2583_v17  ;;  %v2438_v40 = vadd.f32 %v2430_v28, %v2413_v61  ;;  %v2439_v35 = vadd.f32 %v2431_v5, %v2414_v54  ;;  %v2545_v3 = vadd.f32 %v4896_v60, %v2536_v20 }
 0x4f0   : > { %v2584_v36 = vadd.f32 %v2576_v25, %v4599_v57  ;;  %v2546_v47 = vadd.f32 %v4896_v60, %v2537_v30  ;;  %v2480_v9 = vmul.f32 %v4893_v43, %v2397_v29  ;;  %v2481_v0 = vmul.f32 %v4893_v43, %v2472_v56  ;;  %v4649_v25 = vld [vmem:[#allocation2 + $0x80] sm:$0xff]  ;;  %v4901_v30 = vld [vmem:[#allocation9_spill] sm:$0xff] }
 0x4f1   : > { %v2607_v16 = vmul.f32 1.442695, %v3120_v51  ;;  %v2463_v59 = vadd.f32 %v2455_v18, %v2438_v40  ;;  %v2464_v45 = vadd.f32 %v2456_v6, %v2439_v35  ;;  %v4622_v21 = vadd.f32 %v2545_v3, %v4899_v42  ;;  %v4902_v18 = vld [vmem:[#allocation10_spill] sm:$0xff] }
 0x4f2   : > { %v3121_v63 = vmul.f32 -1.5957692, %v2584_v36  ;;  %v4625_v41 = vadd.f32 %v2546_v47, %v4900_v27  ;;  %v2505_v11 = vmul.f32 %v4894_v31, %v2422_v44  ;;  %v2506_v48 = vmul.f32 %v4894_v31, %v4618_v33 }
 0x4f3   : > { %3331 = vpow2.f32 %v2607_v16  ;;  %v2488_v14 = vadd.f32 %v2480_v9, %v2463_v59  ;;  %v2489_v37 = vadd.f32 %v2481_v0, %v2464_v45  ;;  %v2561_v58 = vmul.f32 %v4622_v21, %v4622_v21 }
 0x4f4   : > { %v2609_v49 = vmul.f32 1.442695, %v3121_v63  ;;  %v2562_v34 = vmul.f32 %v4625_v41, %v4625_v41  ;;  %v2530_v62 = vmul.f32 %v4549_v52, %v2447_v23  ;;  %v2531_v1 = vmul.f32 %v4549_v52, %v4628_v7 }
 0x4f5   : > { %v2513_v26 = vadd.f32 %v2505_v11, %v2488_v14  ;;  %v2514_v4 = vadd.f32 %v2506_v48, %v2489_v37  ;;  %v2340_v13 = vmul.f32 %v2397_v29, %v4386_v46  ;;  %v2569_v10 = vmul.f32 %v2561_v58, %v4622_v21 }
 0x4f6   : > { %3333 = vpow2.f32 %v2609_v49  ;;  %v2570_v12 = vmul.f32 %v2562_v34, %v4625_v41  ;;  %v2357_v38 = vmul.f32 %v2422_v44, %v4389_v15  ;;  %v2341_v2 = vmul.f32 %v2472_v56, %v4386_v46 }
 0x4f7   : > { %v2538_v8 = vadd.f32 %v2530_v62, %v2513_v26  ;;  %v2539_v22 = vadd.f32 %v2531_v1, %v2514_v4  ;;  %v2358_v24 = vmul.f32 %v4618_v33, %v4389_v15  ;;  %v2577_v50 = vmul.f32 0.044715, %v2569_v10  ;;  %v2449_v62 = vld [vmem:[#allocation2 + $0x82] sm:$0xff] }
 0x4f8   : > { %v2578_v28 = vmul.f32 0.044715, %v2570_v12  ;;  %v2365_v17 = vadd.f32 %v2357_v38, %v2340_v13  ;;  %v2382_v5 = vmul.f32 %v2447_v23, %v4396_v39  ;;  %v2383_v23 = vmul.f32 %v4628_v7, %v4396_v39  ;;  %v2474_v38 = vld [vmem:[#allocation2 + $0x90] sm:$0xff] }
 0x4f9   : > { %v3332_v61 = vpop.eup %3331  ;;  %v2547_v29 = vadd.f32 %v4896_v60, %v2538_v8  ;;  %v2548_v54 = vadd.f32 %v4896_v60, %v2539_v22  ;;  %v2585_v20 = vadd.f32 %v2577_v50, %v4622_v21  ;;  %v2366_v40 = vadd.f32 %v2358_v24, %v2341_v2 }
 0x4fa   : > { %v4651_v44 = vadd.f32 1.0, %v3332_v61  ;;  %v2586_v46 = vadd.f32 %v2578_v28, %v4625_v41  ;;  %v2390_v35 = vadd.f32 %v2382_v5, %v2365_v17  ;;  %v2407_v36 = vmul.f32 %v2472_v56, %v4418_v32  ;;  %v4675_v56 = vld [vmem:[#allocation2 + $0x81] sm:$0xff] }
 0x4fb   : > { %v4656_v15 = vadd.f32 %v2547_v29, %v4901_v30  ;;  %v4659_v51 = vadd.f32 %v2548_v54, %v4902_v18  ;;  %v2408_v3 = vmul.f32 %v4418_v32, %v4649_v25  ;;  %v3122_v9 = vmul.f32 -1.5957692, %v2585_v20  ;;  %v2499_v20 = vld [vmem:[#allocation2 + $0x91] sm:$0xff] }
 0x4fc   : > { %v3334_v6 = vpop.eup %3333  ;;  %3335 = vrcp.f32 %v4651_v44  ;;  %v3123_v16 = vmul.f32 -1.5957692, %v2586_v46  ;;  %v2642_v0 = vand.u32 2147483648, %v4651_v44  ;;  %v2391_v39 = vadd.f32 %v2383_v23, %v2366_v40 }
 0x4fd   : > { %v4667_v47 = vadd.f32 1.0, %v3334_v6  ;;  %v2563_v59 = vmul.f32 %v4656_v15, %v4656_v15  ;;  %v2564_v45 = vmul.f32 %v4659_v51, %v4659_v51  ;;  %v2415_v63 = vadd.f32 %v2407_v36, %v2390_v35 }
 0x4fe   : > { %v2611_v42 = vmul.f32 1.442695, %v3122_v9  ;;  %v2613_v32 = vmul.f32 1.442695, %v3123_v16  ;;  %vm2636_vm5 = vweird.f32 %v4651_v44  ;;  %v2416_v14 = vadd.f32 %v2408_v3, %v2391_v39  ;;  %v2524_v39 = vld [vmem:[#allocation2 + $0x92] sm:$0xff] }
 0x4ff   : > { %3337 = vrcp.f32 %v4667_v47  ;;  %v2571_v27 = vmul.f32 %v2563_v59, %v4656_v15  ;;  %v2572_v11 = vmul.f32 %v2564_v45, %v4659_v51  ;;  %v2432_v37 = vmul.f32 %v4618_v33, %v4887_v53 }
 0x500   : > { %3339 = vpow2.f32 %v2611_v42  ;;  %v2433_v34 = vmul.f32 %v4887_v53, %v4675_v56  ;;  %v2640_v4 = vand.u32 2147483647, %v4651_v44  ;;  %v2643_v13 = vor.u32 1.1754944e-38, %v2642_v0 }
 0x501   : > { %v2579_v49 = vmul.f32 0.044715, %v2571_v27  ;;  %v2580_v58 = vmul.f32 0.044715, %v2572_v11  ;;  %3341 = vpow2.f32 %v2613_v32  ;;  %v2440_v1 = vadd.f32 %v2432_v37, %v2415_v63 }
 0x502   : > { %v3336_v48 = vpop.eup %3335  ;;  %v2441_v33 = vadd.f32 %v2433_v34, %v2416_v14  ;;  %v2655_v2 = vand.u32 2147483647, %v4667_v47  ;;  %v2457_v53 = vmul.f32 %v4628_v7, %v4891_v55  ;;  %v2458_v24 = vmul.f32 %v4891_v55, %v2449_v62 }
 0x503   : > { %v2632_v26 = vmul.f32 %v3336_v48, %v4651_v44  ;;  %v2587_v10 = vadd.f32 %v2579_v49, %v4656_v15  ;;  %v2588_v12 = vadd.f32 %v2580_v58, %v4659_v51  ;;  %vm2637_vm7 = vweird.f32 %v3336_v48 }
 0x504   : > { %v2465_v29 = vadd.f32 %v2457_v53, %v2440_v1  ;;  %v2466_v54 = vadd.f32 %v2458_v24, %v2441_v33  ;;  %v2483_v5 = vmul.f32 %v4893_v43, %v2474_v38  ;;  %v2657_v18 = vand.u32 2147483648, %v4667_v47  ;;  %vm2638_vm9 = vmor %vm2636_vm5, %vm2637_vm7 }
 0x505   : > { %v3338_v8 = vpop.eup %3337  ;;  %v2633_v22 = vsub.f32 1.0, %v2632_v26  ;;  %v3124_v28 = vmul.f32 -1.5957692, %v2587_v10  ;;  %v3125_v17 = vmul.f32 -1.5957692, %v2588_v12  ;;  %v2482_v7 = vmul.f32 %v4893_v43, %v4649_v25 }
 0x506   : > { %v2647_v50 = vmul.f32 %v3338_v8, %v4667_v47  ;;  %v3340_v46 = vpop.eup %3339  ;;  %vm2652_vm8 = vweird.f32 %v3338_v8  ;;  %v2508_v9 = vmul.f32 %v4894_v31, %v2499_v20  ;;  %v2491_v25 = vadd.f32 %v2483_v5, %v2466_v54 }
 0x507   : > { %v2634_v61 = vmul.f32 %v3336_v48, %v2633_v22  ;;  %v2615_v40 = vmul.f32 1.442695, %v3124_v28  ;;  %v3342_v55 = vpop.eup %3341  ;;  %v4697_v6 = vadd.f32 1.0, %v3340_v46  ;;  %v2617_v23 = vmul.f32 1.442695, %v3125_v17 }
 0x508   : > { %v2648_v30 = vsub.f32 1.0, %v2647_v50  ;;  %v4702_v3 = vadd.f32 1.0, %v3342_v55  ;;  %v2490_v43 = vadd.f32 %v2482_v7, %v2465_v29  ;;  %vm2641_vm10 = vcmp.eq.f32.partialorder %v2640_v4, 8.507059e+37 }
 0x509   : > { %v2635_v35 = vadd.f32 %v3336_v48, %v2634_v61  ;;  %3343 = vpow2.f32 %v2615_v40  ;;  %vm2651_vm11 = vweird.f32 %v4667_v47  ;;  %v2658_v44 = vor.u32 1.1754944e-38, %v2657_v18  ;;  %v4904_v61 = vld [vmem:[#allocation12_spill] sm:$0xff] }
 0x50a   : > { %v2649_v36 = vmul.f32 %v3338_v8, %v2648_v30  ;;  %3345 = vrcp.f32 %v4697_v6  ;;  %vm2653_vm12 = vmor %vm2651_vm11, %vm2652_vm8  ;;  %v2507_v0 = vmul.f32 %v4894_v31, %v4675_v56  ;;  %vm2656_vm13 = vcmp.eq.f32.partialorder %v2655_v2, 8.507059e+37  ;;  %v4903_v2 = vld [vmem:[#allocation11_spill] sm:$0xff] }
 0x50b   : > { %v2639_v16 = vsel %vm2638_vm9, %v3336_v48, %v2635_v35  ;;  %3347 = vrcp.f32 %v4702_v3  ;;  %v2516_v27 = vadd.f32 %v2508_v9, %v2491_v25  ;;  %v2532_v11 = vmul.f32 %v4549_v52, %v2449_v62 }
 0x50c   : > { %v2650_v59 = vadd.f32 %v3338_v8, %v2649_v36  ;;  %v2644_v45 = vsel %vm2641_vm10, %v2643_v13, %v2639_v16  ;;  %3349 = vpow2.f32 %v2617_v23  ;;  %v2515_v32 = vadd.f32 %v2507_v0, %v2490_v43 }
 0x50d   : > { %v2751_v47 = vmul.f32 %v2644_v45, %v4586_v19  ;;  %v2533_v48 = vmul.f32 %v4549_v52, %v2524_v39  ;;  %vm2666_vm14 = vweird.f32 %v4697_v6  ;;  %v2672_v10 = vand.u32 2147483648, %v4697_v6 }
 0x50e   : > { %v2654_v63 = vsel %vm2653_vm12, %v3338_v8, %v2650_v59  ;;  %v2540_v31 = vadd.f32 %v2532_v11, %v2515_v32  ;;  %v2687_v22 = vand.u32 2147483648, %v4702_v3  ;;  %v2685_v50 = vand.u32 2147483647, %v4702_v3 }
 0x50f   : > { %v2659_v42 = vsel %vm2656_vm13, %v2658_v44, %v2654_v63  ;;  %v3344_v14 = vpop.eup %3343  ;;  %v2541_v4 = vadd.f32 %v2533_v48, %v2516_v27  ;;  %v2670_v17 = vand.u32 2147483647, %v4697_v6  ;;  %vm2681_vm3 = vweird.f32 %v4702_v3 }
 0x510   : > { %v2752_v37 = vmul.f32 %v2659_v42, %v4599_v57  ;;  %v3346_v49 = vpop.eup %3345  ;;  %v4715_v58 = vadd.f32 1.0, %v3344_v14  ;;  %v2549_v52 = vadd.f32 %v4896_v60, %v2540_v31  ;;  %v2673_v30 = vor.u32 1.1754944e-38, %v2672_v10 }
 0x511   : > { %v3348_v56 = vpop.eup %3347  ;;  %v2662_v26 = vmul.f32 %v3346_v49, %v4697_v6  ;;  %v2550_v38 = vadd.f32 %v4896_v60, %v2541_v4  ;;  %vm2667_vm15 = vweird.f32 %v3346_v49  ;;  %v2688_v18 = vor.u32 1.1754944e-38, %v2687_v22 }
 0x512   : > { %v2759_v34 = vpack.c.bf16 %v2752_v37, %v2751_v47  ;;  %v2677_v1 = vmul.f32 %v3348_v56, %v4702_v3  ;;  %3351 = vrcp.f32 %v4715_v58  ;;  %v3350_v62 = vpop.eup %3349  ;;  %v4729_v53 = vadd.f32 %v2549_v52, %v4903_v2  ;;  %vm4743_vm2 = vmor %vm2666_vm14, %vm2667_vm15 }
 0x513   : > { %v2663_v13 = vsub.f32 1.0, %v2662_v26  ;;  %v4724_v33 = vadd.f32 1.0, %v3350_v62  ;;  %vm2682_vm1 = vweird.f32 %v3348_v56  ;;  %v4735_v29 = vadd.f32 %v2550_v38, %v4904_v61  ;;  %v3200_v26 = vld [vmem:[%s4843_s11 + $0x30] sm:$0xff] }
 0x514   : > { %3136 = vmatmul.msk.bf16.vlgmr.msrb.gmra.mxu2 %vm415_vm0, %v2759_v34  ;;  %v2678_v12 = vsub.f32 1.0, %v2677_v1  ;;  %v2565_v60 = vmul.f32 %v4729_v53, %v4729_v53  ;;  %vm2683_vm4 = vmor %vm2681_vm3, %vm2682_vm1  ;;  %vm2686_vm6 = vcmp.eq.f32.partialorder %v2685_v50, 8.507059e+37  ;;  %vm2671_vm5 = vcmp.eq.f32.partialorder %v2670_v17, 8.507059e+37  ;;  %v3197_v17 = vld [vmem:[%s4843_s11 + $0x18] sm:$0xff] }
 0x515   : > { %v2664_v8 = vmul.f32 %v3346_v49, %v2663_v13  ;;  %3353 = vrcp.f32 %v4724_v33  ;;  %v2566_v55 = vmul.f32 %v4735_v29, %v4735_v29  ;;  %v2717_v37 = vand.u32 2147483648, %v4724_v33 }
 0x516   : > { %v2679_v24 = vmul.f32 %v3348_v56, %v2678_v12  ;;  %v2573_v35 = vmul.f32 %v2565_v60, %v4729_v53  ;;  %vm2711_vm9 = vweird.f32 %v4724_v33  ;;  %v2702_v34 = vand.u32 2147483648, %v4715_v58 }
 0x517   : > { %v2665_v28 = vadd.f32 %v3346_v49, %v2664_v8  ;;  %v2574_v3 = vmul.f32 %v2566_v55, %v4735_v29  ;;  %vm2696_vm11 = vweird.f32 %v4715_v58  ;;  %v2700_v4 = vand.u32 2147483647, %v4715_v58 }
 0x518   : > { %v4739_v54 = vpop.eup %3351  ;;  %v2680_v20 = vadd.f32 %v3348_v56, %v2679_v24  ;;  %v2581_v9 = vmul.f32 0.044715, %v2573_v35  ;;  %v2718_v62 = vor.u32 1.1754944e-38, %v2717_v37  ;;  %v2703_v10 = vor.u32 1.1754944e-38, %v2702_v34  ;;  %v3198_v24 = vld [vmem:[%s4843_s11 + $0x20] sm:$0xff] }
 0x519   : > { %v2669_v46 = vsel %vm4743_vm2, %v3346_v49, %v2665_v28  ;;  %v2692_v40 = vmul.f32 %v4739_v54, %v4715_v58  ;;  %v2582_v59 = vmul.f32 0.044715, %v2574_v3  ;;  %v3201_v49 = vld [vmem:[%s4843_s11 + $0x38] sm:$0xff]  ;;  %vm2697_vm8 = vweird.f32 %v4739_v54 }
 0x51a   : > { %v2684_v7 = vsel %vm2683_vm4, %v3348_v56, %v2680_v20  ;;  %v2674_v36 = vsel %vm2671_vm5, %v2673_v30, %v2669_v46  ;;  %v2589_v45 = vadd.f32 %v2581_v9, %v4729_v53  ;;  %v2715_v56 = vand.u32 2147483647, %v4724_v33  ;;  %2901 = vmatpush.bf16.msrb.mxu3 %v3201_v49  ;;  %vm2698_vm12 = vmor %vm2696_vm11, %vm2697_vm8  ;;  %v3196_v46 = vld [vmem:[%s4843_s11 + $0x10] sm:$0xff] }
 0x51b   : > { %v2689_v6 = vsel %vm2686_vm6, %v2688_v18, %v2684_v7  ;;  %v3354_v23 = vpop.eup %3353  ;;  %v2693_v43 = vsub.f32 1.0, %v2692_v40  ;;  %v2753_v44 = vmul.f32 %v2674_v36, %v4622_v21  ;;  %v2590_v39 = vadd.f32 %v2582_v59, %v4735_v29  ;;  %v3195_v36 = vld [vmem:[%s4843_s11 + $0x8] sm:$0xff] }
 0x51c   : > { %v2754_v16 = vmul.f32 %v2689_v6, %v4625_v41  ;;  %v2707_v25 = vmul.f32 %v3354_v23, %v4724_v33  ;;  %v3126_v63 = vmul.f32 -1.5957692, %v2589_v45  ;;  %vm2712_vm7 = vweird.f32 %v3354_v23  ;;  %v3199_v33 = vld [vmem:[%s4843_s11 + $0x28] sm:$0xff] }
 0x51d   : > { %v2694_v32 = vmul.f32 %v4739_v54, %v2693_v43  ;;  %v3127_v11 = vmul.f32 -1.5957692, %v2590_v39  ;;  %vm2713_vm10 = vmor %vm2711_vm9, %vm2712_vm7  ;;  %vm2716_vm13 = vcmp.eq.f32.partialorder %v2715_v56, 8.507059e+37  ;;  %vm2701_vm14 = vcmp.eq.f32.partialorder %v2700_v4, 8.507059e+37 }
 0x51e   : > { %v2708_v0 = vsub.f32 1.0, %v2707_v25  ;;  %v2760_v42 = vpack.c.bf16 %v2754_v16, %v2753_v44  ;;  %v2619_v14 = vmul.f32 1.442695, %v3126_v63  ;;  %2902 = vmatpush.bf16.msrb.mxu3 %v3200_v26  ;;  %v3194_v63 = vld [vmem:[%s4843_s11] sm:$0xff] }
 0x51f   : > { %v2621_v48 = vmul.f32 1.442695, %v3127_v11  ;;  %v2695_v31 = vadd.f32 %v4739_v54, %v2694_v32  ;;  %v3228_v32 = vld [vmem:[%s4842_s10] ss:$0 sm:$0xff] }
 0x520   : > { %v2709_v27 = vmul.f32 %v3354_v23, %v2708_v0  ;;  %3355 = vpow2.f32 %v2619_v14 }
 0x521   : > { %3357 = vpow2.f32 %v2621_v48  ;;  %v2699_v13 = vsel %vm2698_vm12, %v4739_v54, %v2695_v31 }
 0x522   : > { %v2710_v47 = vadd.f32 %v3354_v23, %v2709_v27  ;;  %v2704_v22 = vsel %vm2701_vm14, %v2703_v10, %v2699_v13  ;;  %2903 = vmatpush.bf16.msrb.mxu3 %v3199_v33 }
 0x523   : > { %v2755_v50 = vmul.f32 %v2704_v22, %v4656_v15 }
 0x524   : > { %3137 = vmatmul.msk.bf16.gmra.mxu2 %vm415_vm0, %v2760_v42  ;;  %v2714_v1 = vsel %vm2713_vm10, %v3354_v23, %v2710_v47 }
 0x525   : > { %v2719_v12 = vsel %vm2716_vm13, %v2718_v62, %v2714_v1 }
 0x526   : > { %v3356_v52 = vpop.eup %3355  ;;  %v2756_v58 = vmul.f32 %v2719_v12, %v4659_v51  ;;  %2904 = vmatpush.bf16.msrb.mxu3 %v3198_v24 }
 0x527   : > { %v2629_v38 = vadd.f32 1.0, %v3356_v52  ;;  %v3358_v8 = vpop.eup %3357 }
 0x528   : > { %v2630_v2 = vadd.f32 1.0, %v3358_v8  ;;  %v2761_v28 = vpack.c.bf16 %v2756_v58, %v2755_v50 }
 0x529   : > { %3359 = vrcp.f32 %v2629_v38  ;;  %v2732_v30 = vand.u32 2147483648, %v2629_v38  ;;  %v2730_v40 = vand.u32 2147483647, %v2629_v38  ;;  %vm2726_vm1 = vweird.f32 %v2629_v38 }
 0x52a   : > { %3361 = vrcp.f32 %v2630_v2  ;;  %2905 = vmatpush.bf16.msrb.mxu3 %v3197_v17  ;;  %v2747_v55 = vand.u32 2147483648, %v2630_v2  ;;  %v2745_v23 = vand.u32 2147483647, %v2630_v2  ;;  %vm2741_vm6 = vweird.f32 %v2630_v2  ;;  %v3371_v17 = vld [vmem:[%s4834_s2] sm:$0x3f] }
 0x52b   : > { %v2733_v3 = vor.u32 1.1754944e-38, %v2732_v30  ;;  %vm2731_vm4 = vcmp.eq.f32.partialorder %v2730_v40, 8.507059e+37 }
 0x52c   : > { %v2748_v25 = vor.u32 1.1754944e-38, %v2747_v55  ;;  %vm2746_vm7 = vcmp.eq.f32.partialorder %v2745_v23, 8.507059e+37 }
 0x52e   : > { %2906 = vmatpush.bf16.msrb.mxu3 %v3196_v46 }
 0x52f   : > { %v3360_v61 = vpop.eup %3359 }
 0x530   : > { %v2722_v60 = vmul.f32 %v3360_v61, %v2629_v38  ;;  %v3362_v54 = vpop.eup %3361  ;;  %vm2727_vm15 = vweird.f32 %v3360_v61 }
 0x531   : > { %v2737_v20 = vmul.f32 %v3362_v54, %v2630_v2  ;;  %vm2742_vm2 = vweird.f32 %v3362_v54  ;;  %vm2728_vm3 = vmor %vm2726_vm1, %vm2727_vm15 }
 0x532   : > { %v2723_v5 = vsub.f32 1.0, %v2722_v60  ;;  %vm2743_vm5 = vmor %vm2741_vm6, %vm2742_vm2  ;;  %2907 = vmatpush.bf16.msrb.mxu3 %v3195_v36 }
 0x533   : > { %v2738_v7 = vsub.f32 1.0, %v2737_v20 }
 0x534   : > { %3138 = vmatmul.msk.bf16.gmra.mxu2 %vm415_vm0, %v2761_v28  ;;  %v2724_v18 = vmul.f32 %v3360_v61, %v2723_v5 }
 0x535   : > { %v2739_v6 = vmul.f32 %v3362_v54, %v2738_v7 }
 0x536   : > { %v2725_v35 = vadd.f32 %v3360_v61, %v2724_v18  ;;  %2908 = vmatpush.bf16.msrb.mxu3 %v3194_v63 }
 0x537   : > { %v2740_v16 = vadd.f32 %v3362_v54, %v2739_v6 }
 0x538   : > { %v2729_v9 = vsel %vm2728_vm3, %v3360_v61, %v2725_v35  ;;  %v2852_v61 = vperm.slane %v3371_v17, 5 }
 0x539   : > { %v2734_v43 = vsel %vm2731_vm4, %v2733_v3, %v2729_v9  ;;  %v2744_v59 = vsel %vm2743_vm5, %v3362_v54, %v2740_v16 }
 0x53a   : > { %v2757_v45 = vmul.f32 %v2734_v43, %v4729_v53  ;;  %v2749_v44 = vsel %vm2746_vm7, %v2748_v25, %v2744_v59 }
 0x53b   : > { %v2758_v0 = vmul.f32 %v2749_v44, %v4735_v29 }
 0x53d   : > { %v2762_v39 = vpack.c.bf16 %v2758_v0, %v2757_v45 }
 0x544   : > { %3139 = vmatmul.msk.bf16.gmra.mxu2 %vm415_vm0, %v2762_v39 }
 0x597   : > { %v2804_v42 = vpop.f32.mrf.mxu2 }
 0x598   : > { %v2805_v27 = vadd.f32 %v3228_v32, %v2804_v42 }
 0x59a   : > { %v2824_v47 = vmax.f32 %v2805_v27, 0.0 }
 0x59f   : > { %v2806_v11 = vpop.f32.mrf.mxu2 }
 0x5a0   : > { %v2807_v14 = vadd.f32 %v3228_v32, %v2806_v11 }
 0x5a2   : > { %v2825_v37 = vmax.f32 %v2807_v14, 0.0 }
 0x5a4   : > { %v2832_v48 = vpack.c.bf16 %v2825_v37, %v2824_v47 }
 0x5a6   : > { %2909 = vmatmul.bf16.vlgmr.msrb.gmra.mxu3 %v2832_v48 }
 0x5a7   : > { %v2809_v49 = vpop.f32.mrf.mxu2 }
 0x5a8   : > { %v2810_v31 = vadd.f32 %v3228_v32, %v2809_v49 }
 0x5aa   : > { %v2826_v26 = vmax.f32 %v2810_v31, 0.0 }
 0x5af   : > { %v2811_v56 = vpop.f32.mrf.mxu2 }
 0x5b0   : > { %v2812_v34 = vadd.f32 %v3228_v32, %v2811_v56 }
 0x5b2   : > { %v2827_v4 = vmax.f32 %v2812_v34, 0.0 }
 0x5b4   : > { %v2833_v1 = vpack.c.bf16 %v2827_v4, %v2826_v26 }
 0x5b6   : > { %2914 = vmatmul.bf16.gmra.mxu3 %v2833_v1 }
 0x5b7   : > { %v2814_v62 = vpop.f32.mrf.mxu2 }
 0x5b8   : > { %v2815_v13 = vadd.f32 %v3228_v32, %v2814_v62 }
 0x5ba   : > { %v2828_v12 = vmax.f32 %v2815_v13, 0.0 }
 0x5bf   : > { %v2816_v52 = vpop.f32.mrf.mxu2 }
 0x5c0   : > { %v2817_v10 = vadd.f32 %v3228_v32, %v2816_v52 }
 0x5c2   : > { %v2829_v33 = vmax.f32 %v2817_v10, 0.0 }
 0x5c4   : > { %v2834_v38 = vpack.c.bf16 %v2829_v33, %v2828_v12 }
 0x5c6   : > { %2919 = vmatmul.bf16.gmra.mxu3 %v2834_v38 }
 0x5c7   : > { %v2819_v8 = vpop.f32.mrf.mxu2 }
 0x5c8   : > { %v2820_v22 = vadd.f32 %v3228_v32, %v2819_v8 }
 0x5ca   : > { %v2830_v24 = vmax.f32 %v2820_v22, 0.0 }
 0x5cf   : > { %v2821_v58 = vpop.f32.mrf.mxu2 }
 0x5d0   : > { %v2822_v2 = vadd.f32 %v3228_v32, %v2821_v58 }
 0x5d2   : > { %v2831_v50 = vmax.f32 %v2822_v2, 0.0 }
 0x5d4   : > { %v2835_v28 = vpack.c.bf16 %v2831_v50, %v2830_v24 }
 0x5d6   : > { %2924 = vmatmul.bf16.gmra.mxu3 %v2835_v28 }
 0x629   : > { %v2910_v60 = vpop.f32.mrf.mxu3 }
 0x62a   : > { %v2911_v54 = vadd.f32 %v2910_v60, %v2852_v61 }
 0x62c   : > { %v2930_v5 = vadd.f32 %v2911_v54, %v4586_v19 }
 0x62e   : > { %2938 = vst.msk [vmem:[%s413_s14] sm:$0xff] %vm415_vm0, %v2930_v5 }
 0x631   : > { %v2912_v20 = vpop.f32.mrf.mxu3 }
 0x632   : > { %v2913_v46 = vadd.f32 %v2912_v20, %v2852_v61 }
 0x634   : > { %v2931_v30 = vadd.f32 %v2913_v46, %v4599_v57 }
 0x636   : > { %2939 = vst.msk [vmem:[%s413_s14 + $0x8] sm:$0xff] %vm415_vm0, %v2931_v30 }
 0x639   : > { %v2915_v18 = vpop.f32.mrf.mxu3 }
 0x63a   : > { %v2916_v40 = vadd.f32 %v2915_v18, %v2852_v61 }
 0x63c   : > { %v2932_v7 = vadd.f32 %v2916_v40, %v4622_v21 }
 0x63e   : > { %2940 = vst.msk [vmem:[%s413_s14 + $0x10] sm:$0xff] %vm415_vm0, %v2932_v7 }
 0x641   : > { %v2917_v55 = vpop.f32.mrf.mxu3 }
 0x642   : > { %v2918_v35 = vadd.f32 %v2917_v55, %v2852_v61 }
 0x644   : > { %v2933_v6 = vadd.f32 %v2918_v35, %v4625_v41 }
 0x646   : > { %2941 = vst.msk [vmem:[%s413_s14 + $0x18] sm:$0xff] %vm415_vm0, %v2933_v6 }
 0x649   : > { %v2920_v19 = vpop.f32.mrf.mxu3 }
 0x64a   : > { %v2921_v23 = vadd.f32 %v2920_v19, %v2852_v61 }
 0x64c   : > { %v2934_v36 = vadd.f32 %v2921_v23, %v4656_v15 }
 0x64e   : > { %2942 = vst.msk [vmem:[%s413_s14 + $0x20] sm:$0xff] %vm415_vm0, %v2934_v36 }
 0x651   : > { %v2922_v57 = vpop.f32.mrf.mxu3 }
 0x652   : > { %v2923_v3 = vadd.f32 %v2922_v57, %v2852_v61 }
 0x654   : > { %v2935_v9 = vadd.f32 %v2923_v3, %v4659_v51 }
 0x656   : > { %2943 = vst.msk [vmem:[%s413_s14 + $0x28] sm:$0xff] %vm415_vm0, %v2935_v9 }
 0x659   : > { %v2925_v21 = vpop.f32.mrf.mxu3 }
 0x65a   : > { %v2926_v16 = vadd.f32 %v2925_v21, %v2852_v61 }
 0x65c   : > { %v2936_v43 = vadd.f32 %v2926_v16, %v4729_v53 }
 0x65e   : > { %2944 = vst.msk [vmem:[%s413_s14 + $0x30] sm:$0xff] %vm415_vm0, %v2936_v43 }
 0x661   : > { %v2927_v41 = vpop.f32.mrf.mxu3 }
 0x662   : > { %v2928_v25 = vadd.f32 %v2927_v41, %v2852_v61 }
 0x664   : > { %v2937_v59 = vadd.f32 %v2928_v25, %v4735_v29 }
 0x666   : > { %2945 = vst.msk [vmem:[%s413_s14 + $0x38] sm:$0xff] %vm415_vm0, %v2937_v59 }
 0x667 PF: > { %s22_s21 = sadd.s32 1, %s3378_s21  }
 0x668   : > { %p19_p4 = scmp.ge.s32.totalorder %s22_s21, 4  }
 0x66a   :  { %21 = sbr.rel (!%p19_p4) target bundleno = 1 (0x1), region = 104 }

</bundles_post_ra>
